<compile_context>
chip_gen: v5e
topology: v5e:2x2
jax: 0.10.0
libtpu: 0.0.40
codegen_flags: <defaults>
</compile_context>

<pallas_src>
import math

import jax
import jax.numpy as jnp
from jax.experimental import pallas as pl
from jax.experimental.pallas import tpu as pltpu  # noqa: F401  (kept for parity)

# ----------------------------- tiny BERT config -----------------------------
VOCAB = 100
HIDDEN = 32
HEADS = 4
HEAD_DIM = HIDDEN // HEADS
INTER = 64
LAYERS = 2
MAX_POS = 16
LN_EPS = 1e-12

BATCH = 2
SEQ = 8
M = BATCH * SEQ

# ------------------------- packed-parameter layout ---------------------------
# Vector slab: every 1-row vector (biases / LN params) + (pos+type) embedding
# rows, packed into one [N_VEC_ROWS, 3*HIDDEN] f32 array.
VEC_COLS = 3 * HIDDEN                      # 96
ROW_EMB_LN = 0                             # [0:32]=gamma, [32:64]=beta
ROW_POSTYPE = 1                            # rows 1..1+MAX_POS, cols [0:32]
ROW_LAYER0 = ROW_POSTYPE + MAX_POS         # 17
ROWS_PER_LAYER = 4
#   per layer l, base = ROW_LAYER0 + 4*l:
#     base+0: bqkv            [0:96]
#     base+1: bo [0:32], ln1_g [32:64], ln1_b [64:96]
#     base+2: bi [0:64], bo2 [64:96]
#     base+3: ln2_g [0:32], ln2_b [32:64]
ROW_CQKV = ROW_LAYER0 + ROWS_PER_LAYER * LAYERS   # custom-attn bqkv  [0:96]
ROW_POOL = ROW_CQKV + 1                           # pooler bias       [0:32]
N_VEC_ROWS = ROW_POOL + 1                         # 27

# Weight slabs (one per class, leading layer dim; last index = custom/pooler):
#   wqkv_slab [LAYERS+1, 32, 96]   (encoder layers + CustomSelfAttention)
#   wo_slab   [LAYERS+1, 32, 32]   (attention output dense; last = pooler dense)
#   wi_slab   [LAYERS,   32, 64]
#   wo2_slab  [LAYERS,   64, 32]


# ------------------------------ fused kernel --------------------------------
def _fused_bert_kernel(
    # inputs
    ids_ref, mask_ref, gab_ref, word_emb_ref,
    vec_ref, wqkv_ref, wo_ref, wi_ref, wo2_ref,
    # outputs
    seq_ref, pooled_ref,
):
    scale = 1.0 / math.sqrt(HEAD_DIM)
    vec = vec_ref[...]                                   # [27, 96] tiny, in regs
    mask = mask_ref[...]                                 # [B, S] raw mask bias

    # Key-dim mask biases, built ONCE and reused by every attention block.
    mask_full = jnp.concatenate(                         # [B*H*S, S]
        [jnp.broadcast_to(mask[b:b + 1, :], (HEADS * SEQ, SEQ)) for b in range(BATCH)],
        axis=0)
    mask_cls = jnp.concatenate(                          # [B*H, S]
        [jnp.broadcast_to(mask[b:b + 1, :], (HEADS, SEQ)) for b in range(BATCH)],
        axis=0)

    def layer_norm(x, g, b):
        mu = jnp.mean(x, axis=-1, keepdims=True)
        var = jnp.mean(jnp.square(x - mu), axis=-1, keepdims=True)
        return (x - mu) * jax.lax.rsqrt(var + LN_EPS) * g + b

    def softmax_rows(s):
        # one batched max / exp / sum / approx-reciprocal for all heads
        p = jnp.exp(s - jnp.max(s, axis=-1, keepdims=True))
        return p * pl.reciprocal(jnp.sum(p, axis=-1, keepdims=True), approx=True)

    def mha_full(x, wqkv, bqkv):
        # Fused QKV projection: one [M,32]@[32,96] matmul.
        qkv = jnp.dot(x, wqkv, preferred_element_type=jnp.float32) + bqkv   # [M, 3H]
        # Scores for all (batch, head) pairs, stacked along sublanes.
        s_list = []
        for b in range(BATCH):
            r0 = b * SEQ
            for h in range(HEADS):
                c0 = h * HEAD_DIM
                q = qkv[r0:r0 + SEQ, c0:c0 + HEAD_DIM]
                k = qkv[r0:r0 + SEQ, HIDDEN + c0:HIDDEN + c0 + HEAD_DIM]
                s_list.append(jax.lax.dot_general(
                    q, k, (((1,), (1,)), ((), ())),
                    preferred_element_type=jnp.float32))                    # [S, S]
        p = softmax_rows(jnp.concatenate(s_list, axis=0) * scale + mask_full)
        # Per-head P@V kept in registers; heads / batches concatenated.
        rows = []
        for b in range(BATCH):
            r0 = b * SEQ
            heads = []
            for h in range(HEADS):
                idx = b * HEADS + h
                c0 = h * HEAD_DIM
                v = qkv[r0:r0 + SEQ, 2 * HIDDEN + c0:2 * HIDDEN + c0 + HEAD_DIM]
                heads.append(jnp.dot(p[idx * SEQ:(idx + 1) * SEQ, :], v,
                                     preferred_element_type=jnp.float32))   # [S, Dh]
            rows.append(jnp.concatenate(heads, axis=1))                     # [S, H]
        return jnp.concatenate(rows, axis=0)                                # [M, H]

    # --- BertEmbeddings: one-hot MXU gather + pos/type add + LayerNorm ---
    ids = ids_ref[...]                                                      # [M, 1] i32
    onehot = jnp.where(
        jax.lax.broadcasted_iota(jnp.int32, (M, VOCAB), 1) == ids, 1.0, 0.0
    ).astype(jnp.float32)                                                   # [M, VOCAB]
    emb = jnp.dot(onehot, word_emb_ref[...], preferred_element_type=jnp.float32)
    postype = vec[ROW_POSTYPE:ROW_POSTYPE + SEQ, 0:HIDDEN]                  # [S, H]
    emb = emb + jnp.concatenate([postype] * BATCH, axis=0)
    x = layer_norm(emb,
                   vec[ROW_EMB_LN:ROW_EMB_LN + 1, 0:HIDDEN],
                   vec[ROW_EMB_LN:ROW_EMB_LN + 1, HIDDEN:2 * HIDDEN])

    # --- BertEncoder: LAYERS x BertLayer, statically unrolled ---
    for l in range(LAYERS):
        r = ROW_LAYER0 + ROWS_PER_LAYER * l
        ctx = mha_full(x, wqkv_ref[l], vec[r:r + 1, :])
        attn = (jnp.dot(ctx, wo_ref[l], preferred_element_type=jnp.float32)
                + vec[r + 1:r + 2, 0:HIDDEN])
        x1 = layer_norm(attn + x,
                        vec[r + 1:r + 2, HIDDEN:2 * HIDDEN],
                        vec[r + 1:r + 2, 2 * HIDDEN:3 * HIDDEN])            # res + LN
        inter = (jnp.dot(x1, wi_ref[l], preferred_element_type=jnp.float32)
                 + vec[r + 2:r + 3, 0:INTER])
        inter = jax.nn.gelu(inter, approximate=True)  # TODO(synk): erf-GELU exact match
        out = (jnp.dot(inter, wo2_ref[l], preferred_element_type=jnp.float32)
               + vec[r + 2:r + 3, INTER:INTER + HIDDEN])
        x = layer_norm(out + x1,
                       vec[r + 3:r + 4, 0:HIDDEN],
                       vec[r + 3:r + 4, HIDDEN:2 * HIDDEN])                 # res + LN

    seq_ref[...] = x                               # encoder last hidden state (output 1)

    # --- CustomSelfAttention restricted to CLS-query rows + BertPooler ---
    # Only rows {0, SEQ} of the custom attention output reach any kernel output.
    qkv = (jnp.dot(x, wqkv_ref[LAYERS], preferred_element_type=jnp.float32)
           + vec[ROW_CQKV:ROW_CQKV + 1, :])                                 # [M, 3H]
    s_list = []
    for b in range(BATCH):
        r0 = b * SEQ
        for h in range(HEADS):
            c0 = h * HEAD_DIM
            q = qkv[r0:r0 + 1, c0:c0 + HEAD_DIM]                            # CLS query only
            k = qkv[r0:r0 + SEQ, HIDDEN + c0:HIDDEN + c0 + HEAD_DIM]
            s_list.append(jax.lax.dot_general(
                q, k, (((1,), (1,)), ((), ())),
                preferred_element_type=jnp.float32))                        # [1, S]
    p = softmax_rows(jnp.concatenate(s_list, axis=0) * scale + mask_cls)    # [B*H, S]
    rows = []
    for b in range(BATCH):
        r0 = b * SEQ
        heads = []
        for h in range(HEADS):
            idx = b * HEADS + h
            c0 = h * HEAD_DIM
            v = qkv[r0:r0 + SEQ, 2 * HIDDEN + c0:2 * HIDDEN + c0 + HEAD_DIM]
            heads.append(jnp.dot(p[idx:idx + 1, :], v,
                                 preferred_element_type=jnp.float32))       # [1, Dh]
        rows.append(jnp.concatenate(heads, axis=1))                         # [1, H]
    cls_ctx = jnp.concatenate(rows, axis=0)                                 # [B, H]
    # gabriel_mask is broadcast over batch; only its token-0 row touches this path.
    cls_ctx = cls_ctx + gab_ref[0:1, :]

    # BertPooler: dense + tanh; single [B, H] store.
    pooled_ref[...] = jnp.tanh(
        jnp.dot(cls_ctx, wo_ref[LAYERS], preferred_element_type=jnp.float32)
        + vec[ROW_POOL:ROW_POOL + 1, 0:HIDDEN])


# ------------------------------ forward wrapper ------------------------------
def bert_forward(params, input_ids, attention_mask, gabriel_mask):
    B, S = input_ids.shape
    m = B * S
    ids = input_ids.reshape(m, 1).astype(jnp.int32)
    mask = attention_mask.astype(jnp.float32)
    gab = gabriel_mask.reshape(S, HIDDEN).astype(jnp.float32)

    seq, pooled = pl.pallas_call(
        _fused_bert_kernel,
        out_shape=(jax.ShapeDtypeStruct((m, HIDDEN), jnp.float32),   # last hidden
                   jax.ShapeDtypeStruct((B, HIDDEN), jnp.float32)),  # pooled
    )(ids, mask, gab, params["word_emb"],
      params["vec_slab"], params["wqkv_slab"], params["wo_slab"],
      params["wi_slab"], params["wo2_slab"])

    # ModifiedBertModel.forward returns (pooled_output, encoder_outputs)
    return pooled, seq.reshape(B, S, HIDDEN)


# ----------------------------- parameter init -------------------------------
def init_params(key):
    keys = iter(jax.random.split(key, 64))

    def dense(n_in, n_out):
        w = jax.random.normal(next(keys), (n_in, n_out), jnp.float32) * 0.02
        b = jax.random.normal(next(keys), (n_out,), jnp.float32) * 0.02
        return w, b

    def qkv_block():
        wq, bq = dense(HIDDEN, HIDDEN)
        wk, bk = dense(HIDDEN, HIDDEN)
        wv, bv = dense(HIDDEN, HIDDEN)
        return (jnp.concatenate([wq, wk, wv], axis=1),     # [H, 3H]
                jnp.concatenate([bq, bk, bv]))             # [3H]

    word_emb = jax.random.normal(next(keys), (VOCAB, HIDDEN), jnp.float32) * 0.02
    pos_emb = jax.random.normal(next(keys), (MAX_POS, HIDDEN), jnp.float32) * 0.02
    type_emb = jax.random.normal(next(keys), (2, HIDDEN), jnp.float32) * 0.02

    ones = jnp.ones((HIDDEN,), jnp.float32)
    vec = jnp.zeros((N_VEC_ROWS, VEC_COLS), jnp.float32)
    vec = vec.at[ROW_EMB_LN, 0:HIDDEN].set(ones)                       # emb LN gamma
    vec = vec.at[ROW_POSTYPE:ROW_POSTYPE + MAX_POS, 0:HIDDEN].set(pos_emb + type_emb[0])

    wqkv_list, wo_list, wi_list, wo2_list = [], [], [], []
    for l in range(LAYERS):
        r = ROW_LAYER0 + ROWS_PER_LAYER * l
        wqkv, bqkv = qkv_block()
        wo, bo = dense(HIDDEN, HIDDEN)
        wi, bi = dense(HIDDEN, INTER)
        wo2, bo2 = dense(INTER, HIDDEN)
        wqkv_list.append(wqkv); wo_list.append(wo)
        wi_list.append(wi); wo2_list.append(wo2)
        vec = vec.at[r, :].set(bqkv)
        vec = vec.at[r + 1, 0:HIDDEN].set(bo)
        vec = vec.at[r + 1, HIDDEN:2 * HIDDEN].set(ones)               # ln1 gamma
        vec = vec.at[r + 2, 0:INTER].set(bi)
        vec = vec.at[r + 2, INTER:INTER + HIDDEN].set(bo2)
        vec = vec.at[r + 3, 0:HIDDEN].set(ones)                        # ln2 gamma

    c_wqkv, c_bqkv = qkv_block()
    pool_w, pool_b = dense(HIDDEN, HIDDEN)
    wqkv_list.append(c_wqkv)            # custom self-attention QKV
    wo_list.append(pool_w)              # pooler dense
    vec = vec.at[ROW_CQKV, :].set(c_bqkv)
    vec = vec.at[ROW_POOL, 0:HIDDEN].set(pool_b)

    return dict(
        word_emb=word_emb,
        vec_slab=vec,                                   # [27, 96]
        wqkv_slab=jnp.stack(wqkv_list, axis=0),         # [LAYERS+1, 32, 96]
        wo_slab=jnp.stack(wo_list, axis=0),             # [LAYERS+1, 32, 32]
        wi_slab=jnp.stack(wi_list, axis=0),             # [LAYERS, 32, 64]
        wo2_slab=jnp.stack(wo2_list, axis=0),           # [LAYERS, 64, 32]
    )


# ---------------------------------- main -------------------------------------
if __name__ == "__main__":
    key = jax.random.PRNGKey(0)
    k_param, k_ids = jax.random.split(key)

    params = init_params(k_param)

    input_ids = jax.random.randint(k_ids, (BATCH, SEQ), 0, VOCAB, dtype=jnp.int32)
    attention_mask = jnp.ones((BATCH, SEQ), jnp.float32)
    # analogue of the reference gabriel_mask: single 1.0 at position [0, 1, 1]
    gabriel_mask = jnp.zeros((1, SEQ, HIDDEN), jnp.float32).at[0, 1, 1].set(1.0)

    fwd = jax.jit(bert_forward)
    pooled, seq_out = fwd(params, input_ids, attention_mask, gabriel_mask)
    pooled = jax.block_until_ready(pooled)
    seq_out = jax.block_until_ready(seq_out)

    assert pooled.shape == (BATCH, HIDDEN), pooled.shape
    assert seq_out.shape == (BATCH, SEQ, HIDDEN), seq_out.shape
    assert bool(jnp.all(jnp.isfinite(pooled))) and bool(jnp.all(jnp.isfinite(seq_out)))
    print("KERNEL_OK")
</pallas_src>

<mosaic_0001>
module attributes {stable_mosaic.version = 11 : i64} {
  func.func @_fused_bert_kernel(%arg0: memref<16x1xi32, #tpu.memory_space<vmem>>, %arg1: memref<2x8xf32, #tpu.memory_space<vmem>>, %arg2: memref<8x32xf32, #tpu.memory_space<vmem>>, %arg3: memref<100x32xf32, #tpu.memory_space<vmem>>, %arg4: memref<27x96xf32, #tpu.memory_space<vmem>>, %arg5: memref<3x32x96xf32, #tpu.memory_space<vmem>>, %arg6: memref<3x32x32xf32, #tpu.memory_space<vmem>>, %arg7: memref<2x32x64xf32, #tpu.memory_space<vmem>>, %arg8: memref<2x64x32xf32, #tpu.memory_space<vmem>>, %arg9: memref<16x32xf32, #tpu.memory_space<vmem>>, %arg10: memref<2x32xf32, #tpu.memory_space<vmem>>) attributes {dimension_semantics = [], scalar_prefetch = 0 : i64, scratch_operands = 0 : i64, tpu.core_type = #tpu.core_type<tc>} {
    %c0 = arith.constant 0 : index
    %c0_0 = arith.constant 0 : index
    %0 = vector.load %arg4[%c0, %c0_0] : memref<27x96xf32, #tpu.memory_space<vmem>>, vector<27x96xf32>
    %c0_1 = arith.constant 0 : index
    %c0_2 = arith.constant 0 : index
    %1 = vector.load %arg1[%c0_1, %c0_2] : memref<2x8xf32, #tpu.memory_space<vmem>>, vector<2x8xf32>
    %2 = vector.extract_strided_slice %1 {offsets = [0, 0], sizes = [1, 8], strides = [1, 1]} : vector<2x8xf32> to vector<1x8xf32>
    %3 = vector.shape_cast %2 : vector<1x8xf32> to vector<1x8xf32>
    %4 = vector.broadcast %3 : vector<1x8xf32> to vector<32x8xf32>
    %5 = vector.extract_strided_slice %1 {offsets = [1, 0], sizes = [1, 8], strides = [1, 1]} : vector<2x8xf32> to vector<1x8xf32>
    %6 = vector.shape_cast %5 : vector<1x8xf32> to vector<1x8xf32>
    %7 = vector.broadcast %6 : vector<1x8xf32> to vector<32x8xf32>
    %8 = tpu.concatenate %4, %7 in 0 : vector<32x8xf32>, vector<32x8xf32> -> vector<64x8xf32>
    %9 = vector.extract_strided_slice %1 {offsets = [0, 0], sizes = [1, 8], strides = [1, 1]} : vector<2x8xf32> to vector<1x8xf32>
    %10 = vector.shape_cast %9 : vector<1x8xf32> to vector<1x8xf32>
    %11 = vector.broadcast %10 : vector<1x8xf32> to vector<4x8xf32>
    %12 = vector.extract_strided_slice %1 {offsets = [1, 0], sizes = [1, 8], strides = [1, 1]} : vector<2x8xf32> to vector<1x8xf32>
    %13 = vector.shape_cast %12 : vector<1x8xf32> to vector<1x8xf32>
    %14 = vector.broadcast %13 : vector<1x8xf32> to vector<4x8xf32>
    %15 = tpu.concatenate %11, %14 in 0 : vector<4x8xf32>, vector<4x8xf32> -> vector<8x8xf32>
    %c0_3 = arith.constant 0 : index
    %c0_4 = arith.constant 0 : index
    %16 = vector.load %arg0[%c0_3, %c0_4] : memref<16x1xi32, #tpu.memory_space<vmem>>, vector<16x1xi32>
    %17 = tpu.iota {dimensions = array<i32: 1>} : vector<16x100xi32>
    %18 = vector.broadcast %16 : vector<16x1xi32> to vector<16x100xi32>
    %19 = arith.cmpi eq, %17, %18 : vector<16x100xi32>
    %cst = arith.constant 1.000000e+00 : f32
    %cst_5 = arith.constant 0.000000e+00 : f32
    %20 = vector.broadcast %cst : f32 to vector<16x100xf32>
    %21 = vector.broadcast %cst_5 : f32 to vector<16x100xf32>
    %22 = arith.select %19, %20, %21 : vector<16x100xi1>, vector<16x100xf32>
    %c0_6 = arith.constant 0 : index
    %c0_7 = arith.constant 0 : index
    %23 = vector.load %arg3[%c0_6, %c0_7] : memref<100x32xf32, #tpu.memory_space<vmem>>, vector<100x32xf32>
    %cst_8 = arith.constant dense<0.000000e+00> : vector<16x32xf32>
    %24 = tpu.matmul %22, %23, %cst_8 {dimension_numbers = #tpu.dot_dimension_numbers<[1], [0], [0], [1], [0, 0, 1, 1], [], []>} : vector<16x100xf32>, vector<100x32xf32>, vector<16x32xf32> -> vector<16x32xf32>
    %25 = vector.extract_strided_slice %0 {offsets = [1, 0], sizes = [8, 32], strides = [1, 1]} : vector<27x96xf32> to vector<8x32xf32>
    %26 = tpu.concatenate %25, %25 in 0 : vector<8x32xf32>, vector<8x32xf32> -> vector<16x32xf32>
    %27 = arith.addf %24, %26 : vector<16x32xf32>
    %28 = vector.extract_strided_slice %0 {offsets = [0, 0], sizes = [1, 32], strides = [1, 1]} : vector<27x96xf32> to vector<1x32xf32>
    %29 = vector.extract_strided_slice %0 {offsets = [0, 32], sizes = [1, 32], strides = [1, 1]} : vector<27x96xf32> to vector<1x32xf32>
    %cst_9 = arith.constant dense<0.000000e+00> : vector<16xf32>
    %30 = vector.multi_reduction <add>, %27, %cst_9 [1] : vector<16x32xf32> to vector<16xf32>
    %31 = vector.shape_cast %30 : vector<16xf32> to vector<16x1xf32>
    %cst_10 = arith.constant 3.200000e+01 : f32
    %32 = vector.broadcast %cst_10 : f32 to vector<16x1xf32>
    %33 = arith.divf %31, %32 : vector<16x1xf32>
    %34 = vector.broadcast %33 : vector<16x1xf32> to vector<16x32xf32>
    %35 = arith.subf %27, %34 : vector<16x32xf32>
    %36 = arith.mulf %35, %35 : vector<16x32xf32>
    %cst_11 = arith.constant dense<0.000000e+00> : vector<16xf32>
    %37 = vector.multi_reduction <add>, %36, %cst_11 [1] : vector<16x32xf32> to vector<16xf32>
    %38 = vector.shape_cast %37 : vector<16xf32> to vector<16x1xf32>
    %cst_12 = arith.constant 3.200000e+01 : f32
    %39 = vector.broadcast %cst_12 : f32 to vector<16x1xf32>
    %40 = arith.divf %38, %39 : vector<16x1xf32>
    %41 = vector.broadcast %33 : vector<16x1xf32> to vector<16x32xf32>
    %42 = arith.subf %27, %41 : vector<16x32xf32>
    %cst_13 = arith.constant 9.99999996E-13 : f32
    %43 = vector.broadcast %cst_13 : f32 to vector<16x1xf32>
    %44 = arith.addf %40, %43 : vector<16x1xf32>
    %45 = math.rsqrt %44 : vector<16x1xf32>
    %46 = vector.broadcast %45 : vector<16x1xf32> to vector<16x32xf32>
    %47 = arith.mulf %42, %46 : vector<16x32xf32>
    %48 = vector.broadcast %28 : vector<1x32xf32> to vector<16x32xf32>
    %49 = arith.mulf %47, %48 : vector<16x32xf32>
    %50 = vector.broadcast %29 : vector<1x32xf32> to vector<16x32xf32>
    %51 = arith.addf %49, %50 : vector<16x32xf32>
    %c0_14 = arith.constant 0 : index
    %c0_15 = arith.constant 0 : index
    %c0_16 = arith.constant 0 : index
    %52 = vector.load %arg5[%c0_14, %c0_15, %c0_16] : memref<3x32x96xf32, #tpu.memory_space<vmem>>, vector<1x32x96xf32>
    %53 = vector.shape_cast %52 : vector<1x32x96xf32> to vector<32x96xf32>
    %54 = vector.extract_strided_slice %0 {offsets = [17, 0], sizes = [1, 96], strides = [1, 1]} : vector<27x96xf32> to vector<1x96xf32>
    %cst_17 = arith.constant dense<0.000000e+00> : vector<16x96xf32>
    %55 = tpu.matmul %51, %53, %cst_17 {dimension_numbers = #tpu.dot_dimension_numbers<[1], [0], [0], [1], [0, 0, 1, 1], [], []>} : vector<16x32xf32>, vector<32x96xf32>, vector<16x96xf32> -> vector<16x96xf32>
    %56 = vector.broadcast %54 : vector<1x96xf32> to vector<16x96xf32>
    %57 = arith.addf %55, %56 : vector<16x96xf32>
    %58 = vector.extract_strided_slice %57 {offsets = [0, 0], sizes = [8, 8], strides = [1, 1]} : vector<16x96xf32> to vector<8x8xf32>
    %59 = vector.extract_strided_slice %57 {offsets = [0, 32], sizes = [8, 8], strides = [1, 1]} : vector<16x96xf32> to vector<8x8xf32>
    %cst_18 = arith.constant dense<0.000000e+00> : vector<8x8xf32>
    %60 = tpu.matmul %58, %59, %cst_18 {dimension_numbers = #tpu.dot_dimension_numbers<[1], [1], [0], [0], [0, 0, 1, 0], [], []>} : vector<8x8xf32>, vector<8x8xf32>, vector<8x8xf32> -> vector<8x8xf32>
    %61 = vector.extract_strided_slice %57 {offsets = [0, 8], sizes = [8, 8], strides = [1, 1]} : vector<16x96xf32> to vector<8x8xf32>
    %62 = vector.extract_strided_slice %57 {offsets = [0, 40], sizes = [8, 8], strides = [1, 1]} : vector<16x96xf32> to vector<8x8xf32>
    %cst_19 = arith.constant dense<0.000000e+00> : vector<8x8xf32>
    %63 = tpu.matmul %61, %62, %cst_19 {dimension_numbers = #tpu.dot_dimension_numbers<[1], [1], [0], [0], [0, 0, 1, 0], [], []>} : vector<8x8xf32>, vector<8x8xf32>, vector<8x8xf32> -> vector<8x8xf32>
    %64 = vector.extract_strided_slice %57 {offsets = [0, 16], sizes = [8, 8], strides = [1, 1]} : vector<16x96xf32> to vector<8x8xf32>
    %65 = vector.extract_strided_slice %57 {offsets = [0, 48], sizes = [8, 8], strides = [1, 1]} : vector<16x96xf32> to vector<8x8xf32>
    %cst_20 = arith.constant dense<0.000000e+00> : vector<8x8xf32>
    %66 = tpu.matmul %64, %65, %cst_20 {dimension_numbers = #tpu.dot_dimension_numbers<[1], [1], [0], [0], [0, 0, 1, 0], [], []>} : vector<8x8xf32>, vector<8x8xf32>, vector<8x8xf32> -> vector<8x8xf32>
    %67 = vector.extract_strided_slice %57 {offsets = [0, 24], sizes = [8, 8], strides = [1, 1]} : vector<16x96xf32> to vector<8x8xf32>
    %68 = vector.extract_strided_slice %57 {offsets = [0, 56], sizes = [8, 8], strides = [1, 1]} : vector<16x96xf32> to vector<8x8xf32>
    %cst_21 = arith.constant dense<0.000000e+00> : vector<8x8xf32>
    %69 = tpu.matmul %67, %68, %cst_21 {dimension_numbers = #tpu.dot_dimension_numbers<[1], [1], [0], [0], [0, 0, 1, 0], [], []>} : vector<8x8xf32>, vector<8x8xf32>, vector<8x8xf32> -> vector<8x8xf32>
    %70 = vector.extract_strided_slice %57 {offsets = [8, 0], sizes = [8, 8], strides = [1, 1]} : vector<16x96xf32> to vector<8x8xf32>
    %71 = vector.extract_strided_slice %57 {offsets = [8, 32], sizes = [8, 8], strides = [1, 1]} : vector<16x96xf32> to vector<8x8xf32>
    %cst_22 = arith.constant dense<0.000000e+00> : vector<8x8xf32>
    %72 = tpu.matmul %70, %71, %cst_22 {dimension_numbers = #tpu.dot_dimension_numbers<[1], [1], [0], [0], [0, 0, 1, 0], [], []>} : vector<8x8xf32>, vector<8x8xf32>, vector<8x8xf32> -> vector<8x8xf32>
    %73 = vector.extract_strided_slice %57 {offsets = [8, 8], sizes = [8, 8], strides = [1, 1]} : vector<16x96xf32> to vector<8x8xf32>
    %74 = vector.extract_strided_slice %57 {offsets = [8, 40], sizes = [8, 8], strides = [1, 1]} : vector<16x96xf32> to vector<8x8xf32>
    %cst_23 = arith.constant dense<0.000000e+00> : vector<8x8xf32>
    %75 = tpu.matmul %73, %74, %cst_23 {dimension_numbers = #tpu.dot_dimension_numbers<[1], [1], [0], [0], [0, 0, 1, 0], [], []>} : vector<8x8xf32>, vector<8x8xf32>, vector<8x8xf32> -> vector<8x8xf32>
    %76 = vector.extract_strided_slice %57 {offsets = [8, 16], sizes = [8, 8], strides = [1, 1]} : vector<16x96xf32> to vector<8x8xf32>
    %77 = vector.extract_strided_slice %57 {offsets = [8, 48], sizes = [8, 8], strides = [1, 1]} : vector<16x96xf32> to vector<8x8xf32>
    %cst_24 = arith.constant dense<0.000000e+00> : vector<8x8xf32>
    %78 = tpu.matmul %76, %77, %cst_24 {dimension_numbers = #tpu.dot_dimension_numbers<[1], [1], [0], [0], [0, 0, 1, 0], [], []>} : vector<8x8xf32>, vector<8x8xf32>, vector<8x8xf32> -> vector<8x8xf32>
    %79 = vector.extract_strided_slice %57 {offsets = [8, 24], sizes = [8, 8], strides = [1, 1]} : vector<16x96xf32> to vector<8x8xf32>
    %80 = vector.extract_strided_slice %57 {offsets = [8, 56], sizes = [8, 8], strides = [1, 1]} : vector<16x96xf32> to vector<8x8xf32>
    %cst_25 = arith.constant dense<0.000000e+00> : vector<8x8xf32>
    %81 = tpu.matmul %79, %80, %cst_25 {dimension_numbers = #tpu.dot_dimension_numbers<[1], [1], [0], [0], [0, 0, 1, 0], [], []>} : vector<8x8xf32>, vector<8x8xf32>, vector<8x8xf32> -> vector<8x8xf32>
    %82 = tpu.concatenate %60, %63, %66, %69, %72, %75, %78, %81 in 0 : vector<8x8xf32>, vector<8x8xf32>, vector<8x8xf32>, vector<8x8xf32>, vector<8x8xf32>, vector<8x8xf32>, vector<8x8xf32>, vector<8x8xf32> -> vector<64x8xf32>
    %cst_26 = arith.constant 0.353553385 : f32
    %83 = vector.broadcast %cst_26 : f32 to vector<64x8xf32>
    %84 = arith.mulf %82, %83 : vector<64x8xf32>
    %85 = arith.addf %84, %8 : vector<64x8xf32>
    %cst_27 = arith.constant dense<0xFF800000> : vector<64xf32>
    %86 = vector.multi_reduction <maximumf>, %85, %cst_27 [1] : vector<64x8xf32> to vector<64xf32>
    %87 = vector.shape_cast %86 : vector<64xf32> to vector<64x1xf32>
    %88 = vector.broadcast %87 : vector<64x1xf32> to vector<64x8xf32>
    %89 = arith.subf %85, %88 : vector<64x8xf32>
    %90 = math.exp %89 : vector<64x8xf32>
    %cst_28 = arith.constant dense<0.000000e+00> : vector<64xf32>
    %91 = vector.multi_reduction <add>, %90, %cst_28 [1] : vector<64x8xf32> to vector<64xf32>
    %92 = vector.shape_cast %91 : vector<64xf32> to vector<64x1xf32>
    %93 = tpu.reciprocal %92 {approx = true} : vector<64x1xf32> -> vector<64x1xf32>
    %94 = vector.broadcast %93 : vector<64x1xf32> to vector<64x8xf32>
    %95 = arith.mulf %90, %94 : vector<64x8xf32>
    %96 = vector.extract_strided_slice %57 {offsets = [0, 64], sizes = [8, 8], strides = [1, 1]} : vector<16x96xf32> to vector<8x8xf32>
    %97 = vector.extract_strided_slice %95 {offsets = [0, 0], sizes = [8, 8], strides = [1, 1]} : vector<64x8xf32> to vector<8x8xf32>
    %cst_29 = arith.constant dense<0.000000e+00> : vector<8x8xf32>
    %98 = tpu.matmul %97, %96, %cst_29 {dimension_numbers = #tpu.dot_dimension_numbers<[1], [0], [0], [1], [0, 0, 1, 1], [], []>} : vector<8x8xf32>, vector<8x8xf32>, vector<8x8xf32> -> vector<8x8xf32>
    %99 = vector.extract_strided_slice %57 {offsets = [0, 72], sizes = [8, 8], strides = [1, 1]} : vector<16x96xf32> to vector<8x8xf32>
    %100 = vector.extract_strided_slice %95 {offsets = [8, 0], sizes = [8, 8], strides = [1, 1]} : vector<64x8xf32> to vector<8x8xf32>
    %cst_30 = arith.constant dense<0.000000e+00> : vector<8x8xf32>
    %101 = tpu.matmul %100, %99, %cst_30 {dimension_numbers = #tpu.dot_dimension_numbers<[1], [0], [0], [1], [0, 0, 1, 1], [], []>} : vector<8x8xf32>, vector<8x8xf32>, vector<8x8xf32> -> vector<8x8xf32>
    %102 = vector.extract_strided_slice %57 {offsets = [0, 80], sizes = [8, 8], strides = [1, 1]} : vector<16x96xf32> to vector<8x8xf32>
    %103 = vector.extract_strided_slice %95 {offsets = [16, 0], sizes = [8, 8], strides = [1, 1]} : vector<64x8xf32> to vector<8x8xf32>
    %cst_31 = arith.constant dense<0.000000e+00> : vector<8x8xf32>
    %104 = tpu.matmul %103, %102, %cst_31 {dimension_numbers = #tpu.dot_dimension_numbers<[1], [0], [0], [1], [0, 0, 1, 1], [], []>} : vector<8x8xf32>, vector<8x8xf32>, vector<8x8xf32> -> vector<8x8xf32>
    %105 = vector.extract_strided_slice %57 {offsets = [0, 88], sizes = [8, 8], strides = [1, 1]} : vector<16x96xf32> to vector<8x8xf32>
    %106 = vector.extract_strided_slice %95 {offsets = [24, 0], sizes = [8, 8], strides = [1, 1]} : vector<64x8xf32> to vector<8x8xf32>
    %cst_32 = arith.constant dense<0.000000e+00> : vector<8x8xf32>
    %107 = tpu.matmul %106, %105, %cst_32 {dimension_numbers = #tpu.dot_dimension_numbers<[1], [0], [0], [1], [0, 0, 1, 1], [], []>} : vector<8x8xf32>, vector<8x8xf32>, vector<8x8xf32> -> vector<8x8xf32>
    %108 = tpu.concatenate %98, %101, %104, %107 in 1 : vector<8x8xf32>, vector<8x8xf32>, vector<8x8xf32>, vector<8x8xf32> -> vector<8x32xf32>
    %109 = vector.extract_strided_slice %57 {offsets = [8, 64], sizes = [8, 8], strides = [1, 1]} : vector<16x96xf32> to vector<8x8xf32>
    %110 = vector.extract_strided_slice %95 {offsets = [32, 0], sizes = [8, 8], strides = [1, 1]} : vector<64x8xf32> to vector<8x8xf32>
    %cst_33 = arith.constant dense<0.000000e+00> : vector<8x8xf32>
    %111 = tpu.matmul %110, %109, %cst_33 {dimension_numbers = #tpu.dot_dimension_numbers<[1], [0], [0], [1], [0, 0, 1, 1], [], []>} : vector<8x8xf32>, vector<8x8xf32>, vector<8x8xf32> -> vector<8x8xf32>
    %112 = vector.extract_strided_slice %57 {offsets = [8, 72], sizes = [8, 8], strides = [1, 1]} : vector<16x96xf32> to vector<8x8xf32>
    %113 = vector.extract_strided_slice %95 {offsets = [40, 0], sizes = [8, 8], strides = [1, 1]} : vector<64x8xf32> to vector<8x8xf32>
    %cst_34 = arith.constant dense<0.000000e+00> : vector<8x8xf32>
    %114 = tpu.matmul %113, %112, %cst_34 {dimension_numbers = #tpu.dot_dimension_numbers<[1], [0], [0], [1], [0, 0, 1, 1], [], []>} : vector<8x8xf32>, vector<8x8xf32>, vector<8x8xf32> -> vector<8x8xf32>
    %115 = vector.extract_strided_slice %57 {offsets = [8, 80], sizes = [8, 8], strides = [1, 1]} : vector<16x96xf32> to vector<8x8xf32>
    %116 = vector.extract_strided_slice %95 {offsets = [48, 0], sizes = [8, 8], strides = [1, 1]} : vector<64x8xf32> to vector<8x8xf32>
    %cst_35 = arith.constant dense<0.000000e+00> : vector<8x8xf32>
    %117 = tpu.matmul %116, %115, %cst_35 {dimension_numbers = #tpu.dot_dimension_numbers<[1], [0], [0], [1], [0, 0, 1, 1], [], []>} : vector<8x8xf32>, vector<8x8xf32>, vector<8x8xf32> -> vector<8x8xf32>
    %118 = vector.extract_strided_slice %57 {offsets = [8, 88], sizes = [8, 8], strides = [1, 1]} : vector<16x96xf32> to vector<8x8xf32>
    %119 = vector.extract_strided_slice %95 {offsets = [56, 0], sizes = [8, 8], strides = [1, 1]} : vector<64x8xf32> to vector<8x8xf32>
    %cst_36 = arith.constant dense<0.000000e+00> : vector<8x8xf32>
    %120 = tpu.matmul %119, %118, %cst_36 {dimension_numbers = #tpu.dot_dimension_numbers<[1], [0], [0], [1], [0, 0, 1, 1], [], []>} : vector<8x8xf32>, vector<8x8xf32>, vector<8x8xf32> -> vector<8x8xf32>
    %121 = tpu.concatenate %111, %114, %117, %120 in 1 : vector<8x8xf32>, vector<8x8xf32>, vector<8x8xf32>, vector<8x8xf32> -> vector<8x32xf32>
    %122 = tpu.concatenate %108, %121 in 0 : vector<8x32xf32>, vector<8x32xf32> -> vector<16x32xf32>
    %c0_37 = arith.constant 0 : index
    %c0_38 = arith.constant 0 : index
    %c0_39 = arith.constant 0 : index
    %123 = vector.load %arg6[%c0_37, %c0_38, %c0_39] : memref<3x32x32xf32, #tpu.memory_space<vmem>>, vector<1x32x32xf32>
    %124 = vector.shape_cast %123 : vector<1x32x32xf32> to vector<32x32xf32>
    %cst_40 = arith.constant dense<0.000000e+00> : vector<16x32xf32>
    %125 = tpu.matmul %122, %124, %cst_40 {dimension_numbers = #tpu.dot_dimension_numbers<[1], [0], [0], [1], [0, 0, 1, 1], [], []>} : vector<16x32xf32>, vector<32x32xf32>, vector<16x32xf32> -> vector<16x32xf32>
    %126 = vector.extract_strided_slice %0 {offsets = [18, 0], sizes = [1, 32], strides = [1, 1]} : vector<27x96xf32> to vector<1x32xf32>
    %127 = vector.broadcast %126 : vector<1x32xf32> to vector<16x32xf32>
    %128 = arith.addf %125, %127 : vector<16x32xf32>
    %129 = arith.addf %128, %51 : vector<16x32xf32>
    %130 = vector.extract_strided_slice %0 {offsets = [18, 32], sizes = [1, 32], strides = [1, 1]} : vector<27x96xf32> to vector<1x32xf32>
    %131 = vector.extract_strided_slice %0 {offsets = [18, 64], sizes = [1, 32], strides = [1, 1]} : vector<27x96xf32> to vector<1x32xf32>
    %cst_41 = arith.constant dense<0.000000e+00> : vector<16xf32>
    %132 = vector.multi_reduction <add>, %129, %cst_41 [1] : vector<16x32xf32> to vector<16xf32>
    %133 = vector.shape_cast %132 : vector<16xf32> to vector<16x1xf32>
    %cst_42 = arith.constant 3.200000e+01 : f32
    %134 = vector.broadcast %cst_42 : f32 to vector<16x1xf32>
    %135 = arith.divf %133, %134 : vector<16x1xf32>
    %136 = vector.broadcast %135 : vector<16x1xf32> to vector<16x32xf32>
    %137 = arith.subf %129, %136 : vector<16x32xf32>
    %138 = arith.mulf %137, %137 : vector<16x32xf32>
    %cst_43 = arith.constant dense<0.000000e+00> : vector<16xf32>
    %139 = vector.multi_reduction <add>, %138, %cst_43 [1] : vector<16x32xf32> to vector<16xf32>
    %140 = vector.shape_cast %139 : vector<16xf32> to vector<16x1xf32>
    %cst_44 = arith.constant 3.200000e+01 : f32
    %141 = vector.broadcast %cst_44 : f32 to vector<16x1xf32>
    %142 = arith.divf %140, %141 : vector<16x1xf32>
    %143 = vector.broadcast %135 : vector<16x1xf32> to vector<16x32xf32>
    %144 = arith.subf %129, %143 : vector<16x32xf32>
    %cst_45 = arith.constant 9.99999996E-13 : f32
    %145 = vector.broadcast %cst_45 : f32 to vector<16x1xf32>
    %146 = arith.addf %142, %145 : vector<16x1xf32>
    %147 = math.rsqrt %146 : vector<16x1xf32>
    %148 = vector.broadcast %147 : vector<16x1xf32> to vector<16x32xf32>
    %149 = arith.mulf %144, %148 : vector<16x32xf32>
    %150 = vector.broadcast %130 : vector<1x32xf32> to vector<16x32xf32>
    %151 = arith.mulf %149, %150 : vector<16x32xf32>
    %152 = vector.broadcast %131 : vector<1x32xf32> to vector<16x32xf32>
    %153 = arith.addf %151, %152 : vector<16x32xf32>
    %c0_46 = arith.constant 0 : index
    %c0_47 = arith.constant 0 : index
    %c0_48 = arith.constant 0 : index
    %154 = vector.load %arg7[%c0_46, %c0_47, %c0_48] : memref<2x32x64xf32, #tpu.memory_space<vmem>>, vector<1x32x64xf32>
    %155 = vector.shape_cast %154 : vector<1x32x64xf32> to vector<32x64xf32>
    %cst_49 = arith.constant dense<0.000000e+00> : vector<16x64xf32>
    %156 = tpu.matmul %153, %155, %cst_49 {dimension_numbers = #tpu.dot_dimension_numbers<[1], [0], [0], [1], [0, 0, 1, 1], [], []>} : vector<16x32xf32>, vector<32x64xf32>, vector<16x64xf32> -> vector<16x64xf32>
    %157 = vector.extract_strided_slice %0 {offsets = [19, 0], sizes = [1, 64], strides = [1, 1]} : vector<27x96xf32> to vector<1x64xf32>
    %158 = vector.broadcast %157 : vector<1x64xf32> to vector<16x64xf32>
    %159 = arith.addf %156, %158 : vector<16x64xf32>
    %160 = arith.mulf %159, %159 : vector<16x64xf32>
    %161 = arith.mulf %159, %160 : vector<16x64xf32>
    %cst_50 = arith.constant 4.471500e-02 : f32
    %162 = vector.broadcast %cst_50 : f32 to vector<16x64xf32>
    %163 = arith.mulf %162, %161 : vector<16x64xf32>
    %164 = arith.addf %159, %163 : vector<16x64xf32>
    %cst_51 = arith.constant 0.797884583 : f32
    %165 = vector.broadcast %cst_51 : f32 to vector<16x64xf32>
    %166 = arith.mulf %165, %164 : vector<16x64xf32>
    %167 = math.tanh %166 : vector<16x64xf32>
    %cst_52 = arith.constant 1.000000e+00 : f32
    %168 = vector.broadcast %cst_52 : f32 to vector<16x64xf32>
    %169 = arith.addf %168, %167 : vector<16x64xf32>
    %cst_53 = arith.constant 5.000000e-01 : f32
    %170 = vector.broadcast %cst_53 : f32 to vector<16x64xf32>
    %171 = arith.mulf %170, %169 : vector<16x64xf32>
    %172 = arith.mulf %159, %171 : vector<16x64xf32>
    %c0_54 = arith.constant 0 : index
    %c0_55 = arith.constant 0 : index
    %c0_56 = arith.constant 0 : index
    %173 = vector.load %arg8[%c0_54, %c0_55, %c0_56] : memref<2x64x32xf32, #tpu.memory_space<vmem>>, vector<1x64x32xf32>
    %174 = vector.shape_cast %173 : vector<1x64x32xf32> to vector<64x32xf32>
    %cst_57 = arith.constant dense<0.000000e+00> : vector<16x32xf32>
    %175 = tpu.matmul %172, %174, %cst_57 {dimension_numbers = #tpu.dot_dimension_numbers<[1], [0], [0], [1], [0, 0, 1, 1], [], []>} : vector<16x64xf32>, vector<64x32xf32>, vector<16x32xf32> -> vector<16x32xf32>
    %176 = vector.extract_strided_slice %0 {offsets = [19, 64], sizes = [1, 32], strides = [1, 1]} : vector<27x96xf32> to vector<1x32xf32>
    %177 = vector.broadcast %176 : vector<1x32xf32> to vector<16x32xf32>
    %178 = arith.addf %175, %177 : vector<16x32xf32>
    %179 = arith.addf %178, %153 : vector<16x32xf32>
    %180 = vector.extract_strided_slice %0 {offsets = [20, 0], sizes = [1, 32], strides = [1, 1]} : vector<27x96xf32> to vector<1x32xf32>
    %181 = vector.extract_strided_slice %0 {offsets = [20, 32], sizes = [1, 32], strides = [1, 1]} : vector<27x96xf32> to vector<1x32xf32>
    %cst_58 = arith.constant dense<0.000000e+00> : vector<16xf32>
    %182 = vector.multi_reduction <add>, %179, %cst_58 [1] : vector<16x32xf32> to vector<16xf32>
    %183 = vector.shape_cast %182 : vector<16xf32> to vector<16x1xf32>
    %cst_59 = arith.constant 3.200000e+01 : f32
    %184 = vector.broadcast %cst_59 : f32 to vector<16x1xf32>
    %185 = arith.divf %183, %184 : vector<16x1xf32>
    %186 = vector.broadcast %185 : vector<16x1xf32> to vector<16x32xf32>
    %187 = arith.subf %179, %186 : vector<16x32xf32>
    %188 = arith.mulf %187, %187 : vector<16x32xf32>
    %cst_60 = arith.constant dense<0.000000e+00> : vector<16xf32>
    %189 = vector.multi_reduction <add>, %188, %cst_60 [1] : vector<16x32xf32> to vector<16xf32>
    %190 = vector.shape_cast %189 : vector<16xf32> to vector<16x1xf32>
    %cst_61 = arith.constant 3.200000e+01 : f32
    %191 = vector.broadcast %cst_61 : f32 to vector<16x1xf32>
    %192 = arith.divf %190, %191 : vector<16x1xf32>
    %193 = vector.broadcast %185 : vector<16x1xf32> to vector<16x32xf32>
    %194 = arith.subf %179, %193 : vector<16x32xf32>
    %cst_62 = arith.constant 9.99999996E-13 : f32
    %195 = vector.broadcast %cst_62 : f32 to vector<16x1xf32>
    %196 = arith.addf %192, %195 : vector<16x1xf32>
    %197 = math.rsqrt %196 : vector<16x1xf32>
    %198 = vector.broadcast %197 : vector<16x1xf32> to vector<16x32xf32>
    %199 = arith.mulf %194, %198 : vector<16x32xf32>
    %200 = vector.broadcast %180 : vector<1x32xf32> to vector<16x32xf32>
    %201 = arith.mulf %199, %200 : vector<16x32xf32>
    %202 = vector.broadcast %181 : vector<1x32xf32> to vector<16x32xf32>
    %203 = arith.addf %201, %202 : vector<16x32xf32>
    %c1 = arith.constant 1 : index
    %c0_63 = arith.constant 0 : index
    %c0_64 = arith.constant 0 : index
    %204 = vector.load %arg5[%c1, %c0_63, %c0_64] : memref<3x32x96xf32, #tpu.memory_space<vmem>>, vector<1x32x96xf32>
    %205 = vector.shape_cast %204 : vector<1x32x96xf32> to vector<32x96xf32>
    %206 = vector.extract_strided_slice %0 {offsets = [21, 0], sizes = [1, 96], strides = [1, 1]} : vector<27x96xf32> to vector<1x96xf32>
    %cst_65 = arith.constant dense<0.000000e+00> : vector<16x96xf32>
    %207 = tpu.matmul %203, %205, %cst_65 {dimension_numbers = #tpu.dot_dimension_numbers<[1], [0], [0], [1], [0, 0, 1, 1], [], []>} : vector<16x32xf32>, vector<32x96xf32>, vector<16x96xf32> -> vector<16x96xf32>
    %208 = vector.broadcast %206 : vector<1x96xf32> to vector<16x96xf32>
    %209 = arith.addf %207, %208 : vector<16x96xf32>
    %210 = vector.extract_strided_slice %209 {offsets = [0, 0], sizes = [8, 8], strides = [1, 1]} : vector<16x96xf32> to vector<8x8xf32>
    %211 = vector.extract_strided_slice %209 {offsets = [0, 32], sizes = [8, 8], strides = [1, 1]} : vector<16x96xf32> to vector<8x8xf32>
    %cst_66 = arith.constant dense<0.000000e+00> : vector<8x8xf32>
    %212 = tpu.matmul %210, %211, %cst_66 {dimension_numbers = #tpu.dot_dimension_numbers<[1], [1], [0], [0], [0, 0, 1, 0], [], []>} : vector<8x8xf32>, vector<8x8xf32>, vector<8x8xf32> -> vector<8x8xf32>
    %213 = vector.extract_strided_slice %209 {offsets = [0, 8], sizes = [8, 8], strides = [1, 1]} : vector<16x96xf32> to vector<8x8xf32>
    %214 = vector.extract_strided_slice %209 {offsets = [0, 40], sizes = [8, 8], strides = [1, 1]} : vector<16x96xf32> to vector<8x8xf32>
    %cst_67 = arith.constant dense<0.000000e+00> : vector<8x8xf32>
    %215 = tpu.matmul %213, %214, %cst_67 {dimension_numbers = #tpu.dot_dimension_numbers<[1], [1], [0], [0], [0, 0, 1, 0], [], []>} : vector<8x8xf32>, vector<8x8xf32>, vector<8x8xf32> -> vector<8x8xf32>
    %216 = vector.extract_strided_slice %209 {offsets = [0, 16], sizes = [8, 8], strides = [1, 1]} : vector<16x96xf32> to vector<8x8xf32>
    %217 = vector.extract_strided_slice %209 {offsets = [0, 48], sizes = [8, 8], strides = [1, 1]} : vector<16x96xf32> to vector<8x8xf32>
    %cst_68 = arith.constant dense<0.000000e+00> : vector<8x8xf32>
    %218 = tpu.matmul %216, %217, %cst_68 {dimension_numbers = #tpu.dot_dimension_numbers<[1], [1], [0], [0], [0, 0, 1, 0], [], []>} : vector<8x8xf32>, vector<8x8xf32>, vector<8x8xf32> -> vector<8x8xf32>
    %219 = vector.extract_strided_slice %209 {offsets = [0, 24], sizes = [8, 8], strides = [1, 1]} : vector<16x96xf32> to vector<8x8xf32>
    %220 = vector.extract_strided_slice %209 {offsets = [0, 56], sizes = [8, 8], strides = [1, 1]} : vector<16x96xf32> to vector<8x8xf32>
    %cst_69 = arith.constant dense<0.000000e+00> : vector<8x8xf32>
    %221 = tpu.matmul %219, %220, %cst_69 {dimension_numbers = #tpu.dot_dimension_numbers<[1], [1], [0], [0], [0, 0, 1, 0], [], []>} : vector<8x8xf32>, vector<8x8xf32>, vector<8x8xf32> -> vector<8x8xf32>
    %222 = vector.extract_strided_slice %209 {offsets = [8, 0], sizes = [8, 8], strides = [1, 1]} : vector<16x96xf32> to vector<8x8xf32>
    %223 = vector.extract_strided_slice %209 {offsets = [8, 32], sizes = [8, 8], strides = [1, 1]} : vector<16x96xf32> to vector<8x8xf32>
    %cst_70 = arith.constant dense<0.000000e+00> : vector<8x8xf32>
    %224 = tpu.matmul %222, %223, %cst_70 {dimension_numbers = #tpu.dot_dimension_numbers<[1], [1], [0], [0], [0, 0, 1, 0], [], []>} : vector<8x8xf32>, vector<8x8xf32>, vector<8x8xf32> -> vector<8x8xf32>
    %225 = vector.extract_strided_slice %209 {offsets = [8, 8], sizes = [8, 8], strides = [1, 1]} : vector<16x96xf32> to vector<8x8xf32>
    %226 = vector.extract_strided_slice %209 {offsets = [8, 40], sizes = [8, 8], strides = [1, 1]} : vector<16x96xf32> to vector<8x8xf32>
    %cst_71 = arith.constant dense<0.000000e+00> : vector<8x8xf32>
    %227 = tpu.matmul %225, %226, %cst_71 {dimension_numbers = #tpu.dot_dimension_numbers<[1], [1], [0], [0], [0, 0, 1, 0], [], []>} : vector<8x8xf32>, vector<8x8xf32>, vector<8x8xf32> -> vector<8x8xf32>
    %228 = vector.extract_strided_slice %209 {offsets = [8, 16], sizes = [8, 8], strides = [1, 1]} : vector<16x96xf32> to vector<8x8xf32>
    %229 = vector.extract_strided_slice %209 {offsets = [8, 48], sizes = [8, 8], strides = [1, 1]} : vector<16x96xf32> to vector<8x8xf32>
    %cst_72 = arith.constant dense<0.000000e+00> : vector<8x8xf32>
    %230 = tpu.matmul %228, %229, %cst_72 {dimension_numbers = #tpu.dot_dimension_numbers<[1], [1], [0], [0], [0, 0, 1, 0], [], []>} : vector<8x8xf32>, vector<8x8xf32>, vector<8x8xf32> -> vector<8x8xf32>
    %231 = vector.extract_strided_slice %209 {offsets = [8, 24], sizes = [8, 8], strides = [1, 1]} : vector<16x96xf32> to vector<8x8xf32>
    %232 = vector.extract_strided_slice %209 {offsets = [8, 56], sizes = [8, 8], strides = [1, 1]} : vector<16x96xf32> to vector<8x8xf32>
    %cst_73 = arith.constant dense<0.000000e+00> : vector<8x8xf32>
    %233 = tpu.matmul %231, %232, %cst_73 {dimension_numbers = #tpu.dot_dimension_numbers<[1], [1], [0], [0], [0, 0, 1, 0], [], []>} : vector<8x8xf32>, vector<8x8xf32>, vector<8x8xf32> -> vector<8x8xf32>
    %234 = tpu.concatenate %212, %215, %218, %221, %224, %227, %230, %233 in 0 : vector<8x8xf32>, vector<8x8xf32>, vector<8x8xf32>, vector<8x8xf32>, vector<8x8xf32>, vector<8x8xf32>, vector<8x8xf32>, vector<8x8xf32> -> vector<64x8xf32>
    %cst_74 = arith.constant 0.353553385 : f32
    %235 = vector.broadcast %cst_74 : f32 to vector<64x8xf32>
    %236 = arith.mulf %234, %235 : vector<64x8xf32>
    %237 = arith.addf %236, %8 : vector<64x8xf32>
    %cst_75 = arith.constant dense<0xFF800000> : vector<64xf32>
    %238 = vector.multi_reduction <maximumf>, %237, %cst_75 [1] : vector<64x8xf32> to vector<64xf32>
    %239 = vector.shape_cast %238 : vector<64xf32> to vector<64x1xf32>
    %240 = vector.broadcast %239 : vector<64x1xf32> to vector<64x8xf32>
    %241 = arith.subf %237, %240 : vector<64x8xf32>
    %242 = math.exp %241 : vector<64x8xf32>
    %cst_76 = arith.constant dense<0.000000e+00> : vector<64xf32>
    %243 = vector.multi_reduction <add>, %242, %cst_76 [1] : vector<64x8xf32> to vector<64xf32>
    %244 = vector.shape_cast %243 : vector<64xf32> to vector<64x1xf32>
    %245 = tpu.reciprocal %244 {approx = true} : vector<64x1xf32> -> vector<64x1xf32>
    %246 = vector.broadcast %245 : vector<64x1xf32> to vector<64x8xf32>
    %247 = arith.mulf %242, %246 : vector<64x8xf32>
    %248 = vector.extract_strided_slice %209 {offsets = [0, 64], sizes = [8, 8], strides = [1, 1]} : vector<16x96xf32> to vector<8x8xf32>
    %249 = vector.extract_strided_slice %247 {offsets = [0, 0], sizes = [8, 8], strides = [1, 1]} : vector<64x8xf32> to vector<8x8xf32>
    %cst_77 = arith.constant dense<0.000000e+00> : vector<8x8xf32>
    %250 = tpu.matmul %249, %248, %cst_77 {dimension_numbers = #tpu.dot_dimension_numbers<[1], [0], [0], [1], [0, 0, 1, 1], [], []>} : vector<8x8xf32>, vector<8x8xf32>, vector<8x8xf32> -> vector<8x8xf32>
    %251 = vector.extract_strided_slice %209 {offsets = [0, 72], sizes = [8, 8], strides = [1, 1]} : vector<16x96xf32> to vector<8x8xf32>
    %252 = vector.extract_strided_slice %247 {offsets = [8, 0], sizes = [8, 8], strides = [1, 1]} : vector<64x8xf32> to vector<8x8xf32>
    %cst_78 = arith.constant dense<0.000000e+00> : vector<8x8xf32>
    %253 = tpu.matmul %252, %251, %cst_78 {dimension_numbers = #tpu.dot_dimension_numbers<[1], [0], [0], [1], [0, 0, 1, 1], [], []>} : vector<8x8xf32>, vector<8x8xf32>, vector<8x8xf32> -> vector<8x8xf32>
    %254 = vector.extract_strided_slice %209 {offsets = [0, 80], sizes = [8, 8], strides = [1, 1]} : vector<16x96xf32> to vector<8x8xf32>
    %255 = vector.extract_strided_slice %247 {offsets = [16, 0], sizes = [8, 8], strides = [1, 1]} : vector<64x8xf32> to vector<8x8xf32>
    %cst_79 = arith.constant dense<0.000000e+00> : vector<8x8xf32>
    %256 = tpu.matmul %255, %254, %cst_79 {dimension_numbers = #tpu.dot_dimension_numbers<[1], [0], [0], [1], [0, 0, 1, 1], [], []>} : vector<8x8xf32>, vector<8x8xf32>, vector<8x8xf32> -> vector<8x8xf32>
    %257 = vector.extract_strided_slice %209 {offsets = [0, 88], sizes = [8, 8], strides = [1, 1]} : vector<16x96xf32> to vector<8x8xf32>
    %258 = vector.extract_strided_slice %247 {offsets = [24, 0], sizes = [8, 8], strides = [1, 1]} : vector<64x8xf32> to vector<8x8xf32>
    %cst_80 = arith.constant dense<0.000000e+00> : vector<8x8xf32>
    %259 = tpu.matmul %258, %257, %cst_80 {dimension_numbers = #tpu.dot_dimension_numbers<[1], [0], [0], [1], [0, 0, 1, 1], [], []>} : vector<8x8xf32>, vector<8x8xf32>, vector<8x8xf32> -> vector<8x8xf32>
    %260 = tpu.concatenate %250, %253, %256, %259 in 1 : vector<8x8xf32>, vector<8x8xf32>, vector<8x8xf32>, vector<8x8xf32> -> vector<8x32xf32>
    %261 = vector.extract_strided_slice %209 {offsets = [8, 64], sizes = [8, 8], strides = [1, 1]} : vector<16x96xf32> to vector<8x8xf32>
    %262 = vector.extract_strided_slice %247 {offsets = [32, 0], sizes = [8, 8], strides = [1, 1]} : vector<64x8xf32> to vector<8x8xf32>
    %cst_81 = arith.constant dense<0.000000e+00> : vector<8x8xf32>
    %263 = tpu.matmul %262, %261, %cst_81 {dimension_numbers = #tpu.dot_dimension_numbers<[1], [0], [0], [1], [0, 0, 1, 1], [], []>} : vector<8x8xf32>, vector<8x8xf32>, vector<8x8xf32> -> vector<8x8xf32>
    %264 = vector.extract_strided_slice %209 {offsets = [8, 72], sizes = [8, 8], strides = [1, 1]} : vector<16x96xf32> to vector<8x8xf32>
    %265 = vector.extract_strided_slice %247 {offsets = [40, 0], sizes = [8, 8], strides = [1, 1]} : vector<64x8xf32> to vector<8x8xf32>
    %cst_82 = arith.constant dense<0.000000e+00> : vector<8x8xf32>
    %266 = tpu.matmul %265, %264, %cst_82 {dimension_numbers = #tpu.dot_dimension_numbers<[1], [0], [0], [1], [0, 0, 1, 1], [], []>} : vector<8x8xf32>, vector<8x8xf32>, vector<8x8xf32> -> vector<8x8xf32>
    %267 = vector.extract_strided_slice %209 {offsets = [8, 80], sizes = [8, 8], strides = [1, 1]} : vector<16x96xf32> to vector<8x8xf32>
    %268 = vector.extract_strided_slice %247 {offsets = [48, 0], sizes = [8, 8], strides = [1, 1]} : vector<64x8xf32> to vector<8x8xf32>
    %cst_83 = arith.constant dense<0.000000e+00> : vector<8x8xf32>
    %269 = tpu.matmul %268, %267, %cst_83 {dimension_numbers = #tpu.dot_dimension_numbers<[1], [0], [0], [1], [0, 0, 1, 1], [], []>} : vector<8x8xf32>, vector<8x8xf32>, vector<8x8xf32> -> vector<8x8xf32>
    %270 = vector.extract_strided_slice %209 {offsets = [8, 88], sizes = [8, 8], strides = [1, 1]} : vector<16x96xf32> to vector<8x8xf32>
    %271 = vector.extract_strided_slice %247 {offsets = [56, 0], sizes = [8, 8], strides = [1, 1]} : vector<64x8xf32> to vector<8x8xf32>
    %cst_84 = arith.constant dense<0.000000e+00> : vector<8x8xf32>
    %272 = tpu.matmul %271, %270, %cst_84 {dimension_numbers = #tpu.dot_dimension_numbers<[1], [0], [0], [1], [0, 0, 1, 1], [], []>} : vector<8x8xf32>, vector<8x8xf32>, vector<8x8xf32> -> vector<8x8xf32>
    %273 = tpu.concatenate %263, %266, %269, %272 in 1 : vector<8x8xf32>, vector<8x8xf32>, vector<8x8xf32>, vector<8x8xf32> -> vector<8x32xf32>
    %274 = tpu.concatenate %260, %273 in 0 : vector<8x32xf32>, vector<8x32xf32> -> vector<16x32xf32>
    %c1_85 = arith.constant 1 : index
    %c0_86 = arith.constant 0 : index
    %c0_87 = arith.constant 0 : index
    %275 = vector.load %arg6[%c1_85, %c0_86, %c0_87] : memref<3x32x32xf32, #tpu.memory_space<vmem>>, vector<1x32x32xf32>
    %276 = vector.shape_cast %275 : vector<1x32x32xf32> to vector<32x32xf32>
    %cst_88 = arith.constant dense<0.000000e+00> : vector<16x32xf32>
    %277 = tpu.matmul %274, %276, %cst_88 {dimension_numbers = #tpu.dot_dimension_numbers<[1], [0], [0], [1], [0, 0, 1, 1], [], []>} : vector<16x32xf32>, vector<32x32xf32>, vector<16x32xf32> -> vector<16x32xf32>
    %278 = vector.extract_strided_slice %0 {offsets = [22, 0], sizes = [1, 32], strides = [1, 1]} : vector<27x96xf32> to vector<1x32xf32>
    %279 = vector.broadcast %278 : vector<1x32xf32> to vector<16x32xf32>
    %280 = arith.addf %277, %279 : vector<16x32xf32>
    %281 = arith.addf %280, %203 : vector<16x32xf32>
    %282 = vector.extract_strided_slice %0 {offsets = [22, 32], sizes = [1, 32], strides = [1, 1]} : vector<27x96xf32> to vector<1x32xf32>
    %283 = vector.extract_strided_slice %0 {offsets = [22, 64], sizes = [1, 32], strides = [1, 1]} : vector<27x96xf32> to vector<1x32xf32>
    %cst_89 = arith.constant dense<0.000000e+00> : vector<16xf32>
    %284 = vector.multi_reduction <add>, %281, %cst_89 [1] : vector<16x32xf32> to vector<16xf32>
    %285 = vector.shape_cast %284 : vector<16xf32> to vector<16x1xf32>
    %cst_90 = arith.constant 3.200000e+01 : f32
    %286 = vector.broadcast %cst_90 : f32 to vector<16x1xf32>
    %287 = arith.divf %285, %286 : vector<16x1xf32>
    %288 = vector.broadcast %287 : vector<16x1xf32> to vector<16x32xf32>
    %289 = arith.subf %281, %288 : vector<16x32xf32>
    %290 = arith.mulf %289, %289 : vector<16x32xf32>
    %cst_91 = arith.constant dense<0.000000e+00> : vector<16xf32>
    %291 = vector.multi_reduction <add>, %290, %cst_91 [1] : vector<16x32xf32> to vector<16xf32>
    %292 = vector.shape_cast %291 : vector<16xf32> to vector<16x1xf32>
    %cst_92 = arith.constant 3.200000e+01 : f32
    %293 = vector.broadcast %cst_92 : f32 to vector<16x1xf32>
    %294 = arith.divf %292, %293 : vector<16x1xf32>
    %295 = vector.broadcast %287 : vector<16x1xf32> to vector<16x32xf32>
    %296 = arith.subf %281, %295 : vector<16x32xf32>
    %cst_93 = arith.constant 9.99999996E-13 : f32
    %297 = vector.broadcast %cst_93 : f32 to vector<16x1xf32>
    %298 = arith.addf %294, %297 : vector<16x1xf32>
    %299 = math.rsqrt %298 : vector<16x1xf32>
    %300 = vector.broadcast %299 : vector<16x1xf32> to vector<16x32xf32>
    %301 = arith.mulf %296, %300 : vector<16x32xf32>
    %302 = vector.broadcast %282 : vector<1x32xf32> to vector<16x32xf32>
    %303 = arith.mulf %301, %302 : vector<16x32xf32>
    %304 = vector.broadcast %283 : vector<1x32xf32> to vector<16x32xf32>
    %305 = arith.addf %303, %304 : vector<16x32xf32>
    %c1_94 = arith.constant 1 : index
    %c0_95 = arith.constant 0 : index
    %c0_96 = arith.constant 0 : index
    %306 = vector.load %arg7[%c1_94, %c0_95, %c0_96] : memref<2x32x64xf32, #tpu.memory_space<vmem>>, vector<1x32x64xf32>
    %307 = vector.shape_cast %306 : vector<1x32x64xf32> to vector<32x64xf32>
    %cst_97 = arith.constant dense<0.000000e+00> : vector<16x64xf32>
    %308 = tpu.matmul %305, %307, %cst_97 {dimension_numbers = #tpu.dot_dimension_numbers<[1], [0], [0], [1], [0, 0, 1, 1], [], []>} : vector<16x32xf32>, vector<32x64xf32>, vector<16x64xf32> -> vector<16x64xf32>
    %309 = vector.extract_strided_slice %0 {offsets = [23, 0], sizes = [1, 64], strides = [1, 1]} : vector<27x96xf32> to vector<1x64xf32>
    %310 = vector.broadcast %309 : vector<1x64xf32> to vector<16x64xf32>
    %311 = arith.addf %308, %310 : vector<16x64xf32>
    %312 = arith.mulf %311, %311 : vector<16x64xf32>
    %313 = arith.mulf %311, %312 : vector<16x64xf32>
    %cst_98 = arith.constant 4.471500e-02 : f32
    %314 = vector.broadcast %cst_98 : f32 to vector<16x64xf32>
    %315 = arith.mulf %314, %313 : vector<16x64xf32>
    %316 = arith.addf %311, %315 : vector<16x64xf32>
    %cst_99 = arith.constant 0.797884583 : f32
    %317 = vector.broadcast %cst_99 : f32 to vector<16x64xf32>
    %318 = arith.mulf %317, %316 : vector<16x64xf32>
    %319 = math.tanh %318 : vector<16x64xf32>
    %cst_100 = arith.constant 1.000000e+00 : f32
    %320 = vector.broadcast %cst_100 : f32 to vector<16x64xf32>
    %321 = arith.addf %320, %319 : vector<16x64xf32>
    %cst_101 = arith.constant 5.000000e-01 : f32
    %322 = vector.broadcast %cst_101 : f32 to vector<16x64xf32>
    %323 = arith.mulf %322, %321 : vector<16x64xf32>
    %324 = arith.mulf %311, %323 : vector<16x64xf32>
    %c1_102 = arith.constant 1 : index
    %c0_103 = arith.constant 0 : index
    %c0_104 = arith.constant 0 : index
    %325 = vector.load %arg8[%c1_102, %c0_103, %c0_104] : memref<2x64x32xf32, #tpu.memory_space<vmem>>, vector<1x64x32xf32>
    %326 = vector.shape_cast %325 : vector<1x64x32xf32> to vector<64x32xf32>
    %cst_105 = arith.constant dense<0.000000e+00> : vector<16x32xf32>
    %327 = tpu.matmul %324, %326, %cst_105 {dimension_numbers = #tpu.dot_dimension_numbers<[1], [0], [0], [1], [0, 0, 1, 1], [], []>} : vector<16x64xf32>, vector<64x32xf32>, vector<16x32xf32> -> vector<16x32xf32>
    %328 = vector.extract_strided_slice %0 {offsets = [23, 64], sizes = [1, 32], strides = [1, 1]} : vector<27x96xf32> to vector<1x32xf32>
    %329 = vector.broadcast %328 : vector<1x32xf32> to vector<16x32xf32>
    %330 = arith.addf %327, %329 : vector<16x32xf32>
    %331 = arith.addf %330, %305 : vector<16x32xf32>
    %332 = vector.extract_strided_slice %0 {offsets = [24, 0], sizes = [1, 32], strides = [1, 1]} : vector<27x96xf32> to vector<1x32xf32>
    %333 = vector.extract_strided_slice %0 {offsets = [24, 32], sizes = [1, 32], strides = [1, 1]} : vector<27x96xf32> to vector<1x32xf32>
    %cst_106 = arith.constant dense<0.000000e+00> : vector<16xf32>
    %334 = vector.multi_reduction <add>, %331, %cst_106 [1] : vector<16x32xf32> to vector<16xf32>
    %335 = vector.shape_cast %334 : vector<16xf32> to vector<16x1xf32>
    %cst_107 = arith.constant 3.200000e+01 : f32
    %336 = vector.broadcast %cst_107 : f32 to vector<16x1xf32>
    %337 = arith.divf %335, %336 : vector<16x1xf32>
    %338 = vector.broadcast %337 : vector<16x1xf32> to vector<16x32xf32>
    %339 = arith.subf %331, %338 : vector<16x32xf32>
    %340 = arith.mulf %339, %339 : vector<16x32xf32>
    %cst_108 = arith.constant dense<0.000000e+00> : vector<16xf32>
    %341 = vector.multi_reduction <add>, %340, %cst_108 [1] : vector<16x32xf32> to vector<16xf32>
    %342 = vector.shape_cast %341 : vector<16xf32> to vector<16x1xf32>
    %cst_109 = arith.constant 3.200000e+01 : f32
    %343 = vector.broadcast %cst_109 : f32 to vector<16x1xf32>
    %344 = arith.divf %342, %343 : vector<16x1xf32>
    %345 = vector.broadcast %337 : vector<16x1xf32> to vector<16x32xf32>
    %346 = arith.subf %331, %345 : vector<16x32xf32>
    %cst_110 = arith.constant 9.99999996E-13 : f32
    %347 = vector.broadcast %cst_110 : f32 to vector<16x1xf32>
    %348 = arith.addf %344, %347 : vector<16x1xf32>
    %349 = math.rsqrt %348 : vector<16x1xf32>
    %350 = vector.broadcast %349 : vector<16x1xf32> to vector<16x32xf32>
    %351 = arith.mulf %346, %350 : vector<16x32xf32>
    %352 = vector.broadcast %332 : vector<1x32xf32> to vector<16x32xf32>
    %353 = arith.mulf %351, %352 : vector<16x32xf32>
    %354 = vector.broadcast %333 : vector<1x32xf32> to vector<16x32xf32>
    %355 = arith.addf %353, %354 : vector<16x32xf32>
    %c0_111 = arith.constant 0 : index
    %c0_112 = arith.constant 0 : index
    %356 = vector.load %arg9[%c0_111, %c0_112] : memref<16x32xf32, #tpu.memory_space<vmem>>, vector<16x32xf32>
    tpu.vector_store %arg9[%c0_111, %c0_112], %355 {strides = array<i32>} : memref<16x32xf32, #tpu.memory_space<vmem>>, vector<16x32xf32>,
    %c2 = arith.constant 2 : index
    %c0_113 = arith.constant 0 : index
    %c0_114 = arith.constant 0 : index
    %357 = vector.load %arg5[%c2, %c0_113, %c0_114] : memref<3x32x96xf32, #tpu.memory_space<vmem>>, vector<1x32x96xf32>
    %358 = vector.shape_cast %357 : vector<1x32x96xf32> to vector<32x96xf32>
    %cst_115 = arith.constant dense<0.000000e+00> : vector<16x96xf32>
    %359 = tpu.matmul %355, %358, %cst_115 {dimension_numbers = #tpu.dot_dimension_numbers<[1], [0], [0], [1], [0, 0, 1, 1], [], []>} : vector<16x32xf32>, vector<32x96xf32>, vector<16x96xf32> -> vector<16x96xf32>
    %360 = vector.extract_strided_slice %0 {offsets = [25, 0], sizes = [1, 96], strides = [1, 1]} : vector<27x96xf32> to vector<1x96xf32>
    %361 = vector.broadcast %360 : vector<1x96xf32> to vector<16x96xf32>
    %362 = arith.addf %359, %361 : vector<16x96xf32>
    %363 = vector.extract_strided_slice %362 {offsets = [0, 0], sizes = [1, 8], strides = [1, 1]} : vector<16x96xf32> to vector<1x8xf32>
    %364 = vector.extract_strided_slice %362 {offsets = [0, 32], sizes = [8, 8], strides = [1, 1]} : vector<16x96xf32> to vector<8x8xf32>
    %cst_116 = arith.constant dense<0.000000e+00> : vector<1x8xf32>
    %365 = tpu.matmul %363, %364, %cst_116 {dimension_numbers = #tpu.dot_dimension_numbers<[1], [1], [0], [0], [0, 0, 1, 0], [], []>} : vector<1x8xf32>, vector<8x8xf32>, vector<1x8xf32> -> vector<1x8xf32>
    %366 = vector.extract_strided_slice %362 {offsets = [0, 8], sizes = [1, 8], strides = [1, 1]} : vector<16x96xf32> to vector<1x8xf32>
    %367 = vector.extract_strided_slice %362 {offsets = [0, 40], sizes = [8, 8], strides = [1, 1]} : vector<16x96xf32> to vector<8x8xf32>
    %cst_117 = arith.constant dense<0.000000e+00> : vector<1x8xf32>
    %368 = tpu.matmul %366, %367, %cst_117 {dimension_numbers = #tpu.dot_dimension_numbers<[1], [1], [0], [0], [0, 0, 1, 0], [], []>} : vector<1x8xf32>, vector<8x8xf32>, vector<1x8xf32> -> vector<1x8xf32>
    %369 = vector.extract_strided_slice %362 {offsets = [0, 16], sizes = [1, 8], strides = [1, 1]} : vector<16x96xf32> to vector<1x8xf32>
    %370 = vector.extract_strided_slice %362 {offsets = [0, 48], sizes = [8, 8], strides = [1, 1]} : vector<16x96xf32> to vector<8x8xf32>
    %cst_118 = arith.constant dense<0.000000e+00> : vector<1x8xf32>
    %371 = tpu.matmul %369, %370, %cst_118 {dimension_numbers = #tpu.dot_dimension_numbers<[1], [1], [0], [0], [0, 0, 1, 0], [], []>} : vector<1x8xf32>, vector<8x8xf32>, vector<1x8xf32> -> vector<1x8xf32>
    %372 = vector.extract_strided_slice %362 {offsets = [0, 24], sizes = [1, 8], strides = [1, 1]} : vector<16x96xf32> to vector<1x8xf32>
    %373 = vector.extract_strided_slice %362 {offsets = [0, 56], sizes = [8, 8], strides = [1, 1]} : vector<16x96xf32> to vector<8x8xf32>
    %cst_119 = arith.constant dense<0.000000e+00> : vector<1x8xf32>
    %374 = tpu.matmul %372, %373, %cst_119 {dimension_numbers = #tpu.dot_dimension_numbers<[1], [1], [0], [0], [0, 0, 1, 0], [], []>} : vector<1x8xf32>, vector<8x8xf32>, vector<1x8xf32> -> vector<1x8xf32>
    %375 = vector.extract_strided_slice %362 {offsets = [8, 0], sizes = [1, 8], strides = [1, 1]} : vector<16x96xf32> to vector<1x8xf32>
    %376 = vector.extract_strided_slice %362 {offsets = [8, 32], sizes = [8, 8], strides = [1, 1]} : vector<16x96xf32> to vector<8x8xf32>
    %cst_120 = arith.constant dense<0.000000e+00> : vector<1x8xf32>
    %377 = tpu.matmul %375, %376, %cst_120 {dimension_numbers = #tpu.dot_dimension_numbers<[1], [1], [0], [0], [0, 0, 1, 0], [], []>} : vector<1x8xf32>, vector<8x8xf32>, vector<1x8xf32> -> vector<1x8xf32>
    %378 = vector.extract_strided_slice %362 {offsets = [8, 8], sizes = [1, 8], strides = [1, 1]} : vector<16x96xf32> to vector<1x8xf32>
    %379 = vector.extract_strided_slice %362 {offsets = [8, 40], sizes = [8, 8], strides = [1, 1]} : vector<16x96xf32> to vector<8x8xf32>
    %cst_121 = arith.constant dense<0.000000e+00> : vector<1x8xf32>
    %380 = tpu.matmul %378, %379, %cst_121 {dimension_numbers = #tpu.dot_dimension_numbers<[1], [1], [0], [0], [0, 0, 1, 0], [], []>} : vector<1x8xf32>, vector<8x8xf32>, vector<1x8xf32> -> vector<1x8xf32>
    %381 = vector.extract_strided_slice %362 {offsets = [8, 16], sizes = [1, 8], strides = [1, 1]} : vector<16x96xf32> to vector<1x8xf32>
    %382 = vector.extract_strided_slice %362 {offsets = [8, 48], sizes = [8, 8], strides = [1, 1]} : vector<16x96xf32> to vector<8x8xf32>
    %cst_122 = arith.constant dense<0.000000e+00> : vector<1x8xf32>
    %383 = tpu.matmul %381, %382, %cst_122 {dimension_numbers = #tpu.dot_dimension_numbers<[1], [1], [0], [0], [0, 0, 1, 0], [], []>} : vector<1x8xf32>, vector<8x8xf32>, vector<1x8xf32> -> vector<1x8xf32>
    %384 = vector.extract_strided_slice %362 {offsets = [8, 24], sizes = [1, 8], strides = [1, 1]} : vector<16x96xf32> to vector<1x8xf32>
    %385 = vector.extract_strided_slice %362 {offsets = [8, 56], sizes = [8, 8], strides = [1, 1]} : vector<16x96xf32> to vector<8x8xf32>
    %cst_123 = arith.constant dense<0.000000e+00> : vector<1x8xf32>
    %386 = tpu.matmul %384, %385, %cst_123 {dimension_numbers = #tpu.dot_dimension_numbers<[1], [1], [0], [0], [0, 0, 1, 0], [], []>} : vector<1x8xf32>, vector<8x8xf32>, vector<1x8xf32> -> vector<1x8xf32>
    %387 = tpu.concatenate %365, %368, %371, %374, %377, %380, %383, %386 in 0 : vector<1x8xf32>, vector<1x8xf32>, vector<1x8xf32>, vector<1x8xf32>, vector<1x8xf32>, vector<1x8xf32>, vector<1x8xf32>, vector<1x8xf32> -> vector<8x8xf32>
    %cst_124 = arith.constant 0.353553385 : f32
    %388 = vector.broadcast %cst_124 : f32 to vector<8x8xf32>
    %389 = arith.mulf %387, %388 : vector<8x8xf32>
    %390 = arith.addf %389, %15 : vector<8x8xf32>
    %cst_125 = arith.constant dense<0xFF800000> : vector<8xf32>
    %391 = vector.multi_reduction <maximumf>, %390, %cst_125 [1] : vector<8x8xf32> to vector<8xf32>
    %392 = vector.shape_cast %391 : vector<8xf32> to vector<8x1xf32>
    %393 = vector.broadcast %392 : vector<8x1xf32> to vector<8x8xf32>
    %394 = arith.subf %390, %393 : vector<8x8xf32>
    %395 = math.exp %394 : vector<8x8xf32>
    %cst_126 = arith.constant dense<0.000000e+00> : vector<8xf32>
    %396 = vector.multi_reduction <add>, %395, %cst_126 [1] : vector<8x8xf32> to vector<8xf32>
    %397 = vector.shape_cast %396 : vector<8xf32> to vector<8x1xf32>
    %398 = tpu.reciprocal %397 {approx = true} : vector<8x1xf32> -> vector<8x1xf32>
    %399 = vector.broadcast %398 : vector<8x1xf32> to vector<8x8xf32>
    %400 = arith.mulf %395, %399 : vector<8x8xf32>
    %401 = vector.extract_strided_slice %362 {offsets = [0, 64], sizes = [8, 8], strides = [1, 1]} : vector<16x96xf32> to vector<8x8xf32>
    %402 = vector.extract_strided_slice %400 {offsets = [0, 0], sizes = [1, 8], strides = [1, 1]} : vector<8x8xf32> to vector<1x8xf32>
    %cst_127 = arith.constant dense<0.000000e+00> : vector<1x8xf32>
    %403 = tpu.matmul %402, %401, %cst_127 {dimension_numbers = #tpu.dot_dimension_numbers<[1], [0], [0], [1], [0, 0, 1, 1], [], []>} : vector<1x8xf32>, vector<8x8xf32>, vector<1x8xf32> -> vector<1x8xf32>
    %404 = vector.extract_strided_slice %362 {offsets = [0, 72], sizes = [8, 8], strides = [1, 1]} : vector<16x96xf32> to vector<8x8xf32>
    %405 = vector.extract_strided_slice %400 {offsets = [1, 0], sizes = [1, 8], strides = [1, 1]} : vector<8x8xf32> to vector<1x8xf32>
    %cst_128 = arith.constant dense<0.000000e+00> : vector<1x8xf32>
    %406 = tpu.matmul %405, %404, %cst_128 {dimension_numbers = #tpu.dot_dimension_numbers<[1], [0], [0], [1], [0, 0, 1, 1], [], []>} : vector<1x8xf32>, vector<8x8xf32>, vector<1x8xf32> -> vector<1x8xf32>
    %407 = vector.extract_strided_slice %362 {offsets = [0, 80], sizes = [8, 8], strides = [1, 1]} : vector<16x96xf32> to vector<8x8xf32>
    %408 = vector.extract_strided_slice %400 {offsets = [2, 0], sizes = [1, 8], strides = [1, 1]} : vector<8x8xf32> to vector<1x8xf32>
    %cst_129 = arith.constant dense<0.000000e+00> : vector<1x8xf32>
    %409 = tpu.matmul %408, %407, %cst_129 {dimension_numbers = #tpu.dot_dimension_numbers<[1], [0], [0], [1], [0, 0, 1, 1], [], []>} : vector<1x8xf32>, vector<8x8xf32>, vector<1x8xf32> -> vector<1x8xf32>
    %410 = vector.extract_strided_slice %362 {offsets = [0, 88], sizes = [8, 8], strides = [1, 1]} : vector<16x96xf32> to vector<8x8xf32>
    %411 = vector.extract_strided_slice %400 {offsets = [3, 0], sizes = [1, 8], strides = [1, 1]} : vector<8x8xf32> to vector<1x8xf32>
    %cst_130 = arith.constant dense<0.000000e+00> : vector<1x8xf32>
    %412 = tpu.matmul %411, %410, %cst_130 {dimension_numbers = #tpu.dot_dimension_numbers<[1], [0], [0], [1], [0, 0, 1, 1], [], []>} : vector<1x8xf32>, vector<8x8xf32>, vector<1x8xf32> -> vector<1x8xf32>
    %413 = tpu.concatenate %403, %406, %409, %412 in 1 : vector<1x8xf32>, vector<1x8xf32>, vector<1x8xf32>, vector<1x8xf32> -> vector<1x32xf32>
    %414 = vector.extract_strided_slice %362 {offsets = [8, 64], sizes = [8, 8], strides = [1, 1]} : vector<16x96xf32> to vector<8x8xf32>
    %415 = vector.extract_strided_slice %400 {offsets = [4, 0], sizes = [1, 8], strides = [1, 1]} : vector<8x8xf32> to vector<1x8xf32>
    %cst_131 = arith.constant dense<0.000000e+00> : vector<1x8xf32>
    %416 = tpu.matmul %415, %414, %cst_131 {dimension_numbers = #tpu.dot_dimension_numbers<[1], [0], [0], [1], [0, 0, 1, 1], [], []>} : vector<1x8xf32>, vector<8x8xf32>, vector<1x8xf32> -> vector<1x8xf32>
    %417 = vector.extract_strided_slice %362 {offsets = [8, 72], sizes = [8, 8], strides = [1, 1]} : vector<16x96xf32> to vector<8x8xf32>
    %418 = vector.extract_strided_slice %400 {offsets = [5, 0], sizes = [1, 8], strides = [1, 1]} : vector<8x8xf32> to vector<1x8xf32>
    %cst_132 = arith.constant dense<0.000000e+00> : vector<1x8xf32>
    %419 = tpu.matmul %418, %417, %cst_132 {dimension_numbers = #tpu.dot_dimension_numbers<[1], [0], [0], [1], [0, 0, 1, 1], [], []>} : vector<1x8xf32>, vector<8x8xf32>, vector<1x8xf32> -> vector<1x8xf32>
    %420 = vector.extract_strided_slice %362 {offsets = [8, 80], sizes = [8, 8], strides = [1, 1]} : vector<16x96xf32> to vector<8x8xf32>
    %421 = vector.extract_strided_slice %400 {offsets = [6, 0], sizes = [1, 8], strides = [1, 1]} : vector<8x8xf32> to vector<1x8xf32>
    %cst_133 = arith.constant dense<0.000000e+00> : vector<1x8xf32>
    %422 = tpu.matmul %421, %420, %cst_133 {dimension_numbers = #tpu.dot_dimension_numbers<[1], [0], [0], [1], [0, 0, 1, 1], [], []>} : vector<1x8xf32>, vector<8x8xf32>, vector<1x8xf32> -> vector<1x8xf32>
    %423 = vector.extract_strided_slice %362 {offsets = [8, 88], sizes = [8, 8], strides = [1, 1]} : vector<16x96xf32> to vector<8x8xf32>
    %424 = vector.extract_strided_slice %400 {offsets = [7, 0], sizes = [1, 8], strides = [1, 1]} : vector<8x8xf32> to vector<1x8xf32>
    %cst_134 = arith.constant dense<0.000000e+00> : vector<1x8xf32>
    %425 = tpu.matmul %424, %423, %cst_134 {dimension_numbers = #tpu.dot_dimension_numbers<[1], [0], [0], [1], [0, 0, 1, 1], [], []>} : vector<1x8xf32>, vector<8x8xf32>, vector<1x8xf32> -> vector<1x8xf32>
    %426 = tpu.concatenate %416, %419, %422, %425 in 1 : vector<1x8xf32>, vector<1x8xf32>, vector<1x8xf32>, vector<1x8xf32> -> vector<1x32xf32>
    %427 = tpu.concatenate %413, %426 in 0 : vector<1x32xf32>, vector<1x32xf32> -> vector<2x32xf32>
    %c0_135 = arith.constant 0 : index
    %c0_136 = arith.constant 0 : index
    %428 = vector.load %arg2[%c0_135, %c0_136] : memref<8x32xf32, #tpu.memory_space<vmem>>, vector<1x32xf32>
    %429 = vector.broadcast %428 : vector<1x32xf32> to vector<2x32xf32>
    %430 = arith.addf %427, %429 : vector<2x32xf32>
    %c2_137 = arith.constant 2 : index
    %c0_138 = arith.constant 0 : index
    %c0_139 = arith.constant 0 : index
    %431 = vector.load %arg6[%c2_137, %c0_138, %c0_139] : memref<3x32x32xf32, #tpu.memory_space<vmem>>, vector<1x32x32xf32>
    %432 = vector.shape_cast %431 : vector<1x32x32xf32> to vector<32x32xf32>
    %cst_140 = arith.constant dense<0.000000e+00> : vector<2x32xf32>
    %433 = tpu.matmul %430, %432, %cst_140 {dimension_numbers = #tpu.dot_dimension_numbers<[1], [0], [0], [1], [0, 0, 1, 1], [], []>} : vector<2x32xf32>, vector<32x32xf32>, vector<2x32xf32> -> vector<2x32xf32>
    %434 = vector.extract_strided_slice %0 {offsets = [26, 0], sizes = [1, 32], strides = [1, 1]} : vector<27x96xf32> to vector<1x32xf32>
    %435 = vector.broadcast %434 : vector<1x32xf32> to vector<2x32xf32>
    %436 = arith.addf %433, %435 : vector<2x32xf32>
    %437 = math.tanh %436 : vector<2x32xf32>
    %c0_141 = arith.constant 0 : index
    %c0_142 = arith.constant 0 : index
    %438 = vector.load %arg10[%c0_141, %c0_142] : memref<2x32xf32, #tpu.memory_space<vmem>>, vector<2x32xf32>
    tpu.vector_store %arg10[%c0_141, %c0_142], %437 {strides = array<i32>} : memref<2x32xf32, #tpu.memory_space<vmem>>, vector<2x32xf32>,
    return
  }
}

</mosaic_0001>

<bundles_post_ra>
// kernel: bert_forward.1
= control target key start
LH: loop header
LB: loop body
LE: loop exit
PB: predicated region body
PF: predicated region fallthrough
CT: control target
= control target key end

     0   :  { %16 = vsyncpa [#allocation3], 0  ;;  %s3541_s0 = inlined_call_operand.vmem [shape: s32[16,1], index: 0, kind: input, shape index: {}]   ;;  %s3542_s1 = inlined_call_operand.vmem [shape: f32[2,8], index: 1, kind: input, shape index: {}]   ;;  %s3543_s2 = inlined_call_operand.vmem [shape: f32[8,32], index: 2, kind: input, shape index: {}]   ;;  %s3544_s3 = inlined_call_operand.vmem [shape: f32[100,32], index: 3, kind: input, shape index: {}]   ;;  %s3545_s4 = inlined_call_operand.hbm [shape: f32[27,96], index: 4, kind: input, shape index: {}]   ;;  %s3546_s5 = inlined_call_operand.vmem [shape: f32[3,32,96], index: 5, kind: input, shape index: {}]   ;;  %s3547_s6 = inlined_call_operand.vmem [shape: f32[3,32,32], index: 6, kind: input, shape index: {}]   ;;  %s3548_s7 = inlined_call_operand.vmem [shape: f32[2,32,64], index: 7, kind: input, shape index: {}]   ;;  %s3549_s8 = inlined_call_operand.vmem [shape: f32[2,64,32], index: 8, kind: input, shape index: {}]   ;;  %s3550_s9 = inlined_call_operand.hbm [shape: f32[16,32], index: 9, kind: output, shape index: {0}]   ;;  %s3551_s10 = inlined_call_operand.hbm [shape: f32[2,32], index: 10, kind: output, shape index: {1}]  }
   0x1   :  { %17 = vsyncpa [#allocation4], 0 }
   0x2   :  { %18 = vsyncpa [#allocation7], 0  ;;  %s31_s15 = sshll.u32 %s3545_s4, 4  ;;  %s2812_s16 = smov [#allocation2]   ;;  %s32_s15 = int_to_ptr.hbm [resolvable:$true] %s31_s15 }
   0x3   :  { %s33_s17 = sshll.u32 %s2812_s16, 4  ;;  %s3552_s18 = smov 128   ;;  %s34_s17 = int_to_ptr.vmem [resolvable:$true] %s33_s17 }
   0x4   :  { %s2814_s19 = smov 8  }
   0x5   :  { %39 = dma.hbm_to_vmem [thread:$0]  %s32_s15, 512, %s34_s17, [#allocation3], %s3552_s18, %s3552_s18, %s2814_s19  }
   0x6   :  { %2806 = dma.done.wait [#allocation3], 512  }
   0x7   :  { %2807 = vsyncadd [#allocation3], 4294966784  ;;  %v2815_v0 = vmov 0   ;;  %vm59_vm0 = vcmask 1043456   ;;  %v61_v1 = vld [vmem:[%s3541_s0] sm:$0xff]  ;;  %v86_v3 = vld [vmem:[%s3544_s3 + $0x58] sm:$0xff]  ;;  %v63_v16 = vlaneseq }
   0x8   :  { %2631 = vset.pattern.permute.xlu0 %v2815_v0  ;;  %v87_v2 = vld [vmem:[%s3544_s3 + $0x60] sm:$0xf]  ;;  %v85_v4 = vld [vmem:[%s3544_s3 + $0x50] sm:$0xff]  ;;  %v84_v5 = vld [vmem:[%s3544_s3 + $0x48] sm:$0xff]  ;;  %vm95_vm1 = vcmask 818176   ;;  %v2816_v19 = vmov 0.0  }
   0x9   :  { %66 = vperm.xlu0 %2631, %v61_v1   ;;  %2488 = vmatpush.msk.msra.mxu0 %vm59_vm0, %v87_v2  ;;  %v62_v6 = vld [vmem:[%s3541_s0 + $0x8] sm:$0xff]  ;;  %v83_v7 = vld [vmem:[%s3544_s3 + $0x40] sm:$0xff]  ;;  %v82_v8 = vld [vmem:[%s3544_s3 + $0x38] sm:$0xff]  ;;  %v64_v17 = vand.u32 127, %v63_v16  ;;  %vm90_vm4 = vcmask 1046528   ;;  %vm128_vm5 = vcmask 261120  }
   0xa   :  { %v81_v9 = vld [vmem:[%s3544_s3 + $0x30] sm:$0xff]  ;;  %v80_v10 = vld [vmem:[%s3544_s3 + $0x28] sm:$0xff]  ;;  %v79_v11 = vld [vmem:[%s3544_s3 + $0x20] sm:$0xff]  ;;  %v2817_v34 = vmov 32.0   ;;  %s2819_s17 = smov 80   ;;  %s2820_s20 = smov 88  }
   0xb   :  { %109 = vmatpush.msra.mxu0 %v86_v3  ;;  %v78_v12 = vld [vmem:[%s3544_s3 + $0x18] sm:$0xff]  ;;  %v77_v13 = vld [vmem:[%s3544_s3 + $0x10] sm:$0xff]  ;;  %v76_v14 = vld [vmem:[%s3544_s3 + $0x8] sm:$0xff]  ;;  %2633 = vrcp.f32 %v2817_v34  ;;  %s2821_s0 = smov 120   ;;  %s2822_s21 = smov 72   ;;  %vm226_vm13 = vcmask 64512  }
   0xc   :  { %v75_v15 = vld [vmem:[%s3544_s3] sm:$0xff]  ;;  %v53_v24 = vld [vmem:[#allocation2 + $0x8] sm:$0xff]  ;;  %s2818_s3 = smov 96   ;;  %v192_v52 = vld [vmem:[%s3546_s5 + $0x18] sm:$0xff]  ;;  %s2823_s4 = smov 112   ;;  %vm667_vm14 = vcmask 130048  }
   0xd   :  { %110 = vmatpush.msra.mxu0 %v85_v4  ;;  %v52_v23 = vld [vmem:[#allocation2] sm:$0xff]  ;;  %v92_v26 = vrot.slane %v53_v24, 1  ;;  %212 = vmatpush.msra.mxu1 %v192_v52  ;;  %v191_v53 = vld [vmem:[%s3546_s5 + $0x10] sm:$0xff]  ;;  %v190_v54 = vld [vmem:[%s3546_s5 + $0x8] sm:$0xff]  ;;  %s2824_s22 = smov 104   ;;  %s2826_s25 = smov 64  }
   0xe   :  { %v91_v25 = vrot.slane %v52_v23, 1  ;;  %v180_v37 = vperm.slane %v52_v23, 0  ;;  %v189_v55 = vld [vmem:[%s3546_s5] sm:$0xff]  ;;  %s2827_s26 = smov 48   ;;  %s2828_s27 = smov 56   ;;  %vm669_vm15 = vcmask 195584  }
   0xf   :  { %111 = vmatpush.msra.mxu0 %v84_v5  ;;  %213 = vmatpush.msra.mxu1 %v191_v53  ;;  %s2829_s28 = smov 16   ;;  %s2830_s29 = smov 24  }
  0x10   :  { %v93_v27 = vsel %vm90_vm4, %v91_v25, %v92_v26  ;;  %s2832_s23 = smov [#allocation6]  }
  0x11   :  { %69 = vperm.xlu0 %2631, %v62_v6   ;;  %112 = vmatpush.msra.mxu0 %v83_v7  ;;  %v2634_v35 = vpop.eup %2633  ;;  %s2471_s24 = sshll.u32 %s2832_s23, 4  ;;  %s2472_s24 = int_to_ptr.vmem [resolvable:$true] %s2471_s24 }
  0x12   :  { %v136_v36 = vmul.f32 32.0, %v2634_v35  ;;  %vm140_vm6 = vweird.f32 %v2634_v35  ;;  %214 = vmatpush.msra.mxu1 %v190_v54 }
  0x13   :  { %113 = vmatpush.msra.mxu0 %v82_v8 }
  0x14   :  { %v137_v38 = vsub.f32 1.0, %v136_v36  ;;  %215 = vmatpush.msra.mxu1 %v189_v55 }
  0x15   :  { %114 = vmatpush.msra.mxu0 %v81_v9 }
  0x16   :  { %v138_v39 = vmul.f32 %v2634_v35, %v137_v38 }
  0x17   :  { %115 = vmatpush.msra.mxu0 %v80_v10 }
  0x18   :  { %v139_v40 = vadd.f32 %v2634_v35, %v138_v39  ;;  %v56_v39 = vld [vmem:[%s3542_s1] sm:$0x3]  ;;  %s2825_s1 = smov 40  }
  0x19   :  { %116 = vmatpush.msra.mxu0 %v79_v11  ;;  %184 = vrot.lane.b32.xlu0 %v180_v37, %s2818_s3 }
  0x1a   :  { %v2944_v41 = vsel %vm140_vm6, %v2634_v35, %v139_v40  ;;  %v3028_v40 = vperm.slane %v56_v39, 0 }
  0x1b   :  { %117 = vmatpush.msra.mxu0 %v78_v12 }
  0x1d   :  { %118 = vmatpush.msra.mxu0 %v77_v13 }
  0x1f   :  { %119 = vmatpush.msra.mxu0 %v76_v14 }
  0x21   :  { %120 = vmatpush.msra.mxu0 %v75_v15 }
  0x7b   :  { %v67_v18 = vpop.permute.xlu0 %66 }
  0x7c   :  { %vm71_vm2 = vcmp.eq.s32.totalorder %v64_v17, %v67_v18 }
  0x7d   :  { %v73_v20 = vsel %vm71_vm2, 1.0, %v2816_v19 }
  0x7e   :  { %2489 = vmatmul.msk.f32.vlgmr.msra.gmra.mxu0 %vm95_vm1, %v73_v20 }
  0x83   :  { %v70_v21 = vpop.permute.xlu0 %69 }
  0x84   :  { %vm72_vm3 = vcmp.eq.s32.totalorder %v64_v17, %v70_v21 }
  0x85   :  { %v74_v22 = vsel %vm72_vm3, 1.0, %v2816_v19  ;;  %v2972_v19 = vld [vmem:[#allocation2 + $0x10] sm:$0xff] }
  0x86   :  { %2490 = vmatmul.msk.f32.gmra.mxu0 %vm95_vm1, %v74_v22  ;;  %v193_v20 = vperm.slane %v2972_v19, 1 }
  0x8b   :  { %v185_v10 = vpop.permute.xlu0 %184 }
  0xfb   :  { %v122_v28 = vpop.f32.mrf.mxu0 }
  0xfc   :  { %v123_v29 = vadd.f32 %v122_v28, %v93_v27 }
  0xfe   :  { %v129_v30 = vsel %vm128_vm5, %v123_v29, 0.0 }
  0xff   :  { %130 = vadd.xlane.f32.xlu1 %v129_v30 }
 0x103   :  { %v125_v31 = vpop.f32.mrf.mxu0 }
 0x104   :  { %v126_v32 = vadd.f32 %v125_v31, %v93_v27 }
 0x106   :  { %v132_v33 = vsel %vm128_vm5, %v126_v32, 0.0 }
 0x107   :  { %133 = vadd.xlane.f32.xlu1 %v132_v33 }
 0x172   :  { %v131_v42 = vpop.xlane.xlu1 %130 }
 0x173   :  { %v142_v43 = vmul.f32 %v2944_v41, %v131_v42 }
 0x175   :  { %v144_v44 = vsub.f32 %v123_v29, %v142_v43 }
 0x177   :  { %v146_v45 = vmul.f32 %v144_v44, %v144_v44 }
 0x179   :  { %v148_v46 = vsel %vm128_vm5, %v146_v45, 0.0 }
 0x17a   :  { %149 = vadd.xlane.f32.xlu2 %v148_v46  ;;  %v134_v47 = vpop.xlane.xlu1 %133 }
 0x17b   :  { %v143_v48 = vmul.f32 %v2944_v41, %v134_v47 }
 0x17d   :  { %v145_v49 = vsub.f32 %v126_v32, %v143_v48 }
 0x17f   :  { %v147_v50 = vmul.f32 %v145_v49, %v145_v49 }
 0x181   :  { %v151_v51 = vsel %vm128_vm5, %v147_v50, 0.0 }
 0x182   :  { %152 = vadd.xlane.f32.xlu2 %v151_v51  ;;  %v3034_v51 = vperm.slane %v56_v39, 1 }
 0x1ed   :  { %v150_v56 = vpop.xlane.xlu2 %149 }
 0x1ee   :  { %v154_v57 = vmul.f32 %v150_v56, %v2944_v41 }
 0x1f0   :  { %v156_v58 = vadd.f32 1e-12, %v154_v57 }
 0x1f2   :  { %2635 = vrsqrt.f32 %v156_v58  ;;  %vm164_vm8 = vweird.f32 %v156_v58 }
 0x1f5   :  { %v153_v59 = vpop.xlane.xlu2 %152 }
 0x1f6   :  { %v155_v60 = vmul.f32 %v153_v59, %v2944_v41 }
 0x1f8   :  { %v2636_v61 = vpop.eup %2635  ;;  %v157_v62 = vadd.f32 1e-12, %v155_v60 }
 0x1f9   :  { %v159_v63 = vmul.f32 %v2636_v61, %v156_v58  ;;  %vm165_vm7 = vweird.f32 %v2636_v61 }
 0x1fa   :  { %2637 = vrsqrt.f32 %v157_v62  ;;  %vm166_vm9 = vmor %vm164_vm8, %vm165_vm7  ;;  %vm174_vm11 = vweird.f32 %v157_v62 }
 0x1fb   :  { %v160_v0 = vmul.f32 %v2636_v61, %v159_v63 }
 0x1fd   :  { %v161_v1 = vmul.f32 0.5, %v160_v0 }
 0x1ff   :  { %v162_v2 = vsub.f32 1.5, %v161_v1 }
 0x200   :  { %v2638_v3 = vpop.eup %2637 }
 0x201   :  { %v163_v4 = vmul.f32 %v2636_v61, %v162_v2  ;;  %v169_v5 = vmul.f32 %v2638_v3, %v157_v62  ;;  %vm175_vm10 = vweird.f32 %v2638_v3 }
 0x202   :  { %vm176_vm12 = vmor %vm174_vm11, %vm175_vm10 }
 0x203   :  { %v170_v6 = vmul.f32 %v2638_v3, %v169_v5  ;;  %v167_v7 = vsel %vm166_vm9, %v2636_v61, %v163_v4  ;;  %vm945_vm9 = vcmask 523264  }
 0x204   :  { %v178_v8 = vmul.f32 %v167_v7, %v144_v44 }
 0x205   :  { %v171_v9 = vmul.f32 0.5, %v170_v6 }
 0x206   :  { %v181_v11 = vmul.f32 %v180_v37, %v178_v8 }
 0x207   :  { %v172_v12 = vsub.f32 1.5, %v171_v9 }
 0x208   :  { %v2964_v13 = vadd.f32 %v185_v10, %v181_v11 }
 0x209   :  { %v173_v14 = vmul.f32 %v2638_v3, %v172_v12 }
 0x20a   :  { %2491 = vmatmul.msk.f32.vlgmr.msra.gmra.mxu1 %vm128_vm5, %v2964_v13 }
 0x20b   :  { %v177_v15 = vsel %vm176_vm12, %v2638_v3, %v173_v14 }
 0x20c   :  { %v179_v16 = vmul.f32 %v177_v15, %v145_v49 }
 0x20e   :  { %v182_v17 = vmul.f32 %v180_v37, %v179_v16 }
 0x210   :  { %v2968_v18 = vadd.f32 %v185_v10, %v182_v17 }
 0x212   :  { %2492 = vmatmul.msk.f32.gmra.mxu1 %vm128_vm5, %v2968_v18 }
 0x287   :  { %v217_v21 = vpop.f32.mrf.mxu1 }
 0x288   :  { %v2975_v22 = vadd.f32 %v217_v21, %v193_v20 }
 0x28a   :  { %281 = vrot.lane.b32.xlu0 %v2975_v22, %s2819_s17  ;;  %224 = vrot.lane.b32.xlu1 %v2975_v22, %s2818_s3 }
 0x28b   :  { %253 = vrot.lane.b32.xlu2 %v2975_v22, %s2820_s20 }
 0x28f   :  { %v220_v23 = vpop.f32.mrf.mxu1 }
 0x290   :  { %v2983_v24 = vadd.f32 %v220_v23, %v193_v20 }
 0x292   :  { %251 = vrot.lane.b32.xlu0 %v2975_v22, %s2821_s0  ;;  %336 = vrot.lane.b32.xlu1 %v2983_v24, %s2818_s3 }
 0x293   :  { %309 = vrot.lane.b32.xlu2 %v2975_v22, %s2822_s21 }
 0x29a   :  { %279 = vrot.lane.b32.xlu0 %v2975_v22, %s2823_s4  ;;  %418 = vrot.lane.b32.xlu1 %v2983_v24, %s2824_s22 }
 0x29b   :  { %420 = vrot.lane.b32.xlu2 %v2983_v24, %s2822_s21 }
 0x2a2   :  { %307 = vrot.lane.b32.xlu0 %v2975_v22, %s2824_s22  ;;  %362 = vrot.lane.b32.xlu1 %v2983_v24, %s2821_s0 }
 0x2a3   :  { %392 = vrot.lane.b32.xlu2 %v2983_v24, %s2819_s17 }
 0x2aa   :  { %364 = vrot.lane.b32.xlu0 %v2983_v24, %s2820_s20 }
 0x2b2   :  { %390 = vrot.lane.b32.xlu0 %v2983_v24, %s2823_s4 }
 0x2e5   :  { %v254_v25 = vpop.permute.xlu2 %253 }
 0x2e6   :  { %2495 = vmatpush.xpose.msk.msra.mxu3 %vm226_vm13, %v254_v25 }
 0x2ed   :  { %v310_v26 = vpop.permute.xlu2 %309 }
 0x2ee   :  { %2499 = vmatpush.xpose.msk.msrb.mxu3 %vm226_vm13, %v310_v26 }
 0x2f5   :  { %v421_v27 = vpop.permute.xlu2 %420 }
 0x2fc   :  { %v282_v28 = vpop.permute.xlu0 %281  ;;  %v225_v29 = vpop.permute.xlu1 %224 }
 0x2fd   :  { %v393_v30 = vpop.permute.xlu2 %392  ;;  %2493 = vmatpush.xpose.msk.msra.mxu2 %vm226_vm13, %v225_v29 }
 0x2fe   :  { %2505 = vmatpush.xpose.msk.msrb.mxu1 %vm226_vm13, %v393_v30 }
 0x300   :  { %2494 = vmatmul.msk.f32.vlgmr.msra.gmra.mxu2 %vm226_vm13, %v2975_v22 }
 0x301   :  { %2497 = vmatpush.xpose.msk.msrb.mxu2 %vm226_vm13, %v282_v28 }
 0x304   :  { %v252_v31 = vpop.permute.xlu0 %251  ;;  %v337_v32 = vpop.permute.xlu1 %336 }
 0x305   :  { %2496 = vmatmul.msk.f32.vlgmr.msra.gmra.mxu3 %vm226_vm13, %v252_v31  ;;  %2501 = vmatpush.xpose.msk.msra.mxu2 %vm226_vm13, %v337_v32 }
 0x30c   :  { %v280_v33 = vpop.permute.xlu0 %279  ;;  %v419_v35 = vpop.permute.xlu1 %418 }
 0x30d   :  { %2498 = vmatmul.msk.f32.vlgmr.msrb.gmra.mxu2 %vm226_vm13, %v280_v33 }
 0x30e   :  { %2507 = vmatpush.xpose.msk.msrb.mxu2 %vm226_vm13, %v421_v27 }
 0x314   :  { %v308_v34 = vpop.permute.xlu0 %307  ;;  %v363_v37 = vpop.permute.xlu1 %362 }
 0x315   :  { %2500 = vmatmul.msk.f32.vlgmr.msrb.gmra.mxu3 %vm226_vm13, %v308_v34  ;;  %2502 = vmatmul.msk.f32.vlgmr.msra.gmra.mxu2 %vm226_vm13, %v2983_v24 }
 0x31c   :  { %v365_v36 = vpop.permute.xlu0 %364 }
 0x31d   :  { %2503 = vmatpush.xpose.msk.msra.mxu3 %vm226_vm13, %v365_v36  ;;  %2508 = vmatmul.msk.f32.vlgmr.msrb.gmra.mxu2 %vm226_vm13, %v419_v35 }
 0x320   :  { %2504 = vmatmul.msk.f32.vlgmr.msra.gmra.mxu3 %vm226_vm13, %v363_v37 }
 0x324   :  { %v391_v38 = vpop.permute.xlu0 %390 }
 0x325   :  { %2506 = vmatmul.msk.f32.vlgmr.msrb.gmra.mxu1 %vm226_vm13, %v391_v38 }
 0x383   :  { %v248_v42 = vpop.f32.mrf.mxu2 }
 0x384   :  { %v446_v43 = vmul.f32 0.35355338, %v248_v42 }
 0x386   :  { %v454_v44 = vadd.f32 %v446_v43, %v3028_v40 }
 0x388   :  { %v276_v45 = vpop.f32.mrf.mxu3  ;;  %v462_v46 = vsel %vm226_vm13, %v454_v44, -inf }
 0x389   :  { %v447_v47 = vmul.f32 0.35355338, %v276_v45  ;;  %463 = vmax.xlane.f32.xlu2 %v462_v46 }
 0x38b   :  { %v455_v48 = vadd.f32 %v447_v47, %v3028_v40 }
 0x38d   :  { %v465_v50 = vsel %vm226_vm13, %v455_v48, -inf }
 0x390   :  { %v304_v49 = vpop.f32.mrf.mxu2 }
 0x391   :  { %466 = vmax.xlane.f32.xlu2 %v465_v50  ;;  %v448_v6 = vmul.f32 0.35355338, %v304_v49 }
 0x393   :  { %v456_v9 = vadd.f32 %v448_v6, %v3028_v40 }
 0x395   :  { %v468_v10 = vsel %vm226_vm13, %v456_v9, -inf }
 0x398   :  { %v332_v52 = vpop.f32.mrf.mxu3  ;;  %v359_v53 = vpop.f32.mrf.mxu2 }
 0x399   :  { %v449_v54 = vmul.f32 0.35355338, %v332_v52  ;;  %v450_v55 = vmul.f32 0.35355338, %v359_v53 }
 0x39b   :  { %v457_v56 = vadd.f32 %v449_v54, %v3028_v40  ;;  %v3038_v57 = vadd.f32 %v450_v55, %v3034_v51 }
 0x39d   :  { %v471_v58 = vsel %vm226_vm13, %v457_v56, -inf  ;;  %v474_v59 = vsel %vm226_vm13, %v3038_v57, -inf }
 0x39e   :  { %472 = vmax.xlane.f32.xlu0 %v471_v58  ;;  %475 = vmax.xlane.f32.xlu2 %v474_v59 }
 0x3a0   :  { %v443_v60 = vpop.f32.mrf.mxu2 }
 0x3a1   :  { %v453_v61 = vmul.f32 0.35355338, %v443_v60 }
 0x3a2   :  { %v415_v62 = vpop.f32.mrf.mxu1 }
 0x3a3   :  { %v452_v63 = vmul.f32 0.35355338, %v415_v62  ;;  %v387_v0 = vpop.f32.mrf.mxu3  ;;  %v3044_v1 = vadd.f32 %v453_v61, %v3034_v51 }
 0x3a4   :  { %v451_v2 = vmul.f32 0.35355338, %v387_v0 }
 0x3a5   :  { %v483_v3 = vsel %vm226_vm13, %v3044_v1, -inf  ;;  %v460_v4 = vadd.f32 %v452_v63, %v3034_v51 }
 0x3a6   :  { %484 = vmax.xlane.f32.xlu2 %v483_v3  ;;  %v459_v5 = vadd.f32 %v451_v2, %v3034_v51 }
 0x3a7   :  { %v480_v7 = vsel %vm226_vm13, %v460_v4, -inf }
 0x3a8   :  { %481 = vmax.xlane.f32.xlu1 %v480_v7  ;;  %v477_v8 = vsel %vm226_vm13, %v459_v5, -inf }
 0x3a9   :  { %478 = vmax.xlane.f32.xlu0 %v477_v8 }
 0x3b0   :  { %469 = vmax.xlane.f32.xlu1 %v468_v10 }
 0x3bd   :  { %628 = vrot.lane.b32.xlu0 %v2975_v22, %s2825_s1 }
 0x3be   :  { %550 = vrot.lane.b32.xlu2 %v2975_v22, %s2826_s25 }
 0x3c9   :  { %602 = vrot.lane.b32.xlu1 %v2975_v22, %s2827_s26 }
 0x3fc   :  { %v464_v11 = vpop.xlane.xlu2 %463 }
 0x3fd   :  { %v486_v12 = vsub.f32 %v454_v44, %v464_v11 }
 0x3ff   :  { %v494_v14 = vmul.f32 1.442695, %v486_v12 }
 0x401   :  { %2639 = vpow2.f32 %v494_v14 }
 0x404   :  { %v467_v15 = vpop.xlane.xlu2 %466 }
 0x405   :  { %v487_v16 = vsub.f32 %v455_v48, %v467_v15 }
 0x407   :  { %v3060_v17 = vpop.eup %2639  ;;  %v496_v20 = vmul.f32 1.442695, %v487_v16 }
 0x408   :  { %v510_v21 = vsel %vm226_vm13, %v3060_v17, 0.0 }
 0x409   :  { %2641 = vpow2.f32 %v496_v20  ;;  %511 = vadd.xlane.f32.xlu1 %v510_v21 }
 0x40f   :  { %v3064_v23 = vpop.eup %2641 }
 0x410   :  { %v513_v25 = vsel %vm226_vm13, %v3064_v23, 0.0 }
 0x411   :  { %v476_v26 = vpop.xlane.xlu2 %475  ;;  %514 = vadd.xlane.f32.xlu0 %v513_v25  ;;  %v473_v27 = vpop.xlane.xlu0 %472 }
 0x412   :  { %v489_v33 = vsub.f32 %v457_v56, %v473_v27  ;;  %v490_v56 = vsub.f32 %v3038_v57, %v476_v26 }
 0x414   :  { %v500_v37 = vmul.f32 1.442695, %v489_v33  ;;  %v502_v59 = vmul.f32 1.442695, %v490_v56 }
 0x419   :  { %v485_v28 = vpop.xlane.xlu2 %484 }
 0x41a   :  { %v493_v54 = vsub.f32 %v3044_v1, %v485_v28 }
 0x41b   :  { %v482_v29 = vpop.xlane.xlu1 %481 }
 0x41c   :  { %v492_v30 = vsub.f32 %v460_v4, %v482_v29  ;;  %v479_v31 = vpop.xlane.xlu0 %478  ;;  %v508_v55 = vmul.f32 1.442695, %v493_v54 }
 0x41d   :  { %v491_v32 = vsub.f32 %v459_v5, %v479_v31 }
 0x41e   :  { %v506_v34 = vmul.f32 1.442695, %v492_v30 }
 0x41f   :  { %v504_v35 = vmul.f32 1.442695, %v491_v32 }
 0x420   :  { %2643 = vpow2.f32 %v506_v34 }
 0x421   :  { %2645 = vpow2.f32 %v504_v35  ;;  %v551_v36 = vpop.permute.xlu2 %550 }
 0x422   :  { %571 = vmatpush.msrb.mxu3 %v551_v36  ;;  %2647 = vpow2.f32 %v500_v37  ;;  %v793_v37 = vld [vmem:[%s3547_s6 + $0x18] sm:$0xff] }
 0x423   :  { %v470_v38 = vpop.xlane.xlu1 %469 }
 0x424   :  { %v488_v39 = vsub.f32 %v456_v9, %v470_v38  ;;  %v792_v38 = vld [vmem:[%s3547_s6 + $0x10] sm:$0xff] }
 0x426   :  { %v2644_v42 = vpop.eup %2643  ;;  %v498_v43 = vmul.f32 1.442695, %v488_v39  ;;  %v791_v39 = vld [vmem:[%s3547_s6 + $0x8] sm:$0xff] }
 0x427   :  { %v3068_v44 = vpop.eup %2645  ;;  %v528_v45 = vsel %vm226_vm13, %v2644_v42, 0.0 }
 0x428   :  { %2649 = vpow2.f32 %v498_v43  ;;  %529 = vadd.xlane.f32.xlu1 %v528_v45  ;;  %v525_v46 = vsel %vm226_vm13, %v3068_v44, 0.0  ;;  %v2648_v47 = vpop.eup %2647 }
 0x429   :  { %526 = vadd.xlane.f32.xlu2 %v525_v46  ;;  %v519_v50 = vsel %vm226_vm13, %v2648_v47, 0.0  ;;  %2651 = vpow2.f32 %v508_v55 }
 0x42a   :  { %2653 = vpow2.f32 %v502_v59 }
 0x42e   :  { %v2650_v48 = vpop.eup %2649 }
 0x42f   :  { %v629_v49 = vpop.permute.xlu0 %628  ;;  %v516_v52 = vsel %vm226_vm13, %v2650_v48, 0.0  ;;  %v2652_v58 = vpop.eup %2651 }
 0x430   :  { %649 = vmatpush.msra.mxu3 %v629_v49  ;;  %520 = vadd.xlane.f32.xlu1 %v519_v50  ;;  %v531_v60 = vsel %vm226_vm13, %v2652_v58, 0.0  ;;  %v2654_v61 = vpop.eup %2653 }
 0x431   :  { %517 = vadd.xlane.f32.xlu0 %v516_v52  ;;  %v522_v62 = vsel %vm226_vm13, %v2654_v61, 0.0 }
 0x43b   :  { %v603_v53 = vpop.permute.xlu1 %602 }
 0x43c   :  { %623 = vmatpush.msra.mxu2 %v603_v53 }
 0x445   :  { %723 = vrot.lane.b32.xlu0 %v2983_v24, %s2827_s26 }
 0x449   :  { %576 = vrot.lane.b32.xlu1 %v2975_v22, %s2828_s27 }
 0x451   :  { %749 = vrot.lane.b32.xlu1 %v2983_v24, %s2825_s1 }
 0x46f   :  { %532 = vadd.xlane.f32.xlu0 %v531_v60 }
 0x47b   :  { %523 = vadd.xlane.f32.xlu1 %v522_v62 }
 0x47c   :  { %v512_v22 = vpop.xlane.xlu1 %511 }
 0x47d   :  { %2655 = vrcp.f32 %v512_v22 }
 0x483   :  { %v2656_v63 = vpop.eup %2655  ;;  %697 = vrot.lane.b32.xlu0 %v2983_v24, %s2828_s27 }
 0x484   :  { %v542_v0 = vmul.f32 %v2656_v63, %v3060_v17  ;;  %v515_v1 = vpop.xlane.xlu0 %514 }
 0x486   :  { %2509 = vmatmul.msk.f32.vlgmr.msrb.gmra.mxu3 %vm226_vm13, %v542_v0 }
 0x48b   :  { %671 = vrot.lane.b32.xlu0 %v2983_v24, %s2826_s25 }
 0x49b   :  { %v530_v57 = vpop.xlane.xlu1 %529 }
 0x49c   :  { %v527_v17 = vpop.xlane.xlu2 %526 }
 0x4a3   :  { %v521_v2 = vpop.xlane.xlu1 %520 }
 0x4a4   :  { %v518_v3 = vpop.xlane.xlu0 %517  ;;  %2657 = vrcp.f32 %v521_v2 }
 0x4a5   :  { %2659 = vrcp.f32 %v518_v3 }
 0x4a6   :  { %2661 = vrcp.f32 %v530_v57 }
 0x4a7   :  { %2663 = vrcp.f32 %v515_v1 }
 0x4aa   :  { %v2658_v4 = vpop.eup %2657 }
 0x4ab   :  { %v2660_v5 = vpop.eup %2659  ;;  %v545_v6 = vmul.f32 %v2658_v4, %v2648_v47 }
 0x4ac   :  { %v544_v7 = vmul.f32 %v2660_v5, %v2650_v48  ;;  %v2662_v8 = vpop.eup %2661 }
 0x4ad   :  { %2512 = vmatmul.msk.f32.vlgmr.msra.gmra.mxu3 %vm226_vm13, %v545_v6  ;;  %v548_v9 = vmul.f32 %v2662_v8, %v2644_v42  ;;  %v2664_v24 = vpop.eup %2663  ;;  %v790_v42 = vld [vmem:[%s3547_s6] sm:$0xff] }
 0x4ae   :  { %2511 = vmatmul.msk.f32.vlgmr.msra.gmra.mxu2 %vm226_vm13, %v544_v7  ;;  %v543_v11 = vmul.f32 %v2664_v24, %v3064_v23 }
 0x4b7   :  { %v724_v10 = vpop.permute.xlu0 %723 }
 0x4b8   :  { %744 = vmatpush.msrb.mxu2 %v724_v10 }
 0x4b9   :  { %2515 = vmatmul.msk.f32.vlgmr.msrb.gmra.mxu2 %vm226_vm13, %v548_v9 }
 0x4bb   :  { %v577_v12 = vpop.permute.xlu1 %576 }
 0x4bc   :  { %597 = vmatpush.msra.mxu1 %v577_v12  ;;  %v883_v12 = vld [vmem:[%s3548_s7 + $0x10] sm:$0xff] }
 0x4bd   :  { %2510 = vmatmul.msk.f32.vlgmr.msra.gmra.mxu1 %vm226_vm13, %v543_v11  ;;  %v884_v11 = vld [vmem:[%s3548_s7 + $0x18] sm:$0xff] }
 0x4c3   :  { %v750_v14 = vpop.permute.xlu1 %749 }
 0x4c4   :  { %770 = vmatpush.msrb.mxu3 %v750_v14  ;;  %v882_v14 = vld [vmem:[%s3548_s7 + $0x8] sm:$0xff] }
 0x4e2   :  { %v533_v15 = vpop.xlane.xlu0 %532 }
 0x4e3   :  { %2665 = vrcp.f32 %v533_v15 }
 0x4e4   :  { %2667 = vrcp.f32 %v527_v17  ;;  %v881_v17 = vld [vmem:[%s3548_s7] sm:$0xff] }
 0x4e9   :  { %v2666_v16 = vpop.eup %2665 }
 0x4ea   :  { %v549_v20 = vmul.f32 %v2666_v16, %v2652_v58  ;;  %v2668_v25 = vpop.eup %2667  ;;  %v794_v58 = vperm.slane %v2972_v19, 2 }
 0x4eb   :  { %v547_v23 = vmul.f32 %v2668_v25, %v3068_v44 }
 0x4ec   :  { %2516 = vmatmul.msk.f32.vlgmr.msrb.gmra.mxu3 %vm226_vm13, %v549_v20 }
 0x4ee   :  { %v524_v21 = vpop.xlane.xlu1 %523 }
 0x4ef   :  { %2669 = vrcp.f32 %v524_v21 }
 0x4f5   :  { %v698_v26 = vpop.permute.xlu0 %697  ;;  %v2670_v27 = vpop.eup %2669 }
 0x4f6   :  { %718 = vmatpush.msrb.mxu0 %v698_v26  ;;  %v546_v28 = vmul.f32 %v2670_v27, %v2654_v61  ;;  %v885_v27 = vperm.slane %v2972_v19, 3 }
 0x4f7   :  { %2514 = vmatmul.msk.f32.vlgmr.msrb.gmra.mxu0 %vm226_vm13, %v547_v23 }
 0x4f8   :  { %904 = vmatpush.msra.mxu0 %v884_v11 }
 0x4fa   :  { %905 = vmatpush.msra.mxu0 %v883_v12 }
 0x4fc   :  { %906 = vmatpush.msra.mxu0 %v882_v14 }
 0x4fd   :  { %v672_v29 = vpop.permute.xlu0 %671 }
 0x4fe   :  { %692 = vmatpush.msrb.mxu1 %v672_v29  ;;  %907 = vmatpush.msra.mxu0 %v881_v17 }
 0x4ff   :  { %2513 = vmatmul.msk.f32.vlgmr.msrb.gmra.mxu1 %vm226_vm13, %v546_v28 }
 0x500   :  { %813 = vmatpush.msra.mxu1 %v793_v37 }
 0x502   :  { %814 = vmatpush.msra.mxu1 %v792_v38 }
 0x504   :  { %815 = vmatpush.msra.mxu1 %v791_v39 }
 0x506   :  { %816 = vmatpush.msra.mxu1 %v790_v42 }
 0x509   :  { %v573_v31 = vpop.f32.mrf.mxu3 }
 0x530   :  { %v651_v33 = vpop.f32.mrf.mxu3 }
 0x531   :  { %v625_v30 = vpop.f32.mrf.mxu2 }
 0x532   :  { %659 = vrot.lane.b32.xlu2 %v625_v30, %s2829_s28 }
 0x53a   :  { %v599_v32 = vpop.f32.mrf.mxu1 }
 0x53b   :  { %655 = vrot.lane.b32.xlu0 %v599_v32, %s2814_s19 }
 0x53c   :  { %v746_v36 = vpop.f32.mrf.mxu2 }
 0x543   :  { %663 = vrot.lane.b32.xlu0 %v651_v33, %s2830_s29 }
 0x56f   :  { %v772_v34 = vpop.f32.mrf.mxu3 }
 0x570   :  { %784 = vrot.lane.b32.xlu2 %v772_v34, %s2830_s29 }
 0x574   :  { %v720_v35 = vpop.f32.mrf.mxu0 }
 0x575   :  { %776 = vrot.lane.b32.xlu0 %v720_v35, %s2814_s19 }
 0x57c   :  { %v694_v50 = vpop.f32.mrf.mxu1 }
 0x57d   :  { %780 = vrot.lane.b32.xlu0 %v746_v36, %s2829_s28 }
 0x58c   :  { %v660_v45 = vpop.permute.xlu2 %659 }
 0x5ad   :  { %v656_v43 = vpop.permute.xlu0 %655 }
 0x5ae   :  { %v666_v44 = vsel %vm226_vm13, %v573_v31, %v656_v43 }
 0x5af   :  { %v668_v46 = vsel %vm667_vm14, %v666_v44, %v660_v45 }
 0x5b5   :  { %v664_v47 = vpop.permute.xlu0 %663 }
 0x5b6   :  { %v670_v48 = vsel %vm669_vm15, %v668_v46, %v664_v47 }
 0x5b7   :  { %2517 = vmatmul.msk.f32.vlgmr.msra.gmra.mxu1 %vm128_vm5, %v670_v48  ;;  %v940_v48 = vld [vmem:[%s3549_s8 + $0x38] sm:$0xff] }
 0x5b8   :  { %960 = vmatpush.msra.mxu2 %v940_v48 }
 0x5ca   :  { %v785_v54 = vpop.permute.xlu2 %784 }
 0x5e7   :  { %v777_v49 = vpop.permute.xlu0 %776 }
 0x5e8   :  { %v787_v52 = vsel %vm226_vm13, %v694_v50, %v777_v49  ;;  %v939_v49 = vld [vmem:[%s3549_s8 + $0x30] sm:$0xff]  ;;  %v938_v50 = vld [vmem:[%s3549_s8 + $0x28] sm:$0xff] }
 0x5e9   :  { %961 = vmatpush.msra.mxu2 %v939_v49 }
 0x5eb   :  { %962 = vmatpush.msra.mxu2 %v938_v50 }
 0x5ef   :  { %v781_v53 = vpop.permute.xlu0 %780 }
 0x5f0   :  { %v788_v55 = vsel %vm667_vm14, %v787_v52, %v781_v53  ;;  %v937_v52 = vld [vmem:[%s3549_s8 + $0x20] sm:$0xff]  ;;  %v936_v53 = vld [vmem:[%s3549_s8 + $0x18] sm:$0xff] }
 0x5f1   :  { %v789_v56 = vsel %vm669_vm15, %v788_v55, %v785_v54  ;;  %963 = vmatpush.msra.mxu2 %v937_v52  ;;  %v935_v54 = vld [vmem:[%s3549_s8 + $0x10] sm:$0xff]  ;;  %v934_v55 = vld [vmem:[%s3549_s8 + $0x8] sm:$0xff] }
 0x5f2   :  { %2518 = vmatmul.msk.f32.gmra.mxu1 %vm128_vm5, %v789_v56  ;;  %v933_v56 = vld [vmem:[%s3549_s8] sm:$0xff] }
 0x5f3   :  { %964 = vmatpush.msra.mxu2 %v936_v53 }
 0x5f5   :  { %965 = vmatpush.msra.mxu2 %v935_v54 }
 0x5f7   :  { %966 = vmatpush.msra.mxu2 %v934_v55 }
 0x5f9   :  { %967 = vmatpush.msra.mxu2 %v933_v56 }
 0x634   :  { %v818_v59 = vpop.f32.mrf.mxu1 }
 0x635   :  { %v819_v60 = vadd.f32 %v818_v59, %v794_v58 }
 0x637   :  { %v824_v61 = vadd.f32 %v819_v60, %v2964_v13 }
 0x639   :  { %v826_v62 = vsel %vm128_vm5, %v824_v61, 0.0 }
 0x63a   :  { %827 = vadd.xlane.f32.xlu0 %v826_v62 }
 0x64e   :  { %942 = vrot.lane.b32.xlu0 %v885_v27, %s2826_s25 }
 0x66f   :  { %v821_v22 = vpop.f32.mrf.mxu1 }
 0x670   :  { %v822_v63 = vadd.f32 %v821_v22, %v794_v58 }
 0x672   :  { %v825_v0 = vadd.f32 %v822_v63, %v2968_v18 }
 0x674   :  { %v829_v57 = vsel %vm128_vm5, %v825_v0, 0.0 }
 0x675   :  { %830 = vadd.xlane.f32.xlu1 %v829_v57 }
 0x68e   :  { %871 = vrot.lane.b32.xlu1 %v794_v58, %s2818_s3 }
 0x6ad   :  { %v828_v1 = vpop.xlane.xlu0 %827 }
 0x6ae   :  { %v832_v2 = vmul.f32 %v828_v1, %v2944_v41 }
 0x6b0   :  { %v834_v3 = vsub.f32 %v824_v61, %v832_v2 }
 0x6b2   :  { %v836_v4 = vmul.f32 %v834_v3, %v834_v3 }
 0x6b4   :  { %v838_v5 = vsel %vm128_vm5, %v836_v4, 0.0 }
 0x6b5   :  { %839 = vadd.xlane.f32.xlu2 %v838_v5 }
 0x6c0   :  { %v943_v11 = vpop.permute.xlu0 %942 }
 0x6e8   :  { %v831_v13 = vpop.xlane.xlu1 %830 }
 0x6e9   :  { %v833_v6 = vmul.f32 %v831_v13, %v2944_v41 }
 0x6eb   :  { %v835_v7 = vsub.f32 %v825_v0, %v833_v6 }
 0x6ed   :  { %v837_v8 = vmul.f32 %v835_v7, %v835_v7 }
 0x6ef   :  { %v841_v18 = vsel %vm128_vm5, %v837_v8, 0.0 }
 0x6f0   :  { %842 = vadd.xlane.f32.xlu1 %v841_v18 }
 0x700   :  { %v872_v15 = vpop.permute.xlu1 %871 }
 0x709   :  { %876 = vrot.lane.b32.xlu1 %v794_v58, %s2826_s25 }
 0x728   :  { %v840_v9 = vpop.xlane.xlu2 %839 }
 0x729   :  { %v844_v10 = vmul.f32 %v840_v9, %v2944_v41 }
 0x72b   :  { %v846_v24 = vadd.f32 1e-12, %v844_v10 }
 0x72d   :  { %2671 = vrsqrt.f32 %v846_v24  ;;  %vm854_vm2 = vweird.f32 %v846_v24 }
 0x733   :  { %v2672_v16 = vpop.eup %2671 }
 0x734   :  { %v849_v20 = vmul.f32 %v2672_v16, %v846_v24  ;;  %vm855_vm1 = vweird.f32 %v2672_v16 }
 0x735   :  { %vm856_vm3 = vmor %vm854_vm2, %vm855_vm1 }
 0x736   :  { %v850_v21 = vmul.f32 %v2672_v16, %v849_v20 }
 0x738   :  { %v851_v28 = vmul.f32 0.5, %v850_v21 }
 0x73a   :  { %v852_v29 = vsub.f32 1.5, %v851_v28 }
 0x73c   :  { %v853_v31 = vmul.f32 %v2672_v16, %v852_v29 }
 0x73e   :  { %v857_v34 = vsel %vm856_vm3, %v2672_v16, %v853_v31 }
 0x73f   :  { %v868_v37 = vmul.f32 %v857_v34, %v834_v3 }
 0x741   :  { %v874_v42 = vmul.f32 %v872_v15, %v868_v37  ;;  %v2525_v37 = vld [vmem:[%s3546_s5 + $0x30] sm:$0xff] }
 0x763   :  { %v843_v25 = vpop.xlane.xlu1 %842 }
 0x764   :  { %v845_v26 = vmul.f32 %v843_v25, %v2944_v41 }
 0x766   :  { %v847_v23 = vadd.f32 1e-12, %v845_v26  ;;  %v1021_v26 = vperm.slane %v2972_v19, 4 }
 0x768   :  { %2673 = vrsqrt.f32 %v847_v23  ;;  %vm864_vm7 = vweird.f32 %v847_v23  ;;  %1025 = vrot.lane.b32.xlu0 %v1021_v26, %s2818_s3 }
 0x76e   :  { %v2674_v30 = vpop.eup %2673 }
 0x76f   :  { %v859_v32 = vmul.f32 %v2674_v30, %v847_v23  ;;  %vm865_vm6 = vweird.f32 %v2674_v30 }
 0x770   :  { %vm866_vm8 = vmor %vm864_vm7, %vm865_vm6 }
 0x771   :  { %v860_v33 = vmul.f32 %v2674_v30, %v859_v32 }
 0x773   :  { %v861_v35 = vmul.f32 0.5, %v860_v33 }
 0x775   :  { %v862_v36 = vsub.f32 1.5, %v861_v35 }
 0x777   :  { %v863_v38 = vmul.f32 %v2674_v30, %v862_v36  ;;  %v2526_v36 = vld [vmem:[%s3546_s5 + $0x38] sm:$0xff] }
 0x778   :  { %1054 = vmatpush.msra.mxu3 %v2526_v36 }
 0x779   :  { %v867_v39 = vsel %vm866_vm8, %v2674_v30, %v863_v38  ;;  %v2524_v38 = vld [vmem:[%s3546_s5 + $0x28] sm:$0xff] }
 0x77a   :  { %v869_v44 = vmul.f32 %v867_v39, %v835_v7  ;;  %1055 = vmatpush.msra.mxu3 %v2525_v37  ;;  %v2523_v39 = vld [vmem:[%s3546_s5 + $0x20] sm:$0xff] }
 0x77b   :  { %v877_v43 = vpop.permute.xlu1 %876 }
 0x77c   :  { %v879_v45 = vadd.f32 %v877_v43, %v874_v42  ;;  %v875_v46 = vmul.f32 %v872_v15, %v869_v44  ;;  %1056 = vmatpush.msra.mxu3 %v2524_v38 }
 0x77e   :  { %2519 = vmatmul.msk.f32.vlgmr.msra.gmra.mxu0 %vm128_vm5, %v879_v45  ;;  %v880_v47 = vadd.f32 %v877_v43, %v875_v46  ;;  %1057 = vmatpush.msra.mxu3 %v2523_v39 }
 0x786   :  { %2520 = vmatmul.msk.f32.gmra.mxu0 %vm128_vm5, %v880_v47 }
 0x7fb   :  { %v909_v58 = vpop.f32.mrf.mxu0 }
 0x7fc   :  { %v910_v59 = vadd.f32 %v909_v58, %v885_v27 }
 0x7fe   :  { %v915_v60 = vmul.f32 %v910_v59, %v910_v59 }
 0x800   :  { %v917_v61 = vmul.f32 %v915_v60, %v910_v59 }
 0x802   :  { %v919_v62 = vmul.f32 0.044715, %v917_v61 }
 0x803   :  { %v912_v22 = vpop.f32.mrf.mxu0 }
 0x804   :  { %v921_v63 = vadd.f32 %v919_v62, %v910_v59  ;;  %v913_v0 = vadd.f32 %v912_v22, %v885_v27  ;;  %v1026_v62 = vpop.permute.xlu0 %1025 }
 0x806   :  { %v923_v57 = vmul.f32 0.7978846, %v921_v63  ;;  %v916_v1 = vmul.f32 %v913_v0, %v913_v0 }
 0x808   :  { %2675 = vtanh.f32 %v923_v57  ;;  %v918_v2 = vmul.f32 %v916_v1, %v913_v0 }
 0x80a   :  { %v920_v3 = vmul.f32 0.044715, %v918_v2 }
 0x80c   :  { %v922_v4 = vadd.f32 %v920_v3, %v913_v0 }
 0x80e   :  { %v2676_v5 = vpop.eup %2675  ;;  %v924_v13 = vmul.f32 0.7978846, %v922_v4 }
 0x80f   :  { %v927_v6 = vadd.f32 1.0, %v2676_v5  ;;  %v1035_v5 = vperm.slane %v2972_v19, 5 }
 0x810   :  { %2677 = vtanh.f32 %v924_v13 }
 0x811   :  { %v929_v7 = vmul.f32 0.5, %v927_v6 }
 0x813   :  { %v931_v8 = vmul.f32 %v929_v7, %v910_v59 }
 0x815   :  { %2521 = vmatmul.msk.f32.vlgmr.msra.gmra.mxu2 %vm945_vm9, %v931_v8 }
 0x816   :  { %v2678_v18 = vpop.eup %2677 }
 0x817   :  { %v928_v9 = vadd.f32 1.0, %v2678_v18 }
 0x819   :  { %v930_v10 = vmul.f32 0.5, %v928_v9 }
 0x81b   :  { %v932_v24 = vmul.f32 %v930_v10, %v913_v0 }
 0x81d   :  { %2522 = vmatmul.msk.f32.gmra.mxu2 %vm945_vm9, %v932_v24 }
 0x898   :  { %v969_v12 = vpop.f32.mrf.mxu2 }
 0x899   :  { %v970_v14 = vadd.f32 %v969_v12, %v943_v11 }
 0x89b   :  { %v975_v15 = vadd.f32 %v970_v14, %v879_v45 }
 0x89d   :  { %v977_v16 = vsel %vm128_vm5, %v975_v15, 0.0 }
 0x89e   :  { %978 = vadd.xlane.f32.xlu2 %v977_v16 }
 0x8a0   :  { %v972_v17 = vpop.f32.mrf.mxu2 }
 0x8a1   :  { %v973_v20 = vadd.f32 %v972_v17, %v943_v11 }
 0x8a3   :  { %v976_v21 = vadd.f32 %v973_v20, %v880_v47 }
 0x8a5   :  { %v980_v25 = vsel %vm128_vm5, %v976_v21, 0.0 }
 0x8a6   :  { %981 = vadd.xlane.f32.xlu1 %v980_v25 }
 0x911   :  { %v979_v23 = vpop.xlane.xlu2 %978 }
 0x912   :  { %v983_v27 = vmul.f32 %v979_v23, %v2944_v41 }
 0x914   :  { %v985_v28 = vsub.f32 %v975_v15, %v983_v27 }
 0x916   :  { %v987_v29 = vmul.f32 %v985_v28, %v985_v28 }
 0x918   :  { %v989_v30 = vsel %vm128_vm5, %v987_v29, 0.0 }
 0x919   :  { %v982_v31 = vpop.xlane.xlu1 %981  ;;  %990 = vadd.xlane.f32.xlu2 %v989_v30 }
 0x91a   :  { %v984_v32 = vmul.f32 %v982_v31, %v2944_v41 }
 0x91c   :  { %v986_v33 = vsub.f32 %v976_v21, %v984_v32 }
 0x91e   :  { %v988_v34 = vmul.f32 %v986_v33, %v986_v33 }
 0x920   :  { %v992_v35 = vsel %vm128_vm5, %v988_v34, 0.0 }
 0x921   :  { %993 = vadd.xlane.f32.xlu2 %v992_v35 }
 0x98c   :  { %v991_v42 = vpop.xlane.xlu2 %990 }
 0x98d   :  { %v995_v43 = vmul.f32 %v991_v42, %v2944_v41 }
 0x98f   :  { %v997_v44 = vadd.f32 1e-12, %v995_v43 }
 0x991   :  { %2679 = vrsqrt.f32 %v997_v44  ;;  %vm1005_vm11 = vweird.f32 %v997_v44 }
 0x994   :  { %v994_v45 = vpop.xlane.xlu2 %993 }
 0x995   :  { %v996_v46 = vmul.f32 %v994_v45, %v2944_v41 }
 0x997   :  { %v2680_v47 = vpop.eup %2679  ;;  %v998_v48 = vadd.f32 1e-12, %v996_v46 }
 0x998   :  { %v1000_v49 = vmul.f32 %v2680_v47, %v997_v44  ;;  %vm1006_vm10 = vweird.f32 %v2680_v47 }
 0x999   :  { %2681 = vrsqrt.f32 %v998_v48  ;;  %vm1007_vm12 = vmor %vm1005_vm11, %vm1006_vm10  ;;  %vm1015_vm2 = vweird.f32 %v998_v48 }
 0x99a   :  { %v1001_v50 = vmul.f32 %v2680_v47, %v1000_v49 }
 0x99c   :  { %v1002_v52 = vmul.f32 0.5, %v1001_v50 }
 0x99e   :  { %v1003_v53 = vsub.f32 1.5, %v1002_v52 }
 0x99f   :  { %v2682_v54 = vpop.eup %2681 }
 0x9a0   :  { %v1004_v55 = vmul.f32 %v2680_v47, %v1003_v53  ;;  %v1010_v56 = vmul.f32 %v2682_v54, %v998_v48  ;;  %vm1016_vm1 = vweird.f32 %v2682_v54 }
 0x9a1   :  { %vm1017_vm3 = vmor %vm1015_vm2, %vm1016_vm1 }
 0x9a2   :  { %v1011_v58 = vmul.f32 %v2682_v54, %v1010_v56  ;;  %v1008_v59 = vsel %vm1007_vm12, %v2680_v47, %v1004_v55 }
 0x9a3   :  { %v1019_v60 = vmul.f32 %v1008_v59, %v985_v28 }
 0x9a4   :  { %v1012_v61 = vmul.f32 0.5, %v1011_v58 }
 0x9a5   :  { %v1022_v22 = vmul.f32 %v1021_v26, %v1019_v60 }
 0x9a6   :  { %v1013_v63 = vsub.f32 1.5, %v1012_v61 }
 0x9a7   :  { %v3203_v0 = vadd.f32 %v1026_v62, %v1022_v22 }
 0x9a8   :  { %v1014_v57 = vmul.f32 %v2682_v54, %v1013_v63 }
 0x9a9   :  { %2527 = vmatmul.msk.f32.vlgmr.msra.gmra.mxu3 %vm128_vm5, %v3203_v0 }
 0x9aa   :  { %v1018_v1 = vsel %vm1017_vm3, %v2682_v54, %v1014_v57 }
 0x9ab   :  { %v1020_v2 = vmul.f32 %v1018_v1, %v986_v33 }
 0x9ad   :  { %v1023_v3 = vmul.f32 %v1021_v26, %v1020_v2 }
 0x9af   :  { %v3207_v4 = vadd.f32 %v1026_v62, %v1023_v3 }
 0x9b1   :  { %2528 = vmatmul.msk.f32.gmra.mxu3 %vm128_vm5, %v3207_v4 }
 0xa2c   :  { %v1059_v13 = vpop.f32.mrf.mxu3 }
 0xa2d   :  { %v3212_v6 = vadd.f32 %v1059_v13, %v1035_v5 }
 0xa2f   :  { %1120 = vrot.lane.b32.xlu0 %v3212_v6, %s2823_s4  ;;  %1122 = vrot.lane.b32.xlu2 %v3212_v6, %s2819_s17 }
 0xa34   :  { %v1062_v7 = vpop.f32.mrf.mxu3 }
 0xa35   :  { %v3218_v8 = vadd.f32 %v1062_v7, %v1035_v5 }
 0xa37   :  { %1066 = vrot.lane.b32.xlu0 %v3212_v6, %s2818_s3  ;;  %1092 = vrot.lane.b32.xlu2 %v3212_v6, %s2821_s0 }
 0xa38   :  { %1205 = vrot.lane.b32.xlu1 %v3218_v8, %s2820_s20 }
 0xa3f   :  { %1094 = vrot.lane.b32.xlu0 %v3212_v6, %s2820_s20  ;;  %1203 = vrot.lane.b32.xlu2 %v3218_v8, %s2821_s0 }
 0xa40   :  { %1261 = vrot.lane.b32.xlu1 %v3218_v8, %s2822_s21 }
 0xa47   :  { %1150 = vrot.lane.b32.xlu2 %v3212_v6, %s2822_s21  ;;  %1233 = vrot.lane.b32.xlu0 %v3218_v8, %s2819_s17 }
 0xa4f   :  { %1259 = vrot.lane.b32.xlu2 %v3218_v8, %s2824_s22  ;;  %1231 = vrot.lane.b32.xlu0 %v3218_v8, %s2823_s4 }
 0xa57   :  { %1148 = vrot.lane.b32.xlu0 %v3212_v6, %s2824_s22 }
 0xa5f   :  { %1177 = vrot.lane.b32.xlu0 %v3218_v8, %s2818_s3 }
 0xa89   :  { %v1123_v19 = vpop.permute.xlu2 %1122 }
 0xa8a   :  { %2533 = vmatpush.xpose.msk.msrb.mxu3 %vm226_vm13, %v1123_v19 }
 0xa91   :  { %v1093_v18 = vpop.permute.xlu2 %1092 }
 0xa99   :  { %v1204_v9 = vpop.permute.xlu2 %1203 }
 0xaa1   :  { %v1121_v10 = vpop.permute.xlu0 %1120  ;;  %v1151_v11 = vpop.permute.xlu2 %1150 }
 0xaa2   :  { %2534 = vmatmul.msk.f32.vlgmr.msrb.gmra.mxu3 %vm226_vm13, %v1121_v10 }
 0xaa9   :  { %v1067_v24 = vpop.permute.xlu0 %1066  ;;  %v1260_v21 = vpop.permute.xlu2 %1259 }
 0xaaa   :  { %v1206_v12 = vpop.permute.xlu1 %1205  ;;  %2529 = vmatpush.xpose.msk.msrb.mxu1 %vm226_vm13, %v1067_v24 }
 0xaab   :  { %2539 = vmatpush.xpose.msk.msrb.mxu2 %vm226_vm13, %v1206_v12 }
 0xaad   :  { %2530 = vmatmul.msk.f32.vlgmr.msrb.gmra.mxu1 %vm226_vm13, %v3212_v6 }
 0xaae   :  { %2535 = vmatpush.xpose.msk.msra.mxu1 %vm226_vm13, %v1151_v11  ;;  %2540 = vmatmul.msk.f32.vlgmr.msrb.gmra.mxu2 %vm226_vm13, %v1204_v9 }
 0xab1   :  { %v1095_v14 = vpop.permute.xlu0 %1094 }
 0xab2   :  { %v1262_v15 = vpop.permute.xlu1 %1261  ;;  %2531 = vmatpush.xpose.msk.msrb.mxu0 %vm226_vm13, %v1095_v14 }
 0xab3   :  { %2543 = vmatpush.xpose.msk.msrb.mxu1 %vm226_vm13, %v1262_v15 }
 0xab5   :  { %2532 = vmatmul.msk.f32.vlgmr.msrb.gmra.mxu0 %vm226_vm13, %v1093_v18 }
 0xab9   :  { %v1234_v16 = vpop.permute.xlu0 %1233 }
 0xaba   :  { %2541 = vmatpush.xpose.msk.msra.mxu3 %vm226_vm13, %v1234_v16 }
 0xac1   :  { %v1232_v17 = vpop.permute.xlu0 %1231 }
 0xac2   :  { %2542 = vmatmul.msk.f32.vlgmr.msra.gmra.mxu3 %vm226_vm13, %v1232_v17 }
 0xac9   :  { %v1149_v20 = vpop.permute.xlu0 %1148 }
 0xaca   :  { %2536 = vmatmul.msk.f32.vlgmr.msra.gmra.mxu1 %vm226_vm13, %v1149_v20 }
 0xad1   :  { %v1178_v25 = vpop.permute.xlu0 %1177 }
 0xad2   :  { %2537 = vmatpush.xpose.msk.msra.mxu0 %vm226_vm13, %v1178_v25  ;;  %2544 = vmatmul.msk.f32.vlgmr.msrb.gmra.mxu1 %vm226_vm13, %v1260_v21 }
 0xad5   :  { %2538 = vmatmul.msk.f32.vlgmr.msra.gmra.mxu0 %vm226_vm13, %v3218_v8 }
 0xb25   :  { %v1145_v26 = vpop.f32.mrf.mxu3 }
 0xb26   :  { %v1289_v23 = vmul.f32 0.35355338, %v1145_v26 }
 0xb28   :  { %v1297_v27 = vadd.f32 %v1289_v23, %v3028_v40 }
 0xb2a   :  { %v1309_v28 = vsel %vm226_vm13, %v1297_v27, -inf  ;;  %v1089_v31 = vpop.f32.mrf.mxu1 }
 0xb2b   :  { %1310 = vmax.xlane.f32.xlu2 %v1309_v28  ;;  %v1287_v33 = vmul.f32 0.35355338, %v1089_v31 }
 0xb2d   :  { %v3267_v35 = vadd.f32 %v1287_v33, %v3028_v40 }
 0xb2f   :  { %v1303_v38 = vsel %vm226_vm13, %v3267_v35, -inf }
 0xb31   :  { %v1228_v36 = vpop.f32.mrf.mxu2 }
 0xb32   :  { %v1117_v29 = vpop.f32.mrf.mxu0  ;;  %v1292_v37 = vmul.f32 0.35355338, %v1228_v36 }
 0xb33   :  { %v1288_v30 = vmul.f32 0.35355338, %v1117_v29 }
 0xb34   :  { %v1300_v39 = vadd.f32 %v1292_v37, %v3034_v51 }
 0xb35   :  { %v1296_v32 = vadd.f32 %v1288_v30, %v3028_v40 }
 0xb36   :  { %v1318_v45 = vsel %vm226_vm13, %v1300_v39, -inf }
 0xb37   :  { %v1306_v34 = vsel %vm226_vm13, %v1296_v32, -inf }
 0xb38   :  { %1307 = vmax.xlane.f32.xlu1 %v1306_v34 }
 0xb40   :  { %1304 = vmax.xlane.f32.xlu1 %v1303_v38 }
 0xb45   :  { %v1256_v42 = vpop.f32.mrf.mxu3 }
 0xb46   :  { %v1293_v43 = vmul.f32 0.35355338, %v1256_v42 }
 0xb47   :  { %v1173_v44 = vpop.f32.mrf.mxu1 }
 0xb48   :  { %v1290_v46 = vmul.f32 0.35355338, %v1173_v44  ;;  %1319 = vmax.xlane.f32.xlu1 %v1318_v45  ;;  %v1301_v47 = vadd.f32 %v1293_v43, %v3034_v51 }
 0xb4a   :  { %v1321_v48 = vsel %vm226_vm13, %v1301_v47, -inf  ;;  %v1298_v49 = vadd.f32 %v1290_v46, %v3028_v40 }
 0xb4b   :  { %1322 = vmax.xlane.f32.xlu2 %v1321_v48 }
 0xb4c   :  { %v1312_v50 = vsel %vm226_vm13, %v1298_v49, -inf }
 0xb4d   :  { %1313 = vmax.xlane.f32.xlu0 %v1312_v50 }
 0xb4f   :  { %v1284_v54 = vpop.f32.mrf.mxu1 }
 0xb50   :  { %v1294_v56 = vmul.f32 0.35355338, %v1284_v54 }
 0xb52   :  { %v1200_v52 = vpop.f32.mrf.mxu0  ;;  %v1302_v59 = vadd.f32 %v1294_v56, %v3034_v51 }
 0xb53   :  { %v1291_v53 = vmul.f32 0.35355338, %v1200_v52 }
 0xb54   :  { %v1324_v60 = vsel %vm226_vm13, %v1302_v59, -inf }
 0xb55   :  { %v3278_v55 = vadd.f32 %v1291_v53, %v3034_v51 }
 0xb57   :  { %v1315_v58 = vsel %vm226_vm13, %v3278_v55, -inf }
 0xb58   :  { %1316 = vmax.xlane.f32.xlu0 %v1315_v58 }
 0xb60   :  { %1325 = vmax.xlane.f32.xlu0 %v1324_v60 }
 0xb63   :  { %1417 = vrot.lane.b32.xlu2 %v3212_v6, %s2828_s27 }
 0xb74   :  { %1443 = vrot.lane.b32.xlu0 %v3212_v6, %s2827_s26 }
 0xb9e   :  { %v1311_v61 = vpop.xlane.xlu2 %1310 }
 0xb9f   :  { %v1329_v62 = vsub.f32 %v1297_v27, %v1311_v61 }
 0xba1   :  { %v1339_v22 = vmul.f32 1.442695, %v1329_v62 }
 0xba3   :  { %2683 = vpow2.f32 %v1339_v22 }
 0xba9   :  { %v3288_v63 = vpop.eup %2683 }
 0xbaa   :  { %v1357_v57 = vsel %vm226_vm13, %v3288_v63, 0.0 }
 0xbab   :  { %v1308_v1 = vpop.xlane.xlu1 %1307  ;;  %1358 = vadd.xlane.f32.xlu1 %v1357_v57 }
 0xbac   :  { %v1328_v2 = vsub.f32 %v1296_v32, %v1308_v1 }
 0xbae   :  { %v1337_v3 = vmul.f32 1.442695, %v1328_v2 }
 0xbb0   :  { %2685 = vpow2.f32 %v1337_v3 }
 0xbb3   :  { %v1305_v5 = vpop.xlane.xlu1 %1304 }
 0xbb4   :  { %v1327_v34 = vsub.f32 %v3267_v35, %v1305_v5 }
 0xbb6   :  { %v2686_v13 = vpop.eup %2685  ;;  %v1335_v37 = vmul.f32 1.442695, %v1327_v34 }
 0xbb7   :  { %v1354_v7 = vsel %vm226_vm13, %v2686_v13, 0.0 }
 0xbb8   :  { %1355 = vadd.xlane.f32.xlu2 %v1354_v7 }
 0xbbb   :  { %v1320_v19 = vpop.xlane.xlu1 %1319 }
 0xbbc   :  { %v1332_v18 = vsub.f32 %v1300_v39, %v1320_v19 }
 0xbbe   :  { %v1345_v9 = vmul.f32 1.442695, %v1332_v18  ;;  %v1323_v10 = vpop.xlane.xlu2 %1322 }
 0xbbf   :  { %v1333_v23 = vsub.f32 %v1301_v47, %v1323_v10 }
 0xbc0   :  { %2687 = vpow2.f32 %v1345_v9  ;;  %v1314_v24 = vpop.xlane.xlu0 %1313 }
 0xbc1   :  { %v1330_v11 = vsub.f32 %v1298_v49, %v1314_v24  ;;  %v1347_v28 = vmul.f32 1.442695, %v1333_v23 }
 0xbc3   :  { %v1341_v12 = vmul.f32 1.442695, %v1330_v11 }
 0xbc5   :  { %2689 = vpow2.f32 %v1341_v12 }
 0xbc6   :  { %v2688_v14 = vpop.eup %2687  ;;  %v1418_v15 = vpop.permute.xlu2 %1417 }
 0xbc7   :  { %1438 = vmatpush.msra.mxu2 %v1418_v15  ;;  %v1366_v16 = vsel %vm226_vm13, %v2688_v14, 0.0  ;;  %v2556_v15 = vld [vmem:[%s3547_s6 + $0x38] sm:$0xff] }
 0xbc8   :  { %1367 = vadd.xlane.f32.xlu0 %v1366_v16  ;;  %v2555_v16 = vld [vmem:[%s3547_s6 + $0x30] sm:$0xff] }
 0xbcb   :  { %v3294_v17 = vpop.eup %2689  ;;  %v1317_v20 = vpop.xlane.xlu0 %1316 }
 0xbcc   :  { %v1360_v21 = vsel %vm226_vm13, %v3294_v17, 0.0  ;;  %v1331_v36 = vsub.f32 %v3278_v55, %v1317_v20  ;;  %v2553_v20 = vld [vmem:[%s3547_s6 + $0x20] sm:$0xff] }
 0xbcd   :  { %1361 = vadd.xlane.f32.xlu2 %v1360_v21 }
 0xbce   :  { %v1343_v38 = vmul.f32 1.442695, %v1331_v36 }
 0xbd3   :  { %v1326_v25 = vpop.xlane.xlu0 %1325 }
 0xbd4   :  { %v1334_v26 = vsub.f32 %v1302_v59, %v1326_v25 }
 0xbd6   :  { %v1349_v27 = vmul.f32 1.442695, %v1334_v26 }
 0xbd8   :  { %2691 = vpow2.f32 %v1349_v27 }
 0xbd9   :  { %2693 = vpow2.f32 %v1347_v28 }
 0xbda   :  { %2695 = vpow2.f32 %v1335_v37 }
 0xbdb   :  { %2697 = vpow2.f32 %v1343_v38  ;;  %v2733_v38 = vld [vmem:[#allocation2 + $0x10] sm:$0xff] }
 0xbdc   :  { %1536 = vrot.lane.b32.xlu0 %v3218_v8, %s2828_s27 }
 0xbde   :  { %v2692_v29 = vpop.eup %2691 }
 0xbdf   :  { %v1372_v30 = vsel %vm226_vm13, %v2692_v29, 0.0  ;;  %v2694_v31 = vpop.eup %2693 }
 0xbe0   :  { %1373 = vadd.xlane.f32.xlu1 %v1372_v30  ;;  %v1369_v33 = vsel %vm226_vm13, %v2694_v31, 0.0  ;;  %v2696_v39 = vpop.eup %2695 }
 0xbe1   :  { %v2698_v42 = vpop.eup %2697  ;;  %v1351_v43 = vsel %vm226_vm13, %v2696_v39, 0.0 }
 0xbe2   :  { %v1363_v44 = vsel %vm226_vm13, %v2698_v42, 0.0 }
 0xbe4   :  { %1588 = vrot.lane.b32.xlu0 %v3218_v8, %s2825_s1 }
 0xbe5   :  { %1562 = vrot.lane.b32.xlu2 %v3218_v8, %s2827_s26 }
 0xbe6   :  { %v1444_v32 = vpop.permute.xlu0 %1443 }
 0xbe7   :  { %1464 = vmatpush.msrb.mxu3 %v1444_v32 }
 0xbe8   :  { %1370 = vadd.xlane.f32.xlu1 %v1369_v33 }
 0xc01   :  { %1469 = vrot.lane.b32.xlu1 %v3212_v6, %s2825_s1 }
 0xc09   :  { %1391 = vrot.lane.b32.xlu1 %v3212_v6, %s2826_s25 }
 0xc0e   :  { %1352 = vadd.xlane.f32.xlu2 %v1351_v43  ;;  %1364 = vadd.xlane.f32.xlu0 %v1363_v44 }
 0xc11   :  { %1510 = vrot.lane.b32.xlu1 %v3218_v8, %s2826_s25 }
 0xc1e   :  { %v1359_v35 = vpop.xlane.xlu1 %1358 }
 0xc1f   :  { %2699 = vrcp.f32 %v1359_v35 }
 0xc25   :  { %v2700_v45 = vpop.eup %2699 }
 0xc26   :  { %v1385_v46 = vmul.f32 %v2700_v45, %v3288_v63 }
 0xc28   :  { %2547 = vmatmul.msk.f32.vlgmr.msrb.gmra.mxu3 %vm226_vm13, %v1385_v46 }
 0xc2b   :  { %v1356_v47 = vpop.xlane.xlu2 %1355 }
 0xc2c   :  { %2701 = vrcp.f32 %v1356_v47 }
 0xc32   :  { %v2702_v6 = vpop.eup %2701 }
 0xc33   :  { %v1384_v48 = vmul.f32 %v2702_v6, %v2686_v13 }
 0xc35   :  { %2546 = vmatmul.msk.f32.vlgmr.msra.gmra.mxu2 %vm226_vm13, %v1384_v48 }
 0xc3b   :  { %v1368_v50 = vpop.xlane.xlu0 %1367 }
 0xc3c   :  { %2703 = vrcp.f32 %v1368_v50 }
 0xc40   :  { %v1362_v49 = vpop.xlane.xlu2 %1361 }
 0xc42   :  { %v2704_v53 = vpop.eup %2703 }
 0xc43   :  { %v1388_v8 = vmul.f32 %v2704_v53, %v2688_v14 }
 0xc48   :  { %v1563_v52 = vpop.permute.xlu2 %1562 }
 0xc49   :  { %1583 = vmatpush.msra.mxu3 %v1563_v52 }
 0xc4e   :  { %v1537_v54 = vpop.permute.xlu0 %1536 }
 0xc4f   :  { %1557 = vmatpush.msrb.mxu2 %v1537_v54 }
 0xc50   :  { %2550 = vmatmul.msk.f32.vlgmr.msrb.gmra.mxu2 %vm226_vm13, %v1388_v8 }
 0xc53   :  { %v1374_v55 = vpop.xlane.xlu1 %1373 }
 0xc56   :  { %v1589_v22 = vpop.permute.xlu0 %1588 }
 0xc5b   :  { %v1371_v56 = vpop.xlane.xlu1 %1370 }
 0xc5c   :  { %2705 = vrcp.f32 %v1371_v56  ;;  %v2562_v56 = vld [vmem:[%s3548_s7 + $0x38] sm:$0xff] }
 0xc5d   :  { %2707 = vrcp.f32 %v1362_v49  ;;  %1745 = vmatpush.msra.mxu2 %v2562_v56 }
 0xc5e   :  { %2709 = vrcp.f32 %v1374_v55 }
 0xc62   :  { %v2706_v58 = vpop.eup %2705 }
 0xc63   :  { %v1389_v59 = vmul.f32 %v2706_v58, %v2694_v31  ;;  %v2708_v60 = vpop.eup %2707  ;;  %v2561_v58 = vld [vmem:[%s3548_s7 + $0x30] sm:$0xff] }
 0xc64   :  { %v1386_v61 = vmul.f32 %v2708_v60, %v3294_v17  ;;  %v2710_v63 = vpop.eup %2709  ;;  %v2554_v17 = vld [vmem:[%s3547_s6 + $0x28] sm:$0xff]  ;;  %1746 = vmatpush.msra.mxu2 %v2561_v58 }
 0xc65   :  { %2551 = vmatmul.msk.f32.vlgmr.msra.gmra.mxu3 %vm226_vm13, %v1389_v59  ;;  %v1390_v57 = vmul.f32 %v2710_v63, %v2692_v29  ;;  %v2560_v60 = vld [vmem:[%s3548_s7 + $0x28] sm:$0xff] }
 0xc66   :  { %1747 = vmatpush.msra.mxu2 %v2560_v60 }
 0xc73   :  { %v1470_v62 = vpop.permute.xlu1 %1469 }
 0xc74   :  { %1490 = vmatpush.msra.mxu1 %v1470_v62  ;;  %v2559_v62 = vld [vmem:[%s3548_s7 + $0x20] sm:$0xff] }
 0xc75   :  { %2548 = vmatmul.msk.f32.vlgmr.msra.gmra.mxu1 %vm226_vm13, %v1386_v61  ;;  %1748 = vmatpush.msra.mxu2 %v2559_v62 }
 0xc76   :  { %1609 = vmatpush.msrb.mxu1 %v1589_v22 }
 0xc7b   :  { %v1392_v1 = vpop.permute.xlu1 %1391 }
 0xc7c   :  { %1412 = vmatpush.msrb.mxu0 %v1392_v1 }
 0xc7d   :  { %2552 = vmatmul.msk.f32.vlgmr.msrb.gmra.mxu1 %vm226_vm13, %v1390_v57 }
 0xc81   :  { %v1353_v2 = vpop.xlane.xlu2 %1352  ;;  %v1365_v5 = vpop.xlane.xlu0 %1364 }
 0xc82   :  { %2711 = vrcp.f32 %v1353_v2 }
 0xc83   :  { %v1511_v3 = vpop.permute.xlu1 %1510  ;;  %2713 = vrcp.f32 %v1365_v5 }
 0xc84   :  { %1531 = vmatpush.msra.mxu0 %v1511_v3  ;;  %v1726_v3 = vperm.slane %v2733_v38, 7 }
 0xc88   :  { %v2712_v13 = vpop.eup %2711 }
 0xc89   :  { %v1383_v7 = vmul.f32 %v2712_v13, %v2696_v39  ;;  %v2714_v19 = vpop.eup %2713  ;;  %v1634_v39 = vperm.slane %v2733_v38, 6 }
 0xc8a   :  { %v1387_v18 = vmul.f32 %v2714_v19, %v2698_v42 }
 0xc8b   :  { %2545 = vmatmul.msk.f32.vlgmr.msrb.gmra.mxu0 %vm226_vm13, %v1383_v7 }
 0xc8c   :  { %1653 = vmatpush.msrb.mxu0 %v2556_v15 }
 0xc8e   :  { %1654 = vmatpush.msrb.mxu0 %v2555_v16 }
 0xc90   :  { %1655 = vmatpush.msrb.mxu0 %v2554_v17 }
 0xc92   :  { %1656 = vmatpush.msrb.mxu0 %v2553_v20 }
 0xc93   :  { %2549 = vmatmul.msk.f32.vlgmr.msra.gmra.mxu0 %vm226_vm13, %v1387_v18 }
 0xcab   :  { %v1466_v10 = vpop.f32.mrf.mxu3 }
 0xcb8   :  { %v1440_v9 = vpop.f32.mrf.mxu2 }
 0xcb9   :  { %1496 = vrot.lane.b32.xlu1 %v1440_v9, %s2814_s19 }
 0xcc1   :  { %1500 = vrot.lane.b32.xlu1 %v1466_v10, %s2829_s28 }
 0xcd3   :  { %v1559_v24 = vpop.f32.mrf.mxu2 }
 0xcd4   :  { %1615 = vrot.lane.b32.xlu2 %v1559_v24, %s2814_s19 }
 0xce8   :  { %v1585_v11 = vpop.f32.mrf.mxu3 }
 0xce9   :  { %1619 = vrot.lane.b32.xlu0 %v1585_v11, %s2829_s28 }
 0xcf2   :  { %v1492_v12 = vpop.f32.mrf.mxu1 }
 0xcf3   :  { %1504 = vrot.lane.b32.xlu1 %v1492_v12, %s2830_s29 }
 0xcfa   :  { %v1611_v14 = vpop.f32.mrf.mxu1 }
 0xcfb   :  { %1623 = vrot.lane.b32.xlu1 %v1611_v14, %s2830_s29 }
 0xd08   :  { %v1414_v26 = vpop.f32.mrf.mxu0 }
 0xd10   :  { %v1533_v32 = vpop.f32.mrf.mxu0 }
 0xd2b   :  { %v1497_v21 = vpop.permute.xlu1 %1496 }
 0xd2c   :  { %v1507_v23 = vsel %vm226_vm13, %v1414_v26, %v1497_v21 }
 0xd2e   :  { %v1616_v30 = vpop.permute.xlu2 %1615 }
 0xd2f   :  { %v1626_v33 = vsel %vm226_vm13, %v1533_v32, %v1616_v30  ;;  %v2571_v30 = vld [vmem:[%s3549_s8 + $0x70] sm:$0xff]  ;;  %v2569_v32 = vld [vmem:[%s3549_s8 + $0x60] sm:$0xff] }
 0xd33   :  { %v1501_v25 = vpop.permute.xlu1 %1500 }
 0xd34   :  { %v1508_v27 = vsel %vm667_vm14, %v1507_v23, %v1501_v25 }
 0xd5b   :  { %v1620_v31 = vpop.permute.xlu0 %1619 }
 0xd5c   :  { %v1627_v34 = vsel %vm667_vm14, %v1626_v33, %v1620_v31  ;;  %v2570_v31 = vld [vmem:[%s3549_s8 + $0x68] sm:$0xff]  ;;  %v2568_v33 = vld [vmem:[%s3549_s8 + $0x58] sm:$0xff] }
 0xd65   :  { %v1505_v28 = vpop.permute.xlu1 %1504 }
 0xd66   :  { %v1509_v29 = vsel %vm669_vm15, %v1508_v27, %v1505_v28 }
 0xd67   :  { %2557 = vmatmul.msk.f32.vlgmr.msrb.gmra.mxu0 %vm128_vm5, %v1509_v29  ;;  %v2572_v29 = vld [vmem:[%s3549_s8 + $0x78] sm:$0xff] }
 0xd68   :  { %1801 = vmatpush.msrb.mxu3 %v2572_v29 }
 0xd6a   :  { %1802 = vmatpush.msrb.mxu3 %v2571_v30 }
 0xd6c   :  { %1803 = vmatpush.msrb.mxu3 %v2570_v31 }
 0xd6d   :  { %v1624_v36 = vpop.permute.xlu1 %1623 }
 0xd6e   :  { %v1628_v37 = vsel %vm669_vm15, %v1627_v34, %v1624_v36  ;;  %1804 = vmatpush.msrb.mxu3 %v2569_v32  ;;  %v2567_v34 = vld [vmem:[%s3549_s8 + $0x50] sm:$0xff]  ;;  %v2566_v36 = vld [vmem:[%s3549_s8 + $0x48] sm:$0xff] }
 0xd6f   :  { %2558 = vmatmul.msk.f32.gmra.mxu0 %vm128_vm5, %v1628_v37  ;;  %v2565_v37 = vld [vmem:[%s3549_s8 + $0x40] sm:$0xff]  ;;  %s2473_s8 = sshll.u32 %s3551_s10, 4  ;;  %s2474_s8 = int_to_ptr.hbm [resolvable:$true] %s2473_s8 }
 0xd70   :  { %1805 = vmatpush.msrb.mxu3 %v2568_v33 }
 0xd72   :  { %1806 = vmatpush.msrb.mxu3 %v2567_v34 }
 0xd74   :  { %1807 = vmatpush.msrb.mxu3 %v2566_v36 }
 0xd76   :  { %1808 = vmatpush.msrb.mxu3 %v2565_v37 }
 0xde4   :  { %v1658_v42 = vpop.f32.mrf.mxu0 }
 0xde5   :  { %v1659_v43 = vadd.f32 %v1658_v42, %v1634_v39 }
 0xde7   :  { %v1664_v44 = vadd.f32 %v1659_v43, %v3203_v0 }
 0xde9   :  { %v1666_v35 = vsel %vm128_vm5, %v1664_v44, 0.0 }
 0xdea   :  { %1667 = vadd.xlane.f32.xlu1 %v1666_v35 }
 0xdec   :  { %v1661_v45 = vpop.f32.mrf.mxu0 }
 0xded   :  { %v1662_v46 = vadd.f32 %v1661_v45, %v1634_v39 }
 0xdef   :  { %v1665_v47 = vadd.f32 %v1662_v46, %v3207_v4 }
 0xdf1   :  { %v1669_v6 = vsel %vm128_vm5, %v1665_v47, 0.0 }
 0xdf2   :  { %1670 = vadd.xlane.f32.xlu2 %v1669_v6 }
 0xe0a   :  { %1711 = vrot.lane.b32.xlu2 %v1634_v39, %s2818_s3 }
 0xe5d   :  { %v1668_v48 = vpop.xlane.xlu1 %1667 }
 0xe5e   :  { %v1672_v49 = vmul.f32 %v1668_v48, %v2944_v41 }
 0xe60   :  { %v1674_v50 = vsub.f32 %v1664_v44, %v1672_v49 }
 0xe62   :  { %v1676_v52 = vmul.f32 %v1674_v50, %v1674_v50 }
 0xe64   :  { %v1678_v53 = vsel %vm128_vm5, %v1676_v52, 0.0 }
 0xe65   :  { %1679 = vadd.xlane.f32.xlu0 %v1678_v53  ;;  %v1671_v0 = vpop.xlane.xlu2 %1670 }
 0xe66   :  { %v1673_v8 = vmul.f32 %v1671_v0, %v2944_v41 }
 0xe68   :  { %v1675_v54 = vsub.f32 %v1665_v47, %v1673_v8 }
 0xe6a   :  { %v1677_v55 = vmul.f32 %v1675_v54, %v1675_v54 }
 0xe6c   :  { %v1681_v4 = vsel %vm128_vm5, %v1677_v55, 0.0 }
 0xe6d   :  { %1682 = vadd.xlane.f32.xlu1 %v1681_v4  ;;  %v1712_v17 = vpop.permute.xlu2 %1711 }
 0xe79   :  { %1784 = vrot.lane.b32.xlu0 %v1726_v3, %s2826_s25 }
 0xe86   :  { %1716 = vrot.lane.b32.xlu1 %v1634_v39, %s2826_s25 }
 0xed8   :  { %v1680_v59 = vpop.xlane.xlu0 %1679 }
 0xed9   :  { %v1684_v61 = vmul.f32 %v1680_v59, %v2944_v41 }
 0xedb   :  { %v1686_v22 = vadd.f32 1e-12, %v1684_v61 }
 0xedd   :  { %2715 = vrsqrt.f32 %v1686_v22  ;;  %vm1694_vm7 = vweird.f32 %v1686_v22 }
 0xee0   :  { %v1683_v63 = vpop.xlane.xlu1 %1682 }
 0xee1   :  { %v1685_v57 = vmul.f32 %v1683_v63, %v2944_v41 }
 0xee3   :  { %v2716_v1 = vpop.eup %2715  ;;  %v1687_v2 = vadd.f32 1e-12, %v1685_v57 }
 0xee4   :  { %v1689_v5 = vmul.f32 %v2716_v1, %v1686_v22  ;;  %vm1695_vm6 = vweird.f32 %v2716_v1 }
 0xee5   :  { %2717 = vrsqrt.f32 %v1687_v2  ;;  %vm1696_vm8 = vmor %vm1694_vm7, %vm1695_vm6  ;;  %vm1704_vm11 = vweird.f32 %v1687_v2 }
 0xee6   :  { %v1690_v13 = vmul.f32 %v2716_v1, %v1689_v5 }
 0xee8   :  { %v1691_v7 = vmul.f32 0.5, %v1690_v13 }
 0xeea   :  { %v1692_v19 = vsub.f32 1.5, %v1691_v7 }
 0xeeb   :  { %v2718_v18 = vpop.eup %2717  ;;  %v1785_v59 = vpop.permute.xlu0 %1784 }
 0xeec   :  { %v1699_v9 = vmul.f32 %v2718_v18, %v1687_v2  ;;  %v1693_v10 = vmul.f32 %v2716_v1, %v1692_v19  ;;  %vm1705_vm10 = vweird.f32 %v2718_v18 }
 0xeed   :  { %vm1706_vm12 = vmor %vm1704_vm11, %vm1705_vm10  ;;  %vm2153_vm10 = vcmask 1041408   ;;  %vm2155_vm11 = vcmask 1042432  }
 0xeee   :  { %v1700_v24 = vmul.f32 %v2718_v18, %v1699_v9  ;;  %v1697_v12 = vsel %vm1696_vm8, %v2716_v1, %v1693_v10  ;;  %vm2151_vm8 = vcmask 1040384  }
 0xeef   :  { %v1708_v15 = vmul.f32 %v1697_v12, %v1674_v50 }
 0xef0   :  { %v1701_v11 = vmul.f32 0.5, %v1700_v24 }
 0xef1   :  { %v1714_v21 = vmul.f32 %v1712_v17, %v1708_v15  ;;  %v2578_v15 = vld [vmem:[%s3546_s5 + $0x58] sm:$0xff] }
 0xef2   :  { %v1702_v14 = vsub.f32 1.5, %v1701_v11  ;;  %1897 = vmatpush.msra.mxu1 %v2578_v15 }
 0xef4   :  { %v1703_v16 = vmul.f32 %v2718_v18, %v1702_v14 }
 0xef6   :  { %v1707_v20 = vsel %vm1706_vm12, %v2718_v18, %v1703_v16  ;;  %v2577_v16 = vld [vmem:[%s3546_s5 + $0x50] sm:$0xff]  ;;  %vm2158_vm12 = vcmask 1044480  }
 0xef7   :  { %v1709_v26 = vmul.f32 %v1707_v20, %v1675_v54  ;;  %1898 = vmatpush.msra.mxu1 %v2577_v16  ;;  %v2575_v20 = vld [vmem:[%s3546_s5 + $0x40] sm:$0xff] }
 0xef8   :  { %v1717_v25 = vpop.permute.xlu1 %1716 }
 0xef9   :  { %v1719_v23 = vadd.f32 %v1717_v25, %v1714_v21  ;;  %v1715_v27 = vmul.f32 %v1712_v17, %v1709_v26  ;;  %v2576_v17 = vld [vmem:[%s3546_s5 + $0x48] sm:$0xff] }
 0xefa   :  { %1899 = vmatpush.msra.mxu1 %v2576_v17 }
 0xefb   :  { %2563 = vmatmul.msk.f32.vlgmr.msra.gmra.mxu2 %vm128_vm5, %v1719_v23  ;;  %v1720_v28 = vadd.f32 %v1717_v25, %v1715_v27 }
 0xefc   :  { %1900 = vmatpush.msra.mxu1 %v2575_v20 }
 0xf03   :  { %2564 = vmatmul.msk.f32.gmra.mxu2 %vm128_vm5, %v1720_v28 }
 0xf7e   :  { %v1750_v38 = vpop.f32.mrf.mxu2 }
 0xf7f   :  { %v1751_v39 = vadd.f32 %v1750_v38, %v1726_v3 }
 0xf81   :  { %v1756_v42 = vmul.f32 %v1751_v39, %v1751_v39 }
 0xf83   :  { %v1758_v43 = vmul.f32 %v1756_v42, %v1751_v39 }
 0xf85   :  { %v1760_v44 = vmul.f32 0.044715, %v1758_v43 }
 0xf86   :  { %v1753_v35 = vpop.f32.mrf.mxu2 }
 0xf87   :  { %v1762_v45 = vadd.f32 %v1760_v44, %v1751_v39  ;;  %v1754_v46 = vadd.f32 %v1753_v35, %v1726_v3  ;;  %v3407_v3 = vld [vmem:[#allocation2 + $0x18] sm:$0x7] }
 0xf88   :  { %v1862_v5 = vperm.slane %v3407_v3, 0 }
 0xf89   :  { %v1764_v47 = vmul.f32 0.7978846, %v1762_v45  ;;  %v1757_v6 = vmul.f32 %v1754_v46, %v1754_v46 }
 0xf8b   :  { %2719 = vtanh.f32 %v1764_v47  ;;  %v1759_v48 = vmul.f32 %v1757_v6, %v1754_v46 }
 0xf8d   :  { %v1761_v49 = vmul.f32 0.044715, %v1759_v48 }
 0xf8f   :  { %v1763_v50 = vadd.f32 %v1761_v49, %v1754_v46 }
 0xf91   :  { %v2720_v52 = vpop.eup %2719  ;;  %v1765_v53 = vmul.f32 0.7978846, %v1763_v50  ;;  %v1878_v50 = vperm.slane %v3407_v3, 1 }
 0xf92   :  { %v1768_v0 = vadd.f32 1.0, %v2720_v52 }
 0xf93   :  { %2721 = vtanh.f32 %v1765_v53 }
 0xf94   :  { %v1770_v8 = vmul.f32 0.5, %v1768_v0 }
 0xf96   :  { %v1772_v54 = vmul.f32 %v1770_v8, %v1751_v39 }
 0xf98   :  { %2573 = vmatmul.msk.f32.vlgmr.msrb.gmra.mxu3 %vm945_vm9, %v1772_v54 }
 0xf99   :  { %v2722_v55 = vpop.eup %2721 }
 0xf9a   :  { %v1769_v4 = vadd.f32 1.0, %v2722_v55 }
 0xf9c   :  { %v1771_v56 = vmul.f32 0.5, %v1769_v4 }
 0xf9e   :  { %v1773_v58 = vmul.f32 %v1771_v56, %v1754_v46 }
 0xfa0   :  { %2574 = vmatmul.msk.f32.gmra.mxu3 %vm945_vm9, %v1773_v58 }
0x101b   :  { %v1810_v60 = vpop.f32.mrf.mxu3 }
0x101c   :  { %v1811_v61 = vadd.f32 %v1810_v60, %v1785_v59 }
0x101e   :  { %v1816_v62 = vadd.f32 %v1811_v61, %v1719_v23 }
0x1020   :  { %v1818_v22 = vsel %vm128_vm5, %v1816_v62, 0.0 }
0x1021   :  { %1819 = vadd.xlane.f32.xlu0 %v1818_v22 }
0x1023   :  { %v1813_v63 = vpop.f32.mrf.mxu3 }
0x1024   :  { %v1814_v57 = vadd.f32 %v1813_v63, %v1785_v59 }
0x1026   :  { %v1817_v1 = vadd.f32 %v1814_v57, %v1720_v28 }
0x1028   :  { %v1821_v2 = vsel %vm128_vm5, %v1817_v1, 0.0 }
0x1029   :  { %1822 = vadd.xlane.f32.xlu2 %v1821_v2 }
0x1035   :  { %1866 = vrot.lane.b32.xlu0 %v1862_v5, %s2818_s3 }
0x1094   :  { %v1820_v13 = vpop.xlane.xlu0 %1819 }
0x1095   :  { %v1824_v7 = vmul.f32 %v1820_v13, %v2944_v41 }
0x1097   :  { %v1826_v19 = vsub.f32 %v1816_v62, %v1824_v7 }
0x1099   :  { %v1828_v18 = vmul.f32 %v1826_v19, %v1826_v19 }
0x109b   :  { %v1830_v9 = vsel %vm128_vm5, %v1828_v18, 0.0 }
0x109c   :  { %v1823_v10 = vpop.xlane.xlu2 %1822  ;;  %1831 = vadd.xlane.f32.xlu1 %v1830_v9 }
0x109d   :  { %v1825_v24 = vmul.f32 %v1823_v10, %v2944_v41 }
0x109f   :  { %v1827_v11 = vsub.f32 %v1817_v1, %v1825_v24 }
0x10a1   :  { %v1829_v12 = vmul.f32 %v1827_v11, %v1827_v11 }
0x10a3   :  { %v1833_v14 = vsel %vm128_vm5, %v1829_v12, 0.0 }
0x10a4   :  { %1834 = vadd.xlane.f32.xlu2 %v1833_v14 }
0x10a7   :  { %v1867_v44 = vpop.permute.xlu0 %1866 }
0x110f   :  { %v1832_v21 = vpop.xlane.xlu1 %1831 }
0x1110   :  { %v1836_v25 = vmul.f32 %v1832_v21, %v2944_v41 }
0x1112   :  { %v1838_v26 = vadd.f32 1e-12, %v1836_v25 }
0x1114   :  { %2723 = vrsqrt.f32 %v1838_v26  ;;  %vm1846_vm1 = vweird.f32 %v1838_v26 }
0x1117   :  { %v1835_v23 = vpop.xlane.xlu2 %1834 }
0x1118   :  { %v1837_v27 = vmul.f32 %v1835_v23, %v2944_v41 }
0x111a   :  { %v2724_v28 = vpop.eup %2723  ;;  %v1839_v29 = vadd.f32 1e-12, %v1837_v27 }
0x111b   :  { %v1841_v30 = vmul.f32 %v2724_v28, %v1838_v26  ;;  %vm1847_vm9 = vweird.f32 %v2724_v28 }
0x111c   :  { %2725 = vrsqrt.f32 %v1839_v29  ;;  %vm1848_vm2 = vmor %vm1846_vm1, %vm1847_vm9  ;;  %vm1856_vm6 = vweird.f32 %v1839_v29  ;;  %vm2160_vm9 = vcmask 1045504  }
0x111d   :  { %v1842_v31 = vmul.f32 %v2724_v28, %v1841_v30 }
0x111f   :  { %v1843_v32 = vmul.f32 0.5, %v1842_v31 }
0x1121   :  { %v1844_v33 = vsub.f32 1.5, %v1843_v32 }
0x1122   :  { %v2726_v34 = vpop.eup %2725 }
0x1123   :  { %v1845_v36 = vmul.f32 %v2724_v28, %v1844_v33  ;;  %v1851_v37 = vmul.f32 %v2726_v34, %v1839_v29  ;;  %vm1857_vm3 = vweird.f32 %v2726_v34 }
0x1124   :  { %vm1858_vm7 = vmor %vm1856_vm6, %vm1857_vm3 }
0x1125   :  { %v1852_v38 = vmul.f32 %v2726_v34, %v1851_v37  ;;  %v1849_v39 = vsel %vm1848_vm2, %v2724_v28, %v1845_v36  ;;  %v60_v36 = vsel %vm59_vm0, %v3028_v40, %v3034_v51 }
0x1126   :  { %v1860_v42 = vmul.f32 %v1849_v39, %v1826_v19 }
0x1127   :  { %v1853_v43 = vmul.f32 0.5, %v1852_v38 }
0x1128   :  { %v1863_v35 = vmul.f32 %v1862_v5, %v1860_v42 }
0x1129   :  { %v1854_v41 = vsub.f32 1.5, %v1853_v43 }
0x112a   :  { %v1869_v45 = vadd.f32 %v1867_v44, %v1863_v35 }
0x112b   :  { %v1855_v46 = vmul.f32 %v2726_v34, %v1854_v41 }
0x112c   :  { %1871 = vst.msk [vmem:[#allocation5] sm:$0xff] %vm128_vm5, %v1869_v45  ;;  %2579 = vmatmul.msk.f32.vlgmr.msra.gmra.mxu1 %vm128_vm5, %v1869_v45 }
0x112d   :  { %v1859_v47 = vsel %vm1858_vm7, %v2726_v34, %v1855_v46 }
0x112e   :  { %v1861_v6 = vmul.f32 %v1859_v47, %v1827_v11 }
0x1130   :  { %v1864_v48 = vmul.f32 %v1862_v5, %v1861_v6 }
0x1132   :  { %v1870_v49 = vadd.f32 %v1867_v44, %v1864_v48 }
0x1134   :  { %1872 = vst.msk [vmem:[#allocation5 + $0x8] sm:$0xff] %vm128_vm5, %v1870_v49  ;;  %2580 = vmatmul.msk.f32.gmra.mxu1 %vm128_vm5, %v1870_v49 }
0x11a9   :  { %v1902_v52 = vpop.f32.mrf.mxu1 }
0x11aa   :  { %v1903_v53 = vadd.f32 %v1902_v52, %v1878_v50 }
0x11ac   :  { %1935 = vrot.lane.b32.xlu0 %v1903_v53, %s2821_s0  ;;  %1909 = vrot.lane.b32.xlu2 %v1903_v53, %s2818_s3 }
0x11ad   :  { %1937 = vrot.lane.b32.xlu1 %v1903_v53, %s2820_s20 }
0x11b1   :  { %v1905_v0 = vpop.f32.mrf.mxu1 }
0x11b2   :  { %v3440_v8 = vadd.f32 %v1905_v0, %v1878_v50 }
0x11b4   :  { %1963 = vrot.lane.b32.xlu0 %v1903_v53, %s2823_s4  ;;  %1993 = vrot.lane.b32.xlu2 %v1903_v53, %s2822_s21 }
0x11b5   :  { %1965 = vrot.lane.b32.xlu1 %v1903_v53, %s2819_s17 }
0x11bc   :  { %2020 = vrot.lane.b32.xlu0 %v3440_v8, %s2818_s3  ;;  %1991 = vrot.lane.b32.xlu2 %v1903_v53, %s2824_s22 }
0x11bd   :  { %2048 = vrot.lane.b32.xlu1 %v3440_v8, %s2820_s20 }
0x11c4   :  { %2076 = vrot.lane.b32.xlu0 %v3440_v8, %s2819_s17  ;;  %2104 = vrot.lane.b32.xlu2 %v3440_v8, %s2822_s21 }
0x11c5   :  { %2046 = vrot.lane.b32.xlu1 %v3440_v8, %s2821_s0 }
0x11cc   :  { %2102 = vrot.lane.b32.xlu0 %v3440_v8, %s2824_s22 }
0x11cd   :  { %2074 = vrot.lane.b32.xlu1 %v3440_v8, %s2823_s4 }
0x11d4   :  { %2203 = vrot.lane.b32.xlu0 %v1903_v53, %s2828_s27 }
0x11dc   :  { %2229 = vrot.lane.b32.xlu0 %v1903_v53, %s2827_s26 }
0x11e4   :  { %2255 = vrot.lane.b32.xlu0 %v1903_v53, %s2825_s1 }
0x11ec   :  { %2322 = vrot.lane.b32.xlu0 %v3440_v8, %s2828_s27  ;;  %s2459_s27 = sshll.u32 %s3550_s9, 4  ;;  %s2460_s27 = int_to_ptr.hbm [resolvable:$true] %s2459_s27 }
0x11f4   :  { %2348 = vrot.lane.b32.xlu0 %v3440_v8, %s2827_s26 }
0x11fc   :  { %2176 = vrot.lane.b32.xlu0 %v1903_v53, %s2826_s25 }
0x1206   :  { %v1910_v54 = vpop.permute.xlu2 %1909 }
0x1207   :  { %2581 = vmatpush.xpose.msk.msra.mxu0 %vm226_vm13, %v1910_v54 }
0x120a   :  { %2582 = vmatmul.msk.f32.vlgmr.msra.gmra.mxu0 %vm226_vm13, %v1903_v53 }
0x120e   :  { %v1994_v55 = vpop.permute.xlu2 %1993 }
0x120f   :  { %2587 = vmatpush.xpose.msk.msrb.mxu0 %vm226_vm13, %v1994_v55 }
0x1216   :  { %v1992_v4 = vpop.permute.xlu2 %1991 }
0x1217   :  { %2588 = vmatmul.msk.f32.vlgmr.msrb.gmra.mxu0 %vm226_vm13, %v1992_v4 }
0x121e   :  { %v1936_v56 = vpop.permute.xlu0 %1935  ;;  %v2105_v58 = vpop.permute.xlu2 %2104 }
0x121f   :  { %v1938_v59 = vpop.permute.xlu1 %1937  ;;  %2595 = vmatpush.xpose.msk.msra.mxu0 %vm226_vm13, %v2105_v58 }
0x1220   :  { %2583 = vmatpush.xpose.msk.msrb.mxu2 %vm226_vm13, %v1938_v59 }
0x1223   :  { %2584 = vmatmul.msk.f32.vlgmr.msrb.gmra.mxu2 %vm226_vm13, %v1936_v56 }
0x1226   :  { %v1964_v60 = vpop.permute.xlu0 %1963 }
0x1227   :  { %v1966_v61 = vpop.permute.xlu1 %1965 }
0x1228   :  { %2585 = vmatpush.xpose.msk.msrb.mxu1 %vm226_vm13, %v1966_v61  ;;  %v2607_v61 = vld [vmem:[%s3547_s6 + $0x50] sm:$0xff] }
0x122b   :  { %2586 = vmatmul.msk.f32.vlgmr.msrb.gmra.mxu1 %vm226_vm13, %v1964_v60  ;;  %v2608_v60 = vld [vmem:[%s3547_s6 + $0x58] sm:$0xff] }
0x122e   :  { %v2021_v62 = vpop.permute.xlu0 %2020 }
0x122f   :  { %v2049_v22 = vpop.permute.xlu1 %2048  ;;  %2589 = vmatpush.xpose.msk.msra.mxu2 %vm226_vm13, %v2021_v62  ;;  %v2606_v62 = vld [vmem:[%s3547_s6 + $0x48] sm:$0xff] }
0x1230   :  { %2591 = vmatpush.xpose.msk.msra.mxu3 %vm226_vm13, %v2049_v22  ;;  %v2605_v22 = vld [vmem:[%s3547_s6 + $0x40] sm:$0xff] }
0x1232   :  { %2590 = vmatmul.msk.f32.vlgmr.msra.gmra.mxu2 %vm226_vm13, %v3440_v8 }
0x1236   :  { %v2077_v63 = vpop.permute.xlu0 %2076 }
0x1237   :  { %v2047_v57 = vpop.permute.xlu1 %2046  ;;  %2593 = vmatpush.xpose.msk.msra.mxu1 %vm226_vm13, %v2077_v63 }
0x1238   :  { %2592 = vmatmul.msk.f32.vlgmr.msra.gmra.mxu3 %vm226_vm13, %v2047_v57 }
0x123e   :  { %v2103_v1 = vpop.permute.xlu0 %2102 }
0x123f   :  { %v2075_v2 = vpop.permute.xlu1 %2074  ;;  %2596 = vmatmul.msk.f32.vlgmr.msra.gmra.mxu0 %vm226_vm13, %v2103_v1 }
0x1240   :  { %2594 = vmatmul.msk.f32.vlgmr.msra.gmra.mxu1 %vm226_vm13, %v2075_v2 }
0x1246   :  { %v2204_v5 = vpop.permute.xlu0 %2203 }
0x1247   :  { %2223 = vmatpush.msrb.mxu3 %v2204_v5 }
0x124e   :  { %v2230_v13 = vpop.permute.xlu0 %2229 }
0x124f   :  { %2249 = vmatpush.msrb.mxu1 %v2230_v13 }
0x1256   :  { %v2256_v7 = vpop.permute.xlu0 %2255 }
0x1257   :  { %2275 = vmatpush.msrb.mxu0 %v2256_v7 }
0x125e   :  { %v2323_v19 = vpop.permute.xlu0 %2322 }
0x125f   :  { %2342 = vmatpush.msra.mxu3 %v2323_v19 }
0x1266   :  { %v2349_v18 = vpop.permute.xlu0 %2348 }
0x1267   :  { %2368 = vmatpush.msra.mxu1 %v2349_v18 }
0x126e   :  { %v2177_v9 = vpop.permute.xlu0 %2176 }
0x126f   :  { %2197 = vmatpush.msrb.mxu2 %v2177_v9 }
0x1287   :  { %v1932_v10 = vpop.f32.mrf.mxu0 }
0x1294   :  { %v2016_v14 = vpop.f32.mrf.mxu0 }
0x1295   :  { %v2137_v25 = vrot.slane %v2016_v14, 5 }
0x12a6   :  { %v1960_v24 = vpop.f32.mrf.mxu2 }
0x12a7   :  { %v2131_v11 = vrot.slane %v1960_v24, 7  ;;  %v2632_v24 = vld [vmem:[%s3543_s2] ss:$0 sm:$0xff]  ;;  %s3553_s2 = smov 128  }
0x12a8   :  { %v1988_v12 = vpop.f32.mrf.mxu1 }
0x12a9   :  { %v2134_v15 = vrot.slane %v1988_v12, 6  ;;  %v2152_v16 = vsel %vm2151_vm8, %v1932_v10, %v2131_v11 }
0x12ab   :  { %v2154_v20 = vsel %vm2153_vm10, %v2152_v16, %v2134_v15 }
0x12ac   :  { %v2156_v23 = vsel %vm2155_vm11, %v2154_v20, %v2137_v25  ;;  %v2426_v20 = vperm.slane %v3407_v3, 2 }
0x12b5   :  { %v2043_v17 = vpop.f32.mrf.mxu2 }
0x12b6   :  { %v2140_v21 = vrot.slane %v2043_v17, 4 }
0x12b8   :  { %v2157_v29 = vsel %vm59_vm0, %v2156_v23, %v2140_v21  ;;  %vm2451_vm0 = vcmask 254976  }
0x12bb   :  { %v2071_v26 = vpop.f32.mrf.mxu3 }
0x12bc   :  { %v2143_v27 = vrot.slane %v2071_v26, 3  ;;  %v2127_v28 = vpop.f32.mrf.mxu0 }
0x12bd   :  { %v2099_v30 = vpop.f32.mrf.mxu1  ;;  %v2149_v31 = vrot.slane %v2127_v28, 1 }
0x12be   :  { %v2159_v32 = vsel %vm2158_vm12, %v2157_v29, %v2143_v27  ;;  %v2146_v33 = vrot.slane %v2099_v30, 2 }
0x12c0   :  { %v2161_v34 = vsel %vm2160_vm9, %v2159_v32, %v2146_v33 }
0x12c1   :  { %v2162_v37 = vsel %vm90_vm4, %v2161_v34, %v2149_v31 }
0x12c2   :  { %v2163_v38 = vmul.f32 0.35355338, %v2162_v37 }
0x12c4   :  { %v2164_v39 = vadd.f32 %v2163_v38, %v60_v36 }
0x12c6   :  { %v2165_v42 = vsel %vm226_vm13, %v2164_v39, -inf }
0x12c7   :  { %2166 = vmax.xlane.f32.xlu2 %v2165_v42 }
0x12df   :  { %2374 = vrot.lane.b32.xlu2 %v3440_v8, %s2825_s1 }
0x133a   :  { %v2167_v43 = vpop.xlane.xlu2 %2166 }
0x133b   :  { %v2168_v44 = vsub.f32 %v2164_v39, %v2167_v43 }
0x133d   :  { %v2169_v35 = vmul.f32 1.442695, %v2168_v44 }
0x133f   :  { %2727 = vpow2.f32 %v2169_v35 }
0x1342   :  { %v2375_v41 = vpop.permute.xlu2 %2374 }
0x1343   :  { %2394 = vmatpush.msra.mxu0 %v2375_v41 }
0x1345   :  { %v2728_v45 = vpop.eup %2727 }
0x1346   :  { %v2171_v46 = vsel %vm226_vm13, %v2728_v45, 0.0 }
0x1347   :  { %2172 = vadd.xlane.f32.xlu1 %v2171_v46 }
0x1360   :  { %2296 = vrot.lane.b32.xlu1 %v3440_v8, %s2826_s25 }
0x13ba   :  { %v2173_v40 = vpop.xlane.xlu1 %2172 }
0x13bb   :  { %2729 = vrcp.f32 %v2173_v40 }
0x13c1   :  { %v2730_v51 = vpop.eup %2729 }
0x13c2   :  { %v2175_v47 = vmul.f32 %v2730_v51, %v2728_v45 }
0x13c4   :  { %2597 = vmatmul.msk.f32.vlgmr.msrb.gmra.mxu2 %vm226_vm13, %v2175_v47  ;;  %v2202_v6 = vrot.slane %v2175_v47, 1  ;;  %v2228_v48 = vrot.slane %v2175_v47, 2  ;;  %v2254_v49 = vrot.slane %v2175_v47, 3  ;;  %v2321_v50 = vrot.slane %v2175_v47, 5 }
0x13c5   :  { %v2347_v52 = vrot.slane %v2175_v47, 6  ;;  %v2373_v53 = vrot.slane %v2175_v47, 7  ;;  %v2295_v8 = vrot.slane %v2175_v47, 4 }
0x13c6   :  { %2598 = vmatmul.msk.f32.vlgmr.msrb.gmra.mxu3 %vm226_vm13, %v2202_v6  ;;  %2599 = vmatmul.msk.f32.vlgmr.msrb.gmra.mxu1 %vm226_vm13, %v2228_v48 }
0x13c7   :  { %2600 = vmatmul.msk.f32.vlgmr.msrb.gmra.mxu0 %vm226_vm13, %v2254_v49 }
0x13ce   :  { %2602 = vmatmul.msk.f32.vlgmr.msra.gmra.mxu3 %vm226_vm13, %v2321_v50  ;;  %2603 = vmatmul.msk.f32.vlgmr.msra.gmra.mxu1 %vm226_vm13, %v2347_v52 }
0x13cf   :  { %2604 = vmatmul.msk.f32.vlgmr.msra.gmra.mxu0 %vm226_vm13, %v2373_v53 }
0x13d2   :  { %v2297_v0 = vpop.permute.xlu1 %2296 }
0x13d3   :  { %2316 = vmatpush.msra.mxu2 %v2297_v0 }
0x13d4   :  { %2601 = vmatmul.msk.f32.vlgmr.msra.gmra.mxu2 %vm226_vm13, %v2295_v8 }
0x13d5   :  { %2442 = vmatpush.msrb.mxu2 %v2608_v60 }
0x13d7   :  { %2443 = vmatpush.msrb.mxu2 %v2607_v61 }
0x13d9   :  { %2444 = vmatpush.msrb.mxu2 %v2606_v62 }
0x13db   :  { %2445 = vmatpush.msrb.mxu2 %v2605_v22 }
0x1443   :  { %v2251_v54 = vpop.f32.mrf.mxu1 }
0x1444   :  { %2285 = vrot.lane.b32.xlu1 %v2251_v54, %s2829_s28  ;;  %v2277_v56 = vpop.f32.mrf.mxu0 }
0x1447   :  { %v2199_v57 = vpop.f32.mrf.mxu2 }
0x1449   :  { %v2225_v55 = vpop.f32.mrf.mxu3 }
0x144a   :  { %2281 = vrot.lane.b32.xlu2 %v2225_v55, %s2814_s19 }
0x144b   :  { %v2370_v4 = vpop.f32.mrf.mxu1 }
0x144c   :  { %2404 = vrot.lane.b32.xlu0 %v2370_v4, %s2829_s28  ;;  %v2396_v59 = vpop.f32.mrf.mxu0  ;;  %s2831_s28 = smov [#allocation5]  }
0x1451   :  { %v2344_v58 = vpop.f32.mrf.mxu3 }
0x1452   :  { %2289 = vrot.lane.b32.xlu2 %v2277_v56, %s2830_s29 }
0x1454   :  { %2400 = vrot.lane.b32.xlu0 %v2344_v58, %s2814_s19 }
0x1457   :  { %v2318_v5 = vpop.f32.mrf.mxu2 }
0x145c   :  { %2408 = vrot.lane.b32.xlu0 %v2396_v59, %s2830_s29  ;;  %s2457_s29 = sshll.u32 %s2831_s28, 4  ;;  %s2458_s29 = int_to_ptr.vmem [resolvable:$true] %s2457_s29 }
0x145d   :  { %2465 = dma.vmem_to_hbm [thread:$0]  %s2458_s29, 256, %s2460_s27, [#allocation4], %s3553_s2, %s3553_s2, %s2814_s19  }
0x14a4   :  { %v2282_v1 = vpop.permute.xlu2 %2281 }
0x14a5   :  { %v2292_v19 = vsel %vm226_vm13, %v2199_v57, %v2282_v1 }
0x14ac   :  { %v2290_v12 = vpop.permute.xlu2 %2289 }
0x14b6   :  { %v2286_v13 = vpop.permute.xlu1 %2285 }
0x14b7   :  { %v2293_v18 = vsel %vm667_vm14, %v2292_v19, %v2286_v13 }
0x14b8   :  { %v2294_v15 = vsel %vm669_vm15, %v2293_v18, %v2290_v12 }
0x14be   :  { %v2405_v63 = vpop.permute.xlu0 %2404 }
0x14c6   :  { %v2401_v2 = vpop.permute.xlu0 %2400 }
0x14c7   :  { %v2411_v7 = vsel %vm226_vm13, %v2318_v5, %v2401_v2 }
0x14c8   :  { %v2412_v9 = vsel %vm667_vm14, %v2411_v7, %v2405_v63 }
0x14ce   :  { %v2409_v10 = vpop.permute.xlu0 %2408 }
0x14cf   :  { %v2413_v11 = vsel %vm669_vm15, %v2412_v9, %v2409_v10 }
0x14d0   :  { %v2415_v14 = vrot.slane %v2413_v11, 7 }
0x14d2   :  { %v2417_v16 = vsel %vm2151_vm8, %v2294_v15, %v2415_v14 }
0x14d3   :  { %v2420_v17 = vadd.f32 %v2632_v24, %v2417_v16 }
0x14d5   :  { %2609 = vmatmul.msk.f32.vlgmr.msrb.gmra.mxu2 %vm128_vm5, %v2420_v17 }
0x1558   :  { %v2447_v21 = vpop.f32.mrf.mxu2 }
0x1559   :  { %v2448_v25 = vadd.f32 %v2447_v21, %v2426_v20 }
0x155b   :  { %2731 = vtanh.f32 %v2448_v25 }
0x1561   :  { %v2732_v26 = vpop.eup %2731 }
0x1562   :  { %2452 = vst.msk [vmem:[#allocation6] sm:$0x3] %vm2451_vm0, %v2732_v26 }
0x1563   :  { %2476 = dma.vmem_to_hbm [thread:$0]  %s2472_s24, 32, %s2474_s8, [#allocation7]  }
0x1564   :  { %2808 = dma.done.wait [#allocation4], 256  }
0x1565   :  { %2809 = vsyncadd [#allocation4], 4294967040 }
0x1566   :  { %2810 = dma.done.wait [#allocation7], 32  }
0x1567   :  { %2811 = vsyncadd [#allocation7], 4294967264 }
0x1568   :  { %2485 = vsyncpa [#allocation3], 1 }
0x1569   :  { %2486 = vsyncpa [#allocation4], 1 }
0x156a   :  { %2487 = vsyncpa [#allocation7], 1 }

</bundles_post_ra>
